<compile_context>
chip_gen: v6e
topology: v6e:2x2x1
jax: 0.10.0
libtpu: 0.0.40
codegen_flags: <defaults>
</compile_context>

<pallas_src>
import functools

import jax
import jax.numpy as jnp
import numpy as np
from jax import lax
from jax.experimental import pallas as pl
from jax.experimental.pallas import tpu as pltpu

BN_EPS = 1e-5


def basic_block3d_kernel(x_ref, w1_ref, g1_ref, b1_ref, w2_ref, g2_ref, b2_ref,
                         mask_ref, o_ref, col_ref, *, C, R, shifts, full_taps):
    """Fused BasicBlock3d forward on a (C, R) channels-first flattened block.

    col_ref   : (27*C, R) f32 VMEM scratch holding the stacked-tap (im2col) matrix.
    mask_ref  : (27, R) f32 per-tap validity masks (implements zero padding=1).
    shifts    : static tuple of 27 lane-roll amounts, one per (kd, kh, kw) tap.
    full_taps : static tuple of 27 bools; True => tap never touches padding.
    """
    x = x_ref[...]                      # (C, R) f32; also the residual
    inv_r = 1.0 / float(R)

    def conv3x3x3(act, w_ref):
        # Build the im2col matrix: row t*C + cin holds channel cin of the input,
        # lane-rolled for tap t and zeroed where the tap falls in the padding.
        # Each tap goes straight to VMEM (bounded vreg live ranges).
        for t, (sh, full) in enumerate(zip(shifts, full_taps)):
            tap = act if sh == 0 else pltpu.roll(act, shift=sh, axis=1)
            if not full:
                tap = tap * mask_ref[pl.ds(t, 1), :]
            col_ref[t * C:(t + 1) * C, :] = tap
        # Single MXU matmul per conv: (Cout, 27*Cin) @ (27*Cin, R),
        # bf16 operands (native MXU dtype), f32 accumulation.
        return jnp.dot(w_ref[...],
                       col_ref[...].astype(jnp.bfloat16),
                       preferred_element_type=jnp.float32)

    def batchnorm(y, g_ref, b_ref):
        # Training-mode BatchNorm3d (batch stats, biased variance) folded into
        # a per-channel scale/shift; one reduction pass over (C, R).
        mean = jnp.sum(y, axis=1, keepdims=True) * inv_r
        ex2 = jnp.sum(y * y, axis=1, keepdims=True) * inv_r
        var = ex2 - mean * mean
        scale = g_ref[...] * lax.rsqrt(var + BN_EPS)
        shift = b_ref[...] - mean * scale
        return y * scale + shift

    h = jnp.maximum(batchnorm(conv3x3x3(x, w1_ref), g1_ref, b1_ref), 0.0)
    h = batchnorm(conv3x3x3(h, w2_ref), g2_ref, b2_ref)
    o_ref[...] = jnp.maximum(h + x, 0.0)   # residual add (stride=1, no downsample)


def _taps_and_masks(N, D, H, W):
    """Static lane shifts + validity masks for a 3x3x3 conv, padding=1, stride=1."""
    R = N * D * H * W
    r = np.arange(R)
    wpos = r % W
    hpos = (r // W) % H
    dpos = (r // (W * H)) % D
    shifts, masks, full_taps = [], [], []
    for kd in range(3):
        for kh in range(3):
            for kw in range(3):
                dd, dh, dw = kd - 1, kh - 1, kw - 1
                valid = ((dpos + dd >= 0) & (dpos + dd < D) &
                         (hpos + dh >= 0) & (hpos + dh < H) &
                         (wpos + dw >= 0) & (wpos + dw < W))
                masks.append(valid.astype(np.float32))
                full_taps.append(bool(valid.all()))
                off = dd * H * W + dh * W + dw
                shifts.append(int((-off) % R))
    return tuple(shifts), tuple(full_taps), np.stack(masks, axis=0)


def basic_block3d(x_ncdhw, params):
    """x_ncdhw: (N, C, D, H, W) float32. Returns the same shape."""
    N, C, D, H, W = x_ncdhw.shape
    R = N * D * H * W
    x2d = jnp.transpose(x_ncdhw, (1, 0, 2, 3, 4)).reshape(C, R).astype(jnp.float32)

    shifts, full_taps, masks_np = _taps_and_masks(N, D, H, W)
    masks = jnp.asarray(masks_np)          # (27, R) f32

    def pack(w):
        # PyTorch OIDHW (Cout, Cin, 3,3,3) -> (Cout, kd, kh, kw, Cin)
        # -> (Cout, 27*Cin) bf16; column order t*Cin + cin matches the im2col
        # row order built in-kernel, and the contraction dim is lane-dense.
        return jnp.transpose(w, (0, 2, 3, 4, 1)).reshape(C, 27 * C).astype(jnp.bfloat16)

    def vec(p):
        return p.reshape(C, 1).astype(jnp.float32)

    kern = functools.partial(basic_block3d_kernel, C=C, R=R,
                             shifts=shifts, full_taps=full_taps)
    vmem = pl.BlockSpec(memory_space=pltpu.MemorySpace.VMEM)
    out2d = pl.pallas_call(
        kern,
        out_shape=jax.ShapeDtypeStruct((C, R), jnp.float32),
        in_specs=[vmem] * 8,
        out_specs=vmem,
        scratch_shapes=[pltpu.VMEM((27 * C, R), jnp.float32)],
    )(x2d,
      pack(params["w1"]), vec(params["g1"]), vec(params["b1"]),
      pack(params["w2"]), vec(params["g2"]), vec(params["b2"]),
      masks)

    return jnp.transpose(out2d.reshape(C, N, D, H, W), (1, 0, 2, 3, 4))


def reference(x, params):
    """Pure-JAX f32 reference matching the PyTorch module forward (training-mode BN)."""
    def conv(y, w):
        return lax.conv_general_dilated(
            y, w, window_strides=(1, 1, 1), padding=[(1, 1)] * 3,
            dimension_numbers=("NCDHW", "OIDHW", "NCDHW"),
            precision=lax.Precision.HIGHEST)

    def bn(y, g, b):
        mean = y.mean(axis=(0, 2, 3, 4), keepdims=True)
        var = ((y - mean) ** 2).mean(axis=(0, 2, 3, 4), keepdims=True)
        g = g.reshape(1, -1, 1, 1, 1)
        b = b.reshape(1, -1, 1, 1, 1)
        return (y - mean) / jnp.sqrt(var + BN_EPS) * g + b

    out = jax.nn.relu(bn(conv(x, params["w1"]), params["g1"], params["b1"]))
    out = bn(conv(out, params["w2"]), params["g2"], params["b2"])
    return jax.nn.relu(out + x)


if __name__ == "__main__":
    # Small shapes: batch=2, channels=8 (inplanes == planes), spatial 8^3.
    N, C, D, H, W = 2, 8, 8, 8, 8
    key = jax.random.PRNGKey(0)
    ks = jax.random.split(key, 7)
    x = jax.random.normal(ks[0], (N, C, D, H, W), jnp.float32)
    params = {
        "w1": 0.05 * jax.random.normal(ks[1], (C, C, 3, 3, 3), jnp.float32),
        "w2": 0.05 * jax.random.normal(ks[2], (C, C, 3, 3, 3), jnp.float32),
        "g1": 1.0 + 0.1 * jax.random.normal(ks[3], (C,), jnp.float32),
        "b1": 0.1 * jax.random.normal(ks[4], (C,), jnp.float32),
        "g2": 1.0 + 0.1 * jax.random.normal(ks[5], (C,), jnp.float32),
        "b2": 0.1 * jax.random.normal(ks[6], (C,), jnp.float32),
    }

    out = jax.block_until_ready(basic_block3d(x, params))
    ref = jax.block_until_ready(reference(x, params))
    assert out.shape == x.shape
    # Tolerances reflect bf16 MXU operands (f32 accumulation) vs the f32 HIGHEST
    # reference; observed error is ~1e-2 absolute worst case, ~3e-3 RMS.
    max_diff = float(jnp.max(jnp.abs(out - ref)))
    assert bool(jnp.allclose(out, ref, rtol=2e-2, atol=5e-2)), (
        f"max abs diff = {max_diff}")
    rel_rms = float(jnp.linalg.norm(out - ref) / (jnp.linalg.norm(ref) + 1e-12))
    assert rel_rms < 2e-2, f"relative RMS error = {rel_rms}"
    print("KERNEL_OK")
</pallas_src>

<mosaic_0001>
module attributes {stable_mosaic.version = 11 : i64} {
  func.func @basic_block3d_kernel(%arg0: memref<8x1024xf32, #tpu.memory_space<vmem>>, %arg1: memref<8x216xbf16, #tpu.memory_space<vmem>>, %arg2: memref<8x1xf32, #tpu.memory_space<vmem>>, %arg3: memref<8x1xf32, #tpu.memory_space<vmem>>, %arg4: memref<8x216xbf16, #tpu.memory_space<vmem>>, %arg5: memref<8x1xf32, #tpu.memory_space<vmem>>, %arg6: memref<8x1xf32, #tpu.memory_space<vmem>>, %arg7: memref<27x1024xf32, #tpu.memory_space<vmem>>, %arg8: memref<8x1024xf32, #tpu.memory_space<vmem>>, %arg9: memref<216x1024xf32, #tpu.memory_space<vmem>>) attributes {dimension_semantics = [], scalar_prefetch = 0 : i64, scratch_operands = 1 : i64, tpu.core_type = #tpu.core_type<tc>} {
    %c0 = arith.constant 0 : index
    %c0_0 = arith.constant 0 : index
    %0 = vector.load %arg0[%c0, %c0_0] : memref<8x1024xf32, #tpu.memory_space<vmem>>, vector<8x1024xf32>
    %c73_i32 = arith.constant 73 : i32
    %1 = tpu.dynamic_rotate %0 by %c73_i32 dim 1 : vector<8x1024xf32>, i32 -> vector<8x1024xf32>
    %c0_1 = arith.constant 0 : index
    %c0_2 = arith.constant 0 : index
    %2 = vector.load %arg7[%c0_1, %c0_2] : memref<27x1024xf32, #tpu.memory_space<vmem>>, vector<1x1024xf32>
    %3 = vector.broadcast %2 : vector<1x1024xf32> to vector<8x1024xf32>
    %4 = arith.mulf %1, %3 : vector<8x1024xf32>
    %c0_3 = arith.constant 0 : index
    %c0_4 = arith.constant 0 : index
    %5 = vector.load %arg9[%c0_3, %c0_4] : memref<216x1024xf32, #tpu.memory_space<vmem>>, vector<8x1024xf32>
    tpu.vector_store %arg9[%c0_3, %c0_4], %4 {strides = array<i32>} : memref<216x1024xf32, #tpu.memory_space<vmem>>, vector<8x1024xf32>,
    %c72_i32 = arith.constant 72 : i32
    %6 = tpu.dynamic_rotate %0 by %c72_i32 dim 1 : vector<8x1024xf32>, i32 -> vector<8x1024xf32>
    %c1 = arith.constant 1 : index
    %c0_5 = arith.constant 0 : index
    %7 = vector.load %arg7[%c1, %c0_5] : memref<27x1024xf32, #tpu.memory_space<vmem>>, vector<1x1024xf32>
    %8 = vector.broadcast %7 : vector<1x1024xf32> to vector<8x1024xf32>
    %9 = arith.mulf %6, %8 : vector<8x1024xf32>
    %c8 = arith.constant 8 : index
    %c0_6 = arith.constant 0 : index
    %10 = vector.load %arg9[%c8, %c0_6] : memref<216x1024xf32, #tpu.memory_space<vmem>>, vector<8x1024xf32>
    tpu.vector_store %arg9[%c8, %c0_6], %9 {strides = array<i32>} : memref<216x1024xf32, #tpu.memory_space<vmem>>, vector<8x1024xf32>,
    %c71_i32 = arith.constant 71 : i32
    %11 = tpu.dynamic_rotate %0 by %c71_i32 dim 1 : vector<8x1024xf32>, i32 -> vector<8x1024xf32>
    %c2 = arith.constant 2 : index
    %c0_7 = arith.constant 0 : index
    %12 = vector.load %arg7[%c2, %c0_7] : memref<27x1024xf32, #tpu.memory_space<vmem>>, vector<1x1024xf32>
    %13 = vector.broadcast %12 : vector<1x1024xf32> to vector<8x1024xf32>
    %14 = arith.mulf %11, %13 : vector<8x1024xf32>
    %c16 = arith.constant 16 : index
    %c0_8 = arith.constant 0 : index
    %15 = vector.load %arg9[%c16, %c0_8] : memref<216x1024xf32, #tpu.memory_space<vmem>>, vector<8x1024xf32>
    tpu.vector_store %arg9[%c16, %c0_8], %14 {strides = array<i32>} : memref<216x1024xf32, #tpu.memory_space<vmem>>, vector<8x1024xf32>,
    %c65_i32 = arith.constant 65 : i32
    %16 = tpu.dynamic_rotate %0 by %c65_i32 dim 1 : vector<8x1024xf32>, i32 -> vector<8x1024xf32>
    %c3 = arith.constant 3 : index
    %c0_9 = arith.constant 0 : index
    %17 = vector.load %arg7[%c3, %c0_9] : memref<27x1024xf32, #tpu.memory_space<vmem>>, vector<1x1024xf32>
    %18 = vector.broadcast %17 : vector<1x1024xf32> to vector<8x1024xf32>
    %19 = arith.mulf %16, %18 : vector<8x1024xf32>
    %c24 = arith.constant 24 : index
    %c0_10 = arith.constant 0 : index
    %20 = vector.load %arg9[%c24, %c0_10] : memref<216x1024xf32, #tpu.memory_space<vmem>>, vector<8x1024xf32>
    tpu.vector_store %arg9[%c24, %c0_10], %19 {strides = array<i32>} : memref<216x1024xf32, #tpu.memory_space<vmem>>, vector<8x1024xf32>,
    %c64_i32 = arith.constant 64 : i32
    %21 = tpu.dynamic_rotate %0 by %c64_i32 dim 1 : vector<8x1024xf32>, i32 -> vector<8x1024xf32>
    %c4 = arith.constant 4 : index
    %c0_11 = arith.constant 0 : index
    %22 = vector.load %arg7[%c4, %c0_11] : memref<27x1024xf32, #tpu.memory_space<vmem>>, vector<1x1024xf32>
    %23 = vector.broadcast %22 : vector<1x1024xf32> to vector<8x1024xf32>
    %24 = arith.mulf %21, %23 : vector<8x1024xf32>
    %c32 = arith.constant 32 : index
    %c0_12 = arith.constant 0 : index
    %25 = vector.load %arg9[%c32, %c0_12] : memref<216x1024xf32, #tpu.memory_space<vmem>>, vector<8x1024xf32>
    tpu.vector_store %arg9[%c32, %c0_12], %24 {strides = array<i32>} : memref<216x1024xf32, #tpu.memory_space<vmem>>, vector<8x1024xf32>,
    %c63_i32 = arith.constant 63 : i32
    %26 = tpu.dynamic_rotate %0 by %c63_i32 dim 1 : vector<8x1024xf32>, i32 -> vector<8x1024xf32>
    %c5 = arith.constant 5 : index
    %c0_13 = arith.constant 0 : index
    %27 = vector.load %arg7[%c5, %c0_13] : memref<27x1024xf32, #tpu.memory_space<vmem>>, vector<1x1024xf32>
    %28 = vector.broadcast %27 : vector<1x1024xf32> to vector<8x1024xf32>
    %29 = arith.mulf %26, %28 : vector<8x1024xf32>
    %c40 = arith.constant 40 : index
    %c0_14 = arith.constant 0 : index
    %30 = vector.load %arg9[%c40, %c0_14] : memref<216x1024xf32, #tpu.memory_space<vmem>>, vector<8x1024xf32>
    tpu.vector_store %arg9[%c40, %c0_14], %29 {strides = array<i32>} : memref<216x1024xf32, #tpu.memory_space<vmem>>, vector<8x1024xf32>,
    %c57_i32 = arith.constant 57 : i32
    %31 = tpu.dynamic_rotate %0 by %c57_i32 dim 1 : vector<8x1024xf32>, i32 -> vector<8x1024xf32>
    %c6 = arith.constant 6 : index
    %c0_15 = arith.constant 0 : index
    %32 = vector.load %arg7[%c6, %c0_15] : memref<27x1024xf32, #tpu.memory_space<vmem>>, vector<1x1024xf32>
    %33 = vector.broadcast %32 : vector<1x1024xf32> to vector<8x1024xf32>
    %34 = arith.mulf %31, %33 : vector<8x1024xf32>
    %c48 = arith.constant 48 : index
    %c0_16 = arith.constant 0 : index
    %35 = vector.load %arg9[%c48, %c0_16] : memref<216x1024xf32, #tpu.memory_space<vmem>>, vector<8x1024xf32>
    tpu.vector_store %arg9[%c48, %c0_16], %34 {strides = array<i32>} : memref<216x1024xf32, #tpu.memory_space<vmem>>, vector<8x1024xf32>,
    %c56_i32 = arith.constant 56 : i32
    %36 = tpu.dynamic_rotate %0 by %c56_i32 dim 1 : vector<8x1024xf32>, i32 -> vector<8x1024xf32>
    %c7 = arith.constant 7 : index
    %c0_17 = arith.constant 0 : index
    %37 = vector.load %arg7[%c7, %c0_17] : memref<27x1024xf32, #tpu.memory_space<vmem>>, vector<1x1024xf32>
    %38 = vector.broadcast %37 : vector<1x1024xf32> to vector<8x1024xf32>
    %39 = arith.mulf %36, %38 : vector<8x1024xf32>
    %c56 = arith.constant 56 : index
    %c0_18 = arith.constant 0 : index
    %40 = vector.load %arg9[%c56, %c0_18] : memref<216x1024xf32, #tpu.memory_space<vmem>>, vector<8x1024xf32>
    tpu.vector_store %arg9[%c56, %c0_18], %39 {strides = array<i32>} : memref<216x1024xf32, #tpu.memory_space<vmem>>, vector<8x1024xf32>,
    %c55_i32 = arith.constant 55 : i32
    %41 = tpu.dynamic_rotate %0 by %c55_i32 dim 1 : vector<8x1024xf32>, i32 -> vector<8x1024xf32>
    %c8_19 = arith.constant 8 : index
    %c0_20 = arith.constant 0 : index
    %42 = vector.load %arg7[%c8_19, %c0_20] : memref<27x1024xf32, #tpu.memory_space<vmem>>, vector<1x1024xf32>
    %43 = vector.broadcast %42 : vector<1x1024xf32> to vector<8x1024xf32>
    %44 = arith.mulf %41, %43 : vector<8x1024xf32>
    %c64 = arith.constant 64 : index
    %c0_21 = arith.constant 0 : index
    %45 = vector.load %arg9[%c64, %c0_21] : memref<216x1024xf32, #tpu.memory_space<vmem>>, vector<8x1024xf32>
    tpu.vector_store %arg9[%c64, %c0_21], %44 {strides = array<i32>} : memref<216x1024xf32, #tpu.memory_space<vmem>>, vector<8x1024xf32>,
    %c9_i32 = arith.constant 9 : i32
    %46 = tpu.dynamic_rotate %0 by %c9_i32 dim 1 : vector<8x1024xf32>, i32 -> vector<8x1024xf32>
    %c9 = arith.constant 9 : index
    %c0_22 = arith.constant 0 : index
    %47 = vector.load %arg7[%c9, %c0_22] : memref<27x1024xf32, #tpu.memory_space<vmem>>, vector<1x1024xf32>
    %48 = vector.broadcast %47 : vector<1x1024xf32> to vector<8x1024xf32>
    %49 = arith.mulf %46, %48 : vector<8x1024xf32>
    %c72 = arith.constant 72 : index
    %c0_23 = arith.constant 0 : index
    %50 = vector.load %arg9[%c72, %c0_23] : memref<216x1024xf32, #tpu.memory_space<vmem>>, vector<8x1024xf32>
    tpu.vector_store %arg9[%c72, %c0_23], %49 {strides = array<i32>} : memref<216x1024xf32, #tpu.memory_space<vmem>>, vector<8x1024xf32>,
    %c8_i32 = arith.constant 8 : i32
    %51 = tpu.dynamic_rotate %0 by %c8_i32 dim 1 : vector<8x1024xf32>, i32 -> vector<8x1024xf32>
    %c10 = arith.constant 10 : index
    %c0_24 = arith.constant 0 : index
    %52 = vector.load %arg7[%c10, %c0_24] : memref<27x1024xf32, #tpu.memory_space<vmem>>, vector<1x1024xf32>
    %53 = vector.broadcast %52 : vector<1x1024xf32> to vector<8x1024xf32>
    %54 = arith.mulf %51, %53 : vector<8x1024xf32>
    %c80 = arith.constant 80 : index
    %c0_25 = arith.constant 0 : index
    %55 = vector.load %arg9[%c80, %c0_25] : memref<216x1024xf32, #tpu.memory_space<vmem>>, vector<8x1024xf32>
    tpu.vector_store %arg9[%c80, %c0_25], %54 {strides = array<i32>} : memref<216x1024xf32, #tpu.memory_space<vmem>>, vector<8x1024xf32>,
    %c7_i32 = arith.constant 7 : i32
    %56 = tpu.dynamic_rotate %0 by %c7_i32 dim 1 : vector<8x1024xf32>, i32 -> vector<8x1024xf32>
    %c11 = arith.constant 11 : index
    %c0_26 = arith.constant 0 : index
    %57 = vector.load %arg7[%c11, %c0_26] : memref<27x1024xf32, #tpu.memory_space<vmem>>, vector<1x1024xf32>
    %58 = vector.broadcast %57 : vector<1x1024xf32> to vector<8x1024xf32>
    %59 = arith.mulf %56, %58 : vector<8x1024xf32>
    %c88 = arith.constant 88 : index
    %c0_27 = arith.constant 0 : index
    %60 = vector.load %arg9[%c88, %c0_27] : memref<216x1024xf32, #tpu.memory_space<vmem>>, vector<8x1024xf32>
    tpu.vector_store %arg9[%c88, %c0_27], %59 {strides = array<i32>} : memref<216x1024xf32, #tpu.memory_space<vmem>>, vector<8x1024xf32>,
    %c1_i32 = arith.constant 1 : i32
    %61 = tpu.dynamic_rotate %0 by %c1_i32 dim 1 : vector<8x1024xf32>, i32 -> vector<8x1024xf32>
    %c12 = arith.constant 12 : index
    %c0_28 = arith.constant 0 : index
    %62 = vector.load %arg7[%c12, %c0_28] : memref<27x1024xf32, #tpu.memory_space<vmem>>, vector<1x1024xf32>
    %63 = vector.broadcast %62 : vector<1x1024xf32> to vector<8x1024xf32>
    %64 = arith.mulf %61, %63 : vector<8x1024xf32>
    %c96 = arith.constant 96 : index
    %c0_29 = arith.constant 0 : index
    %65 = vector.load %arg9[%c96, %c0_29] : memref<216x1024xf32, #tpu.memory_space<vmem>>, vector<8x1024xf32>
    tpu.vector_store %arg9[%c96, %c0_29], %64 {strides = array<i32>} : memref<216x1024xf32, #tpu.memory_space<vmem>>, vector<8x1024xf32>,
    %c104 = arith.constant 104 : index
    %c0_30 = arith.constant 0 : index
    %66 = vector.load %arg9[%c104, %c0_30] : memref<216x1024xf32, #tpu.memory_space<vmem>>, vector<8x1024xf32>
    tpu.vector_store %arg9[%c104, %c0_30], %0 {strides = array<i32>} : memref<216x1024xf32, #tpu.memory_space<vmem>>, vector<8x1024xf32>,
    %c1023_i32 = arith.constant 1023 : i32
    %67 = tpu.dynamic_rotate %0 by %c1023_i32 dim 1 : vector<8x1024xf32>, i32 -> vector<8x1024xf32>
    %c14 = arith.constant 14 : index
    %c0_31 = arith.constant 0 : index
    %68 = vector.load %arg7[%c14, %c0_31] : memref<27x1024xf32, #tpu.memory_space<vmem>>, vector<1x1024xf32>
    %69 = vector.broadcast %68 : vector<1x1024xf32> to vector<8x1024xf32>
    %70 = arith.mulf %67, %69 : vector<8x1024xf32>
    %c112 = arith.constant 112 : index
    %c0_32 = arith.constant 0 : index
    %71 = vector.load %arg9[%c112, %c0_32] : memref<216x1024xf32, #tpu.memory_space<vmem>>, vector<8x1024xf32>
    tpu.vector_store %arg9[%c112, %c0_32], %70 {strides = array<i32>} : memref<216x1024xf32, #tpu.memory_space<vmem>>, vector<8x1024xf32>,
    %c1017_i32 = arith.constant 1017 : i32
    %72 = tpu.dynamic_rotate %0 by %c1017_i32 dim 1 : vector<8x1024xf32>, i32 -> vector<8x1024xf32>
    %c15 = arith.constant 15 : index
    %c0_33 = arith.constant 0 : index
    %73 = vector.load %arg7[%c15, %c0_33] : memref<27x1024xf32, #tpu.memory_space<vmem>>, vector<1x1024xf32>
    %74 = vector.broadcast %73 : vector<1x1024xf32> to vector<8x1024xf32>
    %75 = arith.mulf %72, %74 : vector<8x1024xf32>
    %c120 = arith.constant 120 : index
    %c0_34 = arith.constant 0 : index
    %76 = vector.load %arg9[%c120, %c0_34] : memref<216x1024xf32, #tpu.memory_space<vmem>>, vector<8x1024xf32>
    tpu.vector_store %arg9[%c120, %c0_34], %75 {strides = array<i32>} : memref<216x1024xf32, #tpu.memory_space<vmem>>, vector<8x1024xf32>,
    %c1016_i32 = arith.constant 1016 : i32
    %77 = tpu.dynamic_rotate %0 by %c1016_i32 dim 1 : vector<8x1024xf32>, i32 -> vector<8x1024xf32>
    %c16_35 = arith.constant 16 : index
    %c0_36 = arith.constant 0 : index
    %78 = vector.load %arg7[%c16_35, %c0_36] : memref<27x1024xf32, #tpu.memory_space<vmem>>, vector<1x1024xf32>
    %79 = vector.broadcast %78 : vector<1x1024xf32> to vector<8x1024xf32>
    %80 = arith.mulf %77, %79 : vector<8x1024xf32>
    %c128 = arith.constant 128 : index
    %c0_37 = arith.constant 0 : index
    %81 = vector.load %arg9[%c128, %c0_37] : memref<216x1024xf32, #tpu.memory_space<vmem>>, vector<8x1024xf32>
    tpu.vector_store %arg9[%c128, %c0_37], %80 {strides = array<i32>} : memref<216x1024xf32, #tpu.memory_space<vmem>>, vector<8x1024xf32>,
    %c1015_i32 = arith.constant 1015 : i32
    %82 = tpu.dynamic_rotate %0 by %c1015_i32 dim 1 : vector<8x1024xf32>, i32 -> vector<8x1024xf32>
    %c17 = arith.constant 17 : index
    %c0_38 = arith.constant 0 : index
    %83 = vector.load %arg7[%c17, %c0_38] : memref<27x1024xf32, #tpu.memory_space<vmem>>, vector<1x1024xf32>
    %84 = vector.broadcast %83 : vector<1x1024xf32> to vector<8x1024xf32>
    %85 = arith.mulf %82, %84 : vector<8x1024xf32>
    %c136 = arith.constant 136 : index
    %c0_39 = arith.constant 0 : index
    %86 = vector.load %arg9[%c136, %c0_39] : memref<216x1024xf32, #tpu.memory_space<vmem>>, vector<8x1024xf32>
    tpu.vector_store %arg9[%c136, %c0_39], %85 {strides = array<i32>} : memref<216x1024xf32, #tpu.memory_space<vmem>>, vector<8x1024xf32>,
    %c969_i32 = arith.constant 969 : i32
    %87 = tpu.dynamic_rotate %0 by %c969_i32 dim 1 : vector<8x1024xf32>, i32 -> vector<8x1024xf32>
    %c18 = arith.constant 18 : index
    %c0_40 = arith.constant 0 : index
    %88 = vector.load %arg7[%c18, %c0_40] : memref<27x1024xf32, #tpu.memory_space<vmem>>, vector<1x1024xf32>
    %89 = vector.broadcast %88 : vector<1x1024xf32> to vector<8x1024xf32>
    %90 = arith.mulf %87, %89 : vector<8x1024xf32>
    %c144 = arith.constant 144 : index
    %c0_41 = arith.constant 0 : index
    %91 = vector.load %arg9[%c144, %c0_41] : memref<216x1024xf32, #tpu.memory_space<vmem>>, vector<8x1024xf32>
    tpu.vector_store %arg9[%c144, %c0_41], %90 {strides = array<i32>} : memref<216x1024xf32, #tpu.memory_space<vmem>>, vector<8x1024xf32>,
    %c968_i32 = arith.constant 968 : i32
    %92 = tpu.dynamic_rotate %0 by %c968_i32 dim 1 : vector<8x1024xf32>, i32 -> vector<8x1024xf32>
    %c19 = arith.constant 19 : index
    %c0_42 = arith.constant 0 : index
    %93 = vector.load %arg7[%c19, %c0_42] : memref<27x1024xf32, #tpu.memory_space<vmem>>, vector<1x1024xf32>
    %94 = vector.broadcast %93 : vector<1x1024xf32> to vector<8x1024xf32>
    %95 = arith.mulf %92, %94 : vector<8x1024xf32>
    %c152 = arith.constant 152 : index
    %c0_43 = arith.constant 0 : index
    %96 = vector.load %arg9[%c152, %c0_43] : memref<216x1024xf32, #tpu.memory_space<vmem>>, vector<8x1024xf32>
    tpu.vector_store %arg9[%c152, %c0_43], %95 {strides = array<i32>} : memref<216x1024xf32, #tpu.memory_space<vmem>>, vector<8x1024xf32>,
    %c967_i32 = arith.constant 967 : i32
    %97 = tpu.dynamic_rotate %0 by %c967_i32 dim 1 : vector<8x1024xf32>, i32 -> vector<8x1024xf32>
    %c20 = arith.constant 20 : index
    %c0_44 = arith.constant 0 : index
    %98 = vector.load %arg7[%c20, %c0_44] : memref<27x1024xf32, #tpu.memory_space<vmem>>, vector<1x1024xf32>
    %99 = vector.broadcast %98 : vector<1x1024xf32> to vector<8x1024xf32>
    %100 = arith.mulf %97, %99 : vector<8x1024xf32>
    %c160 = arith.constant 160 : index
    %c0_45 = arith.constant 0 : index
    %101 = vector.load %arg9[%c160, %c0_45] : memref<216x1024xf32, #tpu.memory_space<vmem>>, vector<8x1024xf32>
    tpu.vector_store %arg9[%c160, %c0_45], %100 {strides = array<i32>} : memref<216x1024xf32, #tpu.memory_space<vmem>>, vector<8x1024xf32>,
    %c961_i32 = arith.constant 961 : i32
    %102 = tpu.dynamic_rotate %0 by %c961_i32 dim 1 : vector<8x1024xf32>, i32 -> vector<8x1024xf32>
    %c21 = arith.constant 21 : index
    %c0_46 = arith.constant 0 : index
    %103 = vector.load %arg7[%c21, %c0_46] : memref<27x1024xf32, #tpu.memory_space<vmem>>, vector<1x1024xf32>
    %104 = vector.broadcast %103 : vector<1x1024xf32> to vector<8x1024xf32>
    %105 = arith.mulf %102, %104 : vector<8x1024xf32>
    %c168 = arith.constant 168 : index
    %c0_47 = arith.constant 0 : index
    %106 = vector.load %arg9[%c168, %c0_47] : memref<216x1024xf32, #tpu.memory_space<vmem>>, vector<8x1024xf32>
    tpu.vector_store %arg9[%c168, %c0_47], %105 {strides = array<i32>} : memref<216x1024xf32, #tpu.memory_space<vmem>>, vector<8x1024xf32>,
    %c960_i32 = arith.constant 960 : i32
    %107 = tpu.dynamic_rotate %0 by %c960_i32 dim 1 : vector<8x1024xf32>, i32 -> vector<8x1024xf32>
    %c22 = arith.constant 22 : index
    %c0_48 = arith.constant 0 : index
    %108 = vector.load %arg7[%c22, %c0_48] : memref<27x1024xf32, #tpu.memory_space<vmem>>, vector<1x1024xf32>
    %109 = vector.broadcast %108 : vector<1x1024xf32> to vector<8x1024xf32>
    %110 = arith.mulf %107, %109 : vector<8x1024xf32>
    %c176 = arith.constant 176 : index
    %c0_49 = arith.constant 0 : index
    %111 = vector.load %arg9[%c176, %c0_49] : memref<216x1024xf32, #tpu.memory_space<vmem>>, vector<8x1024xf32>
    tpu.vector_store %arg9[%c176, %c0_49], %110 {strides = array<i32>} : memref<216x1024xf32, #tpu.memory_space<vmem>>, vector<8x1024xf32>,
    %c959_i32 = arith.constant 959 : i32
    %112 = tpu.dynamic_rotate %0 by %c959_i32 dim 1 : vector<8x1024xf32>, i32 -> vector<8x1024xf32>
    %c23 = arith.constant 23 : index
    %c0_50 = arith.constant 0 : index
    %113 = vector.load %arg7[%c23, %c0_50] : memref<27x1024xf32, #tpu.memory_space<vmem>>, vector<1x1024xf32>
    %114 = vector.broadcast %113 : vector<1x1024xf32> to vector<8x1024xf32>
    %115 = arith.mulf %112, %114 : vector<8x1024xf32>
    %c184 = arith.constant 184 : index
    %c0_51 = arith.constant 0 : index
    %116 = vector.load %arg9[%c184, %c0_51] : memref<216x1024xf32, #tpu.memory_space<vmem>>, vector<8x1024xf32>
    tpu.vector_store %arg9[%c184, %c0_51], %115 {strides = array<i32>} : memref<216x1024xf32, #tpu.memory_space<vmem>>, vector<8x1024xf32>,
    %c953_i32 = arith.constant 953 : i32
    %117 = tpu.dynamic_rotate %0 by %c953_i32 dim 1 : vector<8x1024xf32>, i32 -> vector<8x1024xf32>
    %c24_52 = arith.constant 24 : index
    %c0_53 = arith.constant 0 : index
    %118 = vector.load %arg7[%c24_52, %c0_53] : memref<27x1024xf32, #tpu.memory_space<vmem>>, vector<1x1024xf32>
    %119 = vector.broadcast %118 : vector<1x1024xf32> to vector<8x1024xf32>
    %120 = arith.mulf %117, %119 : vector<8x1024xf32>
    %c192 = arith.constant 192 : index
    %c0_54 = arith.constant 0 : index
    %121 = vector.load %arg9[%c192, %c0_54] : memref<216x1024xf32, #tpu.memory_space<vmem>>, vector<8x1024xf32>
    tpu.vector_store %arg9[%c192, %c0_54], %120 {strides = array<i32>} : memref<216x1024xf32, #tpu.memory_space<vmem>>, vector<8x1024xf32>,
    %c952_i32 = arith.constant 952 : i32
    %122 = tpu.dynamic_rotate %0 by %c952_i32 dim 1 : vector<8x1024xf32>, i32 -> vector<8x1024xf32>
    %c25 = arith.constant 25 : index
    %c0_55 = arith.constant 0 : index
    %123 = vector.load %arg7[%c25, %c0_55] : memref<27x1024xf32, #tpu.memory_space<vmem>>, vector<1x1024xf32>
    %124 = vector.broadcast %123 : vector<1x1024xf32> to vector<8x1024xf32>
    %125 = arith.mulf %122, %124 : vector<8x1024xf32>
    %c200 = arith.constant 200 : index
    %c0_56 = arith.constant 0 : index
    %126 = vector.load %arg9[%c200, %c0_56] : memref<216x1024xf32, #tpu.memory_space<vmem>>, vector<8x1024xf32>
    tpu.vector_store %arg9[%c200, %c0_56], %125 {strides = array<i32>} : memref<216x1024xf32, #tpu.memory_space<vmem>>, vector<8x1024xf32>,
    %c951_i32 = arith.constant 951 : i32
    %127 = tpu.dynamic_rotate %0 by %c951_i32 dim 1 : vector<8x1024xf32>, i32 -> vector<8x1024xf32>
    %c26 = arith.constant 26 : index
    %c0_57 = arith.constant 0 : index
    %128 = vector.load %arg7[%c26, %c0_57] : memref<27x1024xf32, #tpu.memory_space<vmem>>, vector<1x1024xf32>
    %129 = vector.broadcast %128 : vector<1x1024xf32> to vector<8x1024xf32>
    %130 = arith.mulf %127, %129 : vector<8x1024xf32>
    %c208 = arith.constant 208 : index
    %c0_58 = arith.constant 0 : index
    %131 = vector.load %arg9[%c208, %c0_58] : memref<216x1024xf32, #tpu.memory_space<vmem>>, vector<8x1024xf32>
    tpu.vector_store %arg9[%c208, %c0_58], %130 {strides = array<i32>} : memref<216x1024xf32, #tpu.memory_space<vmem>>, vector<8x1024xf32>,
    %c0_59 = arith.constant 0 : index
    %c0_60 = arith.constant 0 : index
    %132 = vector.load %arg1[%c0_59, %c0_60] : memref<8x216xbf16, #tpu.memory_space<vmem>>, vector<8x216xbf16>
    %c0_61 = arith.constant 0 : index
    %c0_62 = arith.constant 0 : index
    %133 = vector.load %arg9[%c0_61, %c0_62] : memref<216x1024xf32, #tpu.memory_space<vmem>>, vector<216x1024xf32>
    %134 = arith.truncf %133 : vector<216x1024xf32> to vector<216x1024xbf16>
    %cst = arith.constant dense<0.000000e+00> : vector<8x1024xf32>
    %135 = tpu.matmul %132, %134, %cst {dimension_numbers = #tpu.dot_dimension_numbers<[1], [0], [0], [1], [0, 0, 1, 1], [], []>} : vector<8x216xbf16>, vector<216x1024xbf16>, vector<8x1024xf32> -> vector<8x1024xf32>
    %cst_63 = arith.constant dense<0.000000e+00> : vector<8xf32>
    %136 = vector.multi_reduction <add>, %135, %cst_63 [1] : vector<8x1024xf32> to vector<8xf32>
    %137 = vector.shape_cast %136 : vector<8xf32> to vector<8x1xf32>
    %cst_64 = arith.constant 9.765625E-4 : f32
    %138 = vector.broadcast %cst_64 : f32 to vector<8x1xf32>
    %139 = arith.mulf %137, %138 : vector<8x1xf32>
    %140 = arith.mulf %135, %135 : vector<8x1024xf32>
    %cst_65 = arith.constant dense<0.000000e+00> : vector<8xf32>
    %141 = vector.multi_reduction <add>, %140, %cst_65 [1] : vector<8x1024xf32> to vector<8xf32>
    %142 = vector.shape_cast %141 : vector<8xf32> to vector<8x1xf32>
    %cst_66 = arith.constant 9.765625E-4 : f32
    %143 = vector.broadcast %cst_66 : f32 to vector<8x1xf32>
    %144 = arith.mulf %142, %143 : vector<8x1xf32>
    %145 = arith.mulf %139, %139 : vector<8x1xf32>
    %146 = arith.subf %144, %145 : vector<8x1xf32>
    %c0_67 = arith.constant 0 : index
    %c0_68 = arith.constant 0 : index
    %147 = vector.load %arg2[%c0_67, %c0_68] : memref<8x1xf32, #tpu.memory_space<vmem>>, vector<8x1xf32>
    %cst_69 = arith.constant 9.99999974E-6 : f32
    %148 = vector.broadcast %cst_69 : f32 to vector<8x1xf32>
    %149 = arith.addf %146, %148 : vector<8x1xf32>
    %150 = math.rsqrt %149 : vector<8x1xf32>
    %151 = arith.mulf %147, %150 : vector<8x1xf32>
    %c0_70 = arith.constant 0 : index
    %c0_71 = arith.constant 0 : index
    %152 = vector.load %arg3[%c0_70, %c0_71] : memref<8x1xf32, #tpu.memory_space<vmem>>, vector<8x1xf32>
    %153 = arith.mulf %139, %151 : vector<8x1xf32>
    %154 = arith.subf %152, %153 : vector<8x1xf32>
    %155 = vector.broadcast %151 : vector<8x1xf32> to vector<8x1024xf32>
    %156 = arith.mulf %135, %155 : vector<8x1024xf32>
    %157 = vector.broadcast %154 : vector<8x1xf32> to vector<8x1024xf32>
    %158 = arith.addf %156, %157 : vector<8x1024xf32>
    %cst_72 = arith.constant 0.000000e+00 : f32
    %159 = vector.broadcast %cst_72 : f32 to vector<8x1024xf32>
    %160 = arith.maximumf %158, %159 : vector<8x1024xf32>
    %c73_i32_73 = arith.constant 73 : i32
    %161 = tpu.dynamic_rotate %160 by %c73_i32_73 dim 1 : vector<8x1024xf32>, i32 -> vector<8x1024xf32>
    %c0_74 = arith.constant 0 : index
    %c0_75 = arith.constant 0 : index
    %162 = vector.load %arg7[%c0_74, %c0_75] : memref<27x1024xf32, #tpu.memory_space<vmem>>, vector<1x1024xf32>
    %163 = vector.broadcast %162 : vector<1x1024xf32> to vector<8x1024xf32>
    %164 = arith.mulf %161, %163 : vector<8x1024xf32>
    %c0_76 = arith.constant 0 : index
    %c0_77 = arith.constant 0 : index
    %165 = vector.load %arg9[%c0_76, %c0_77] : memref<216x1024xf32, #tpu.memory_space<vmem>>, vector<8x1024xf32>
    tpu.vector_store %arg9[%c0_76, %c0_77], %164 {strides = array<i32>} : memref<216x1024xf32, #tpu.memory_space<vmem>>, vector<8x1024xf32>,
    %c72_i32_78 = arith.constant 72 : i32
    %166 = tpu.dynamic_rotate %160 by %c72_i32_78 dim 1 : vector<8x1024xf32>, i32 -> vector<8x1024xf32>
    %c1_79 = arith.constant 1 : index
    %c0_80 = arith.constant 0 : index
    %167 = vector.load %arg7[%c1_79, %c0_80] : memref<27x1024xf32, #tpu.memory_space<vmem>>, vector<1x1024xf32>
    %168 = vector.broadcast %167 : vector<1x1024xf32> to vector<8x1024xf32>
    %169 = arith.mulf %166, %168 : vector<8x1024xf32>
    %c8_81 = arith.constant 8 : index
    %c0_82 = arith.constant 0 : index
    %170 = vector.load %arg9[%c8_81, %c0_82] : memref<216x1024xf32, #tpu.memory_space<vmem>>, vector<8x1024xf32>
    tpu.vector_store %arg9[%c8_81, %c0_82], %169 {strides = array<i32>} : memref<216x1024xf32, #tpu.memory_space<vmem>>, vector<8x1024xf32>,
    %c71_i32_83 = arith.constant 71 : i32
    %171 = tpu.dynamic_rotate %160 by %c71_i32_83 dim 1 : vector<8x1024xf32>, i32 -> vector<8x1024xf32>
    %c2_84 = arith.constant 2 : index
    %c0_85 = arith.constant 0 : index
    %172 = vector.load %arg7[%c2_84, %c0_85] : memref<27x1024xf32, #tpu.memory_space<vmem>>, vector<1x1024xf32>
    %173 = vector.broadcast %172 : vector<1x1024xf32> to vector<8x1024xf32>
    %174 = arith.mulf %171, %173 : vector<8x1024xf32>
    %c16_86 = arith.constant 16 : index
    %c0_87 = arith.constant 0 : index
    %175 = vector.load %arg9[%c16_86, %c0_87] : memref<216x1024xf32, #tpu.memory_space<vmem>>, vector<8x1024xf32>
    tpu.vector_store %arg9[%c16_86, %c0_87], %174 {strides = array<i32>} : memref<216x1024xf32, #tpu.memory_space<vmem>>, vector<8x1024xf32>,
    %c65_i32_88 = arith.constant 65 : i32
    %176 = tpu.dynamic_rotate %160 by %c65_i32_88 dim 1 : vector<8x1024xf32>, i32 -> vector<8x1024xf32>
    %c3_89 = arith.constant 3 : index
    %c0_90 = arith.constant 0 : index
    %177 = vector.load %arg7[%c3_89, %c0_90] : memref<27x1024xf32, #tpu.memory_space<vmem>>, vector<1x1024xf32>
    %178 = vector.broadcast %177 : vector<1x1024xf32> to vector<8x1024xf32>
    %179 = arith.mulf %176, %178 : vector<8x1024xf32>
    %c24_91 = arith.constant 24 : index
    %c0_92 = arith.constant 0 : index
    %180 = vector.load %arg9[%c24_91, %c0_92] : memref<216x1024xf32, #tpu.memory_space<vmem>>, vector<8x1024xf32>
    tpu.vector_store %arg9[%c24_91, %c0_92], %179 {strides = array<i32>} : memref<216x1024xf32, #tpu.memory_space<vmem>>, vector<8x1024xf32>,
    %c64_i32_93 = arith.constant 64 : i32
    %181 = tpu.dynamic_rotate %160 by %c64_i32_93 dim 1 : vector<8x1024xf32>, i32 -> vector<8x1024xf32>
    %c4_94 = arith.constant 4 : index
    %c0_95 = arith.constant 0 : index
    %182 = vector.load %arg7[%c4_94, %c0_95] : memref<27x1024xf32, #tpu.memory_space<vmem>>, vector<1x1024xf32>
    %183 = vector.broadcast %182 : vector<1x1024xf32> to vector<8x1024xf32>
    %184 = arith.mulf %181, %183 : vector<8x1024xf32>
    %c32_96 = arith.constant 32 : index
    %c0_97 = arith.constant 0 : index
    %185 = vector.load %arg9[%c32_96, %c0_97] : memref<216x1024xf32, #tpu.memory_space<vmem>>, vector<8x1024xf32>
    tpu.vector_store %arg9[%c32_96, %c0_97], %184 {strides = array<i32>} : memref<216x1024xf32, #tpu.memory_space<vmem>>, vector<8x1024xf32>,
    %c63_i32_98 = arith.constant 63 : i32
    %186 = tpu.dynamic_rotate %160 by %c63_i32_98 dim 1 : vector<8x1024xf32>, i32 -> vector<8x1024xf32>
    %c5_99 = arith.constant 5 : index
    %c0_100 = arith.constant 0 : index
    %187 = vector.load %arg7[%c5_99, %c0_100] : memref<27x1024xf32, #tpu.memory_space<vmem>>, vector<1x1024xf32>
    %188 = vector.broadcast %187 : vector<1x1024xf32> to vector<8x1024xf32>
    %189 = arith.mulf %186, %188 : vector<8x1024xf32>
    %c40_101 = arith.constant 40 : index
    %c0_102 = arith.constant 0 : index
    %190 = vector.load %arg9[%c40_101, %c0_102] : memref<216x1024xf32, #tpu.memory_space<vmem>>, vector<8x1024xf32>
    tpu.vector_store %arg9[%c40_101, %c0_102], %189 {strides = array<i32>} : memref<216x1024xf32, #tpu.memory_space<vmem>>, vector<8x1024xf32>,
    %c57_i32_103 = arith.constant 57 : i32
    %191 = tpu.dynamic_rotate %160 by %c57_i32_103 dim 1 : vector<8x1024xf32>, i32 -> vector<8x1024xf32>
    %c6_104 = arith.constant 6 : index
    %c0_105 = arith.constant 0 : index
    %192 = vector.load %arg7[%c6_104, %c0_105] : memref<27x1024xf32, #tpu.memory_space<vmem>>, vector<1x1024xf32>
    %193 = vector.broadcast %192 : vector<1x1024xf32> to vector<8x1024xf32>
    %194 = arith.mulf %191, %193 : vector<8x1024xf32>
    %c48_106 = arith.constant 48 : index
    %c0_107 = arith.constant 0 : index
    %195 = vector.load %arg9[%c48_106, %c0_107] : memref<216x1024xf32, #tpu.memory_space<vmem>>, vector<8x1024xf32>
    tpu.vector_store %arg9[%c48_106, %c0_107], %194 {strides = array<i32>} : memref<216x1024xf32, #tpu.memory_space<vmem>>, vector<8x1024xf32>,
    %c56_i32_108 = arith.constant 56 : i32
    %196 = tpu.dynamic_rotate %160 by %c56_i32_108 dim 1 : vector<8x1024xf32>, i32 -> vector<8x1024xf32>
    %c7_109 = arith.constant 7 : index
    %c0_110 = arith.constant 0 : index
    %197 = vector.load %arg7[%c7_109, %c0_110] : memref<27x1024xf32, #tpu.memory_space<vmem>>, vector<1x1024xf32>
    %198 = vector.broadcast %197 : vector<1x1024xf32> to vector<8x1024xf32>
    %199 = arith.mulf %196, %198 : vector<8x1024xf32>
    %c56_111 = arith.constant 56 : index
    %c0_112 = arith.constant 0 : index
    %200 = vector.load %arg9[%c56_111, %c0_112] : memref<216x1024xf32, #tpu.memory_space<vmem>>, vector<8x1024xf32>
    tpu.vector_store %arg9[%c56_111, %c0_112], %199 {strides = array<i32>} : memref<216x1024xf32, #tpu.memory_space<vmem>>, vector<8x1024xf32>,
    %c55_i32_113 = arith.constant 55 : i32
    %201 = tpu.dynamic_rotate %160 by %c55_i32_113 dim 1 : vector<8x1024xf32>, i32 -> vector<8x1024xf32>
    %c8_114 = arith.constant 8 : index
    %c0_115 = arith.constant 0 : index
    %202 = vector.load %arg7[%c8_114, %c0_115] : memref<27x1024xf32, #tpu.memory_space<vmem>>, vector<1x1024xf32>
    %203 = vector.broadcast %202 : vector<1x1024xf32> to vector<8x1024xf32>
    %204 = arith.mulf %201, %203 : vector<8x1024xf32>
    %c64_116 = arith.constant 64 : index
    %c0_117 = arith.constant 0 : index
    %205 = vector.load %arg9[%c64_116, %c0_117] : memref<216x1024xf32, #tpu.memory_space<vmem>>, vector<8x1024xf32>
    tpu.vector_store %arg9[%c64_116, %c0_117], %204 {strides = array<i32>} : memref<216x1024xf32, #tpu.memory_space<vmem>>, vector<8x1024xf32>,
    %c9_i32_118 = arith.constant 9 : i32
    %206 = tpu.dynamic_rotate %160 by %c9_i32_118 dim 1 : vector<8x1024xf32>, i32 -> vector<8x1024xf32>
    %c9_119 = arith.constant 9 : index
    %c0_120 = arith.constant 0 : index
    %207 = vector.load %arg7[%c9_119, %c0_120] : memref<27x1024xf32, #tpu.memory_space<vmem>>, vector<1x1024xf32>
    %208 = vector.broadcast %207 : vector<1x1024xf32> to vector<8x1024xf32>
    %209 = arith.mulf %206, %208 : vector<8x1024xf32>
    %c72_121 = arith.constant 72 : index
    %c0_122 = arith.constant 0 : index
    %210 = vector.load %arg9[%c72_121, %c0_122] : memref<216x1024xf32, #tpu.memory_space<vmem>>, vector<8x1024xf32>
    tpu.vector_store %arg9[%c72_121, %c0_122], %209 {strides = array<i32>} : memref<216x1024xf32, #tpu.memory_space<vmem>>, vector<8x1024xf32>,
    %c8_i32_123 = arith.constant 8 : i32
    %211 = tpu.dynamic_rotate %160 by %c8_i32_123 dim 1 : vector<8x1024xf32>, i32 -> vector<8x1024xf32>
    %c10_124 = arith.constant 10 : index
    %c0_125 = arith.constant 0 : index
    %212 = vector.load %arg7[%c10_124, %c0_125] : memref<27x1024xf32, #tpu.memory_space<vmem>>, vector<1x1024xf32>
    %213 = vector.broadcast %212 : vector<1x1024xf32> to vector<8x1024xf32>
    %214 = arith.mulf %211, %213 : vector<8x1024xf32>
    %c80_126 = arith.constant 80 : index
    %c0_127 = arith.constant 0 : index
    %215 = vector.load %arg9[%c80_126, %c0_127] : memref<216x1024xf32, #tpu.memory_space<vmem>>, vector<8x1024xf32>
    tpu.vector_store %arg9[%c80_126, %c0_127], %214 {strides = array<i32>} : memref<216x1024xf32, #tpu.memory_space<vmem>>, vector<8x1024xf32>,
    %c7_i32_128 = arith.constant 7 : i32
    %216 = tpu.dynamic_rotate %160 by %c7_i32_128 dim 1 : vector<8x1024xf32>, i32 -> vector<8x1024xf32>
    %c11_129 = arith.constant 11 : index
    %c0_130 = arith.constant 0 : index
    %217 = vector.load %arg7[%c11_129, %c0_130] : memref<27x1024xf32, #tpu.memory_space<vmem>>, vector<1x1024xf32>
    %218 = vector.broadcast %217 : vector<1x1024xf32> to vector<8x1024xf32>
    %219 = arith.mulf %216, %218 : vector<8x1024xf32>
    %c88_131 = arith.constant 88 : index
    %c0_132 = arith.constant 0 : index
    %220 = vector.load %arg9[%c88_131, %c0_132] : memref<216x1024xf32, #tpu.memory_space<vmem>>, vector<8x1024xf32>
    tpu.vector_store %arg9[%c88_131, %c0_132], %219 {strides = array<i32>} : memref<216x1024xf32, #tpu.memory_space<vmem>>, vector<8x1024xf32>,
    %c1_i32_133 = arith.constant 1 : i32
    %221 = tpu.dynamic_rotate %160 by %c1_i32_133 dim 1 : vector<8x1024xf32>, i32 -> vector<8x1024xf32>
    %c12_134 = arith.constant 12 : index
    %c0_135 = arith.constant 0 : index
    %222 = vector.load %arg7[%c12_134, %c0_135] : memref<27x1024xf32, #tpu.memory_space<vmem>>, vector<1x1024xf32>
    %223 = vector.broadcast %222 : vector<1x1024xf32> to vector<8x1024xf32>
    %224 = arith.mulf %221, %223 : vector<8x1024xf32>
    %c96_136 = arith.constant 96 : index
    %c0_137 = arith.constant 0 : index
    %225 = vector.load %arg9[%c96_136, %c0_137] : memref<216x1024xf32, #tpu.memory_space<vmem>>, vector<8x1024xf32>
    tpu.vector_store %arg9[%c96_136, %c0_137], %224 {strides = array<i32>} : memref<216x1024xf32, #tpu.memory_space<vmem>>, vector<8x1024xf32>,
    %c104_138 = arith.constant 104 : index
    %c0_139 = arith.constant 0 : index
    %226 = vector.load %arg9[%c104_138, %c0_139] : memref<216x1024xf32, #tpu.memory_space<vmem>>, vector<8x1024xf32>
    tpu.vector_store %arg9[%c104_138, %c0_139], %160 {strides = array<i32>} : memref<216x1024xf32, #tpu.memory_space<vmem>>, vector<8x1024xf32>,
    %c1023_i32_140 = arith.constant 1023 : i32
    %227 = tpu.dynamic_rotate %160 by %c1023_i32_140 dim 1 : vector<8x1024xf32>, i32 -> vector<8x1024xf32>
    %c14_141 = arith.constant 14 : index
    %c0_142 = arith.constant 0 : index
    %228 = vector.load %arg7[%c14_141, %c0_142] : memref<27x1024xf32, #tpu.memory_space<vmem>>, vector<1x1024xf32>
    %229 = vector.broadcast %228 : vector<1x1024xf32> to vector<8x1024xf32>
    %230 = arith.mulf %227, %229 : vector<8x1024xf32>
    %c112_143 = arith.constant 112 : index
    %c0_144 = arith.constant 0 : index
    %231 = vector.load %arg9[%c112_143, %c0_144] : memref<216x1024xf32, #tpu.memory_space<vmem>>, vector<8x1024xf32>
    tpu.vector_store %arg9[%c112_143, %c0_144], %230 {strides = array<i32>} : memref<216x1024xf32, #tpu.memory_space<vmem>>, vector<8x1024xf32>,
    %c1017_i32_145 = arith.constant 1017 : i32
    %232 = tpu.dynamic_rotate %160 by %c1017_i32_145 dim 1 : vector<8x1024xf32>, i32 -> vector<8x1024xf32>
    %c15_146 = arith.constant 15 : index
    %c0_147 = arith.constant 0 : index
    %233 = vector.load %arg7[%c15_146, %c0_147] : memref<27x1024xf32, #tpu.memory_space<vmem>>, vector<1x1024xf32>
    %234 = vector.broadcast %233 : vector<1x1024xf32> to vector<8x1024xf32>
    %235 = arith.mulf %232, %234 : vector<8x1024xf32>
    %c120_148 = arith.constant 120 : index
    %c0_149 = arith.constant 0 : index
    %236 = vector.load %arg9[%c120_148, %c0_149] : memref<216x1024xf32, #tpu.memory_space<vmem>>, vector<8x1024xf32>
    tpu.vector_store %arg9[%c120_148, %c0_149], %235 {strides = array<i32>} : memref<216x1024xf32, #tpu.memory_space<vmem>>, vector<8x1024xf32>,
    %c1016_i32_150 = arith.constant 1016 : i32
    %237 = tpu.dynamic_rotate %160 by %c1016_i32_150 dim 1 : vector<8x1024xf32>, i32 -> vector<8x1024xf32>
    %c16_151 = arith.constant 16 : index
    %c0_152 = arith.constant 0 : index
    %238 = vector.load %arg7[%c16_151, %c0_152] : memref<27x1024xf32, #tpu.memory_space<vmem>>, vector<1x1024xf32>
    %239 = vector.broadcast %238 : vector<1x1024xf32> to vector<8x1024xf32>
    %240 = arith.mulf %237, %239 : vector<8x1024xf32>
    %c128_153 = arith.constant 128 : index
    %c0_154 = arith.constant 0 : index
    %241 = vector.load %arg9[%c128_153, %c0_154] : memref<216x1024xf32, #tpu.memory_space<vmem>>, vector<8x1024xf32>
    tpu.vector_store %arg9[%c128_153, %c0_154], %240 {strides = array<i32>} : memref<216x1024xf32, #tpu.memory_space<vmem>>, vector<8x1024xf32>,
    %c1015_i32_155 = arith.constant 1015 : i32
    %242 = tpu.dynamic_rotate %160 by %c1015_i32_155 dim 1 : vector<8x1024xf32>, i32 -> vector<8x1024xf32>
    %c17_156 = arith.constant 17 : index
    %c0_157 = arith.constant 0 : index
    %243 = vector.load %arg7[%c17_156, %c0_157] : memref<27x1024xf32, #tpu.memory_space<vmem>>, vector<1x1024xf32>
    %244 = vector.broadcast %243 : vector<1x1024xf32> to vector<8x1024xf32>
    %245 = arith.mulf %242, %244 : vector<8x1024xf32>
    %c136_158 = arith.constant 136 : index
    %c0_159 = arith.constant 0 : index
    %246 = vector.load %arg9[%c136_158, %c0_159] : memref<216x1024xf32, #tpu.memory_space<vmem>>, vector<8x1024xf32>
    tpu.vector_store %arg9[%c136_158, %c0_159], %245 {strides = array<i32>} : memref<216x1024xf32, #tpu.memory_space<vmem>>, vector<8x1024xf32>,
    %c969_i32_160 = arith.constant 969 : i32
    %247 = tpu.dynamic_rotate %160 by %c969_i32_160 dim 1 : vector<8x1024xf32>, i32 -> vector<8x1024xf32>
    %c18_161 = arith.constant 18 : index
    %c0_162 = arith.constant 0 : index
    %248 = vector.load %arg7[%c18_161, %c0_162] : memref<27x1024xf32, #tpu.memory_space<vmem>>, vector<1x1024xf32>
    %249 = vector.broadcast %248 : vector<1x1024xf32> to vector<8x1024xf32>
    %250 = arith.mulf %247, %249 : vector<8x1024xf32>
    %c144_163 = arith.constant 144 : index
    %c0_164 = arith.constant 0 : index
    %251 = vector.load %arg9[%c144_163, %c0_164] : memref<216x1024xf32, #tpu.memory_space<vmem>>, vector<8x1024xf32>
    tpu.vector_store %arg9[%c144_163, %c0_164], %250 {strides = array<i32>} : memref<216x1024xf32, #tpu.memory_space<vmem>>, vector<8x1024xf32>,
    %c968_i32_165 = arith.constant 968 : i32
    %252 = tpu.dynamic_rotate %160 by %c968_i32_165 dim 1 : vector<8x1024xf32>, i32 -> vector<8x1024xf32>
    %c19_166 = arith.constant 19 : index
    %c0_167 = arith.constant 0 : index
    %253 = vector.load %arg7[%c19_166, %c0_167] : memref<27x1024xf32, #tpu.memory_space<vmem>>, vector<1x1024xf32>
    %254 = vector.broadcast %253 : vector<1x1024xf32> to vector<8x1024xf32>
    %255 = arith.mulf %252, %254 : vector<8x1024xf32>
    %c152_168 = arith.constant 152 : index
    %c0_169 = arith.constant 0 : index
    %256 = vector.load %arg9[%c152_168, %c0_169] : memref<216x1024xf32, #tpu.memory_space<vmem>>, vector<8x1024xf32>
    tpu.vector_store %arg9[%c152_168, %c0_169], %255 {strides = array<i32>} : memref<216x1024xf32, #tpu.memory_space<vmem>>, vector<8x1024xf32>,
    %c967_i32_170 = arith.constant 967 : i32
    %257 = tpu.dynamic_rotate %160 by %c967_i32_170 dim 1 : vector<8x1024xf32>, i32 -> vector<8x1024xf32>
    %c20_171 = arith.constant 20 : index
    %c0_172 = arith.constant 0 : index
    %258 = vector.load %arg7[%c20_171, %c0_172] : memref<27x1024xf32, #tpu.memory_space<vmem>>, vector<1x1024xf32>
    %259 = vector.broadcast %258 : vector<1x1024xf32> to vector<8x1024xf32>
    %260 = arith.mulf %257, %259 : vector<8x1024xf32>
    %c160_173 = arith.constant 160 : index
    %c0_174 = arith.constant 0 : index
    %261 = vector.load %arg9[%c160_173, %c0_174] : memref<216x1024xf32, #tpu.memory_space<vmem>>, vector<8x1024xf32>
    tpu.vector_store %arg9[%c160_173, %c0_174], %260 {strides = array<i32>} : memref<216x1024xf32, #tpu.memory_space<vmem>>, vector<8x1024xf32>,
    %c961_i32_175 = arith.constant 961 : i32
    %262 = tpu.dynamic_rotate %160 by %c961_i32_175 dim 1 : vector<8x1024xf32>, i32 -> vector<8x1024xf32>
    %c21_176 = arith.constant 21 : index
    %c0_177 = arith.constant 0 : index
    %263 = vector.load %arg7[%c21_176, %c0_177] : memref<27x1024xf32, #tpu.memory_space<vmem>>, vector<1x1024xf32>
    %264 = vector.broadcast %263 : vector<1x1024xf32> to vector<8x1024xf32>
    %265 = arith.mulf %262, %264 : vector<8x1024xf32>
    %c168_178 = arith.constant 168 : index
    %c0_179 = arith.constant 0 : index
    %266 = vector.load %arg9[%c168_178, %c0_179] : memref<216x1024xf32, #tpu.memory_space<vmem>>, vector<8x1024xf32>
    tpu.vector_store %arg9[%c168_178, %c0_179], %265 {strides = array<i32>} : memref<216x1024xf32, #tpu.memory_space<vmem>>, vector<8x1024xf32>,
    %c960_i32_180 = arith.constant 960 : i32
    %267 = tpu.dynamic_rotate %160 by %c960_i32_180 dim 1 : vector<8x1024xf32>, i32 -> vector<8x1024xf32>
    %c22_181 = arith.constant 22 : index
    %c0_182 = arith.constant 0 : index
    %268 = vector.load %arg7[%c22_181, %c0_182] : memref<27x1024xf32, #tpu.memory_space<vmem>>, vector<1x1024xf32>
    %269 = vector.broadcast %268 : vector<1x1024xf32> to vector<8x1024xf32>
    %270 = arith.mulf %267, %269 : vector<8x1024xf32>
    %c176_183 = arith.constant 176 : index
    %c0_184 = arith.constant 0 : index
    %271 = vector.load %arg9[%c176_183, %c0_184] : memref<216x1024xf32, #tpu.memory_space<vmem>>, vector<8x1024xf32>
    tpu.vector_store %arg9[%c176_183, %c0_184], %270 {strides = array<i32>} : memref<216x1024xf32, #tpu.memory_space<vmem>>, vector<8x1024xf32>,
    %c959_i32_185 = arith.constant 959 : i32
    %272 = tpu.dynamic_rotate %160 by %c959_i32_185 dim 1 : vector<8x1024xf32>, i32 -> vector<8x1024xf32>
    %c23_186 = arith.constant 23 : index
    %c0_187 = arith.constant 0 : index
    %273 = vector.load %arg7[%c23_186, %c0_187] : memref<27x1024xf32, #tpu.memory_space<vmem>>, vector<1x1024xf32>
    %274 = vector.broadcast %273 : vector<1x1024xf32> to vector<8x1024xf32>
    %275 = arith.mulf %272, %274 : vector<8x1024xf32>
    %c184_188 = arith.constant 184 : index
    %c0_189 = arith.constant 0 : index
    %276 = vector.load %arg9[%c184_188, %c0_189] : memref<216x1024xf32, #tpu.memory_space<vmem>>, vector<8x1024xf32>
    tpu.vector_store %arg9[%c184_188, %c0_189], %275 {strides = array<i32>} : memref<216x1024xf32, #tpu.memory_space<vmem>>, vector<8x1024xf32>,
    %c953_i32_190 = arith.constant 953 : i32
    %277 = tpu.dynamic_rotate %160 by %c953_i32_190 dim 1 : vector<8x1024xf32>, i32 -> vector<8x1024xf32>
    %c24_191 = arith.constant 24 : index
    %c0_192 = arith.constant 0 : index
    %278 = vector.load %arg7[%c24_191, %c0_192] : memref<27x1024xf32, #tpu.memory_space<vmem>>, vector<1x1024xf32>
    %279 = vector.broadcast %278 : vector<1x1024xf32> to vector<8x1024xf32>
    %280 = arith.mulf %277, %279 : vector<8x1024xf32>
    %c192_193 = arith.constant 192 : index
    %c0_194 = arith.constant 0 : index
    %281 = vector.load %arg9[%c192_193, %c0_194] : memref<216x1024xf32, #tpu.memory_space<vmem>>, vector<8x1024xf32>
    tpu.vector_store %arg9[%c192_193, %c0_194], %280 {strides = array<i32>} : memref<216x1024xf32, #tpu.memory_space<vmem>>, vector<8x1024xf32>,
    %c952_i32_195 = arith.constant 952 : i32
    %282 = tpu.dynamic_rotate %160 by %c952_i32_195 dim 1 : vector<8x1024xf32>, i32 -> vector<8x1024xf32>
    %c25_196 = arith.constant 25 : index
    %c0_197 = arith.constant 0 : index
    %283 = vector.load %arg7[%c25_196, %c0_197] : memref<27x1024xf32, #tpu.memory_space<vmem>>, vector<1x1024xf32>
    %284 = vector.broadcast %283 : vector<1x1024xf32> to vector<8x1024xf32>
    %285 = arith.mulf %282, %284 : vector<8x1024xf32>
    %c200_198 = arith.constant 200 : index
    %c0_199 = arith.constant 0 : index
    %286 = vector.load %arg9[%c200_198, %c0_199] : memref<216x1024xf32, #tpu.memory_space<vmem>>, vector<8x1024xf32>
    tpu.vector_store %arg9[%c200_198, %c0_199], %285 {strides = array<i32>} : memref<216x1024xf32, #tpu.memory_space<vmem>>, vector<8x1024xf32>,
    %c951_i32_200 = arith.constant 951 : i32
    %287 = tpu.dynamic_rotate %160 by %c951_i32_200 dim 1 : vector<8x1024xf32>, i32 -> vector<8x1024xf32>
    %c26_201 = arith.constant 26 : index
    %c0_202 = arith.constant 0 : index
    %288 = vector.load %arg7[%c26_201, %c0_202] : memref<27x1024xf32, #tpu.memory_space<vmem>>, vector<1x1024xf32>
    %289 = vector.broadcast %288 : vector<1x1024xf32> to vector<8x1024xf32>
    %290 = arith.mulf %287, %289 : vector<8x1024xf32>
    %c208_203 = arith.constant 208 : index
    %c0_204 = arith.constant 0 : index
    %291 = vector.load %arg9[%c208_203, %c0_204] : memref<216x1024xf32, #tpu.memory_space<vmem>>, vector<8x1024xf32>
    tpu.vector_store %arg9[%c208_203, %c0_204], %290 {strides = array<i32>} : memref<216x1024xf32, #tpu.memory_space<vmem>>, vector<8x1024xf32>,
    %c0_205 = arith.constant 0 : index
    %c0_206 = arith.constant 0 : index
    %292 = vector.load %arg4[%c0_205, %c0_206] : memref<8x216xbf16, #tpu.memory_space<vmem>>, vector<8x216xbf16>
    %c0_207 = arith.constant 0 : index
    %c0_208 = arith.constant 0 : index
    %293 = vector.load %arg9[%c0_207, %c0_208] : memref<216x1024xf32, #tpu.memory_space<vmem>>, vector<216x1024xf32>
    %294 = arith.truncf %293 : vector<216x1024xf32> to vector<216x1024xbf16>
    %cst_209 = arith.constant dense<0.000000e+00> : vector<8x1024xf32>
    %295 = tpu.matmul %292, %294, %cst_209 {dimension_numbers = #tpu.dot_dimension_numbers<[1], [0], [0], [1], [0, 0, 1, 1], [], []>} : vector<8x216xbf16>, vector<216x1024xbf16>, vector<8x1024xf32> -> vector<8x1024xf32>
    %cst_210 = arith.constant dense<0.000000e+00> : vector<8xf32>
    %296 = vector.multi_reduction <add>, %295, %cst_210 [1] : vector<8x1024xf32> to vector<8xf32>
    %297 = vector.shape_cast %296 : vector<8xf32> to vector<8x1xf32>
    %cst_211 = arith.constant 9.765625E-4 : f32
    %298 = vector.broadcast %cst_211 : f32 to vector<8x1xf32>
    %299 = arith.mulf %297, %298 : vector<8x1xf32>
    %300 = arith.mulf %295, %295 : vector<8x1024xf32>
    %cst_212 = arith.constant dense<0.000000e+00> : vector<8xf32>
    %301 = vector.multi_reduction <add>, %300, %cst_212 [1] : vector<8x1024xf32> to vector<8xf32>
    %302 = vector.shape_cast %301 : vector<8xf32> to vector<8x1xf32>
    %cst_213 = arith.constant 9.765625E-4 : f32
    %303 = vector.broadcast %cst_213 : f32 to vector<8x1xf32>
    %304 = arith.mulf %302, %303 : vector<8x1xf32>
    %305 = arith.mulf %299, %299 : vector<8x1xf32>
    %306 = arith.subf %304, %305 : vector<8x1xf32>
    %c0_214 = arith.constant 0 : index
    %c0_215 = arith.constant 0 : index
    %307 = vector.load %arg5[%c0_214, %c0_215] : memref<8x1xf32, #tpu.memory_space<vmem>>, vector<8x1xf32>
    %cst_216 = arith.constant 9.99999974E-6 : f32
    %308 = vector.broadcast %cst_216 : f32 to vector<8x1xf32>
    %309 = arith.addf %306, %308 : vector<8x1xf32>
    %310 = math.rsqrt %309 : vector<8x1xf32>
    %311 = arith.mulf %307, %310 : vector<8x1xf32>
    %c0_217 = arith.constant 0 : index
    %c0_218 = arith.constant 0 : index
    %312 = vector.load %arg6[%c0_217, %c0_218] : memref<8x1xf32, #tpu.memory_space<vmem>>, vector<8x1xf32>
    %313 = arith.mulf %299, %311 : vector<8x1xf32>
    %314 = arith.subf %312, %313 : vector<8x1xf32>
    %315 = vector.broadcast %311 : vector<8x1xf32> to vector<8x1024xf32>
    %316 = arith.mulf %295, %315 : vector<8x1024xf32>
    %317 = vector.broadcast %314 : vector<8x1xf32> to vector<8x1024xf32>
    %318 = arith.addf %316, %317 : vector<8x1024xf32>
    %319 = arith.addf %318, %0 : vector<8x1024xf32>
    %cst_219 = arith.constant 0.000000e+00 : f32
    %320 = vector.broadcast %cst_219 : f32 to vector<8x1024xf32>
    %321 = arith.maximumf %319, %320 : vector<8x1024xf32>
    %c0_220 = arith.constant 0 : index
    %c0_221 = arith.constant 0 : index
    %322 = vector.load %arg8[%c0_220, %c0_221] : memref<8x1024xf32, #tpu.memory_space<vmem>>, vector<8x1024xf32>
    tpu.vector_store %arg8[%c0_220, %c0_221], %321 {strides = array<i32>} : memref<8x1024xf32, #tpu.memory_space<vmem>>, vector<8x1024xf32>,
    return
  }
}

</mosaic_0001>

<bundles_post_ra>
// kernel: tpu_custom_call.1
= control target key start
LH: loop header
LB: loop body
LE: loop exit
PB: predicated region body
PF: predicated region fallthrough
CT: control target
= control target key end

     0   :  { %13 = vsyncpa [#allocation4], 0  ;;  %s9128_s0 = inlined_call_operand.hbm [shape: f32[8,1024], index: 0, kind: input, shape index: {}]   ;;  %s9129_s1 = inlined_call_operand.vmem [shape: bf16[8,216], index: 1, kind: input, shape index: {}]   ;;  %s9130_s2 = inlined_call_operand.vmem [shape: f32[8,1], index: 2, kind: input, shape index: {}]   ;;  %s9131_s3 = inlined_call_operand.vmem [shape: f32[8,1], index: 3, kind: input, shape index: {}]   ;;  %s9132_s4 = inlined_call_operand.vmem [shape: bf16[8,216], index: 4, kind: input, shape index: {}]   ;;  %s9133_s5 = inlined_call_operand.vmem [shape: f32[8,1], index: 5, kind: input, shape index: {}]   ;;  %s9134_s6 = inlined_call_operand.vmem [shape: f32[8,1], index: 6, kind: input, shape index: {}]   ;;  %s9135_s7 = inlined_call_operand.hbm [shape: f32[27,1024], index: 7, kind: input, shape index: {}]   ;;  %s9136_s8 = inlined_call_operand.hbm [shape: f32[8,1024], index: 8, kind: output, shape index: {}]  }
   0x1   :  { %14 = vsyncpa [#allocation7], 0 }
   0x2   :  { %15 = vsyncpa [#allocation5], 0  ;;  %s5419_s27 = smov [#allocation3]   ;;  %s5420_s29 = smov [#allocation6]  }
   0x3   :  { %s22_s28 = sshll.u32 %s5419_s27, 4  ;;  %s43_s30 = sshll.u32 %s5420_s29, 4  ;;  %s23_s28 = int_to_ptr.vmem [resolvable:$true] %s22_s28  ;;  %s44_s30 = int_to_ptr.vmem [resolvable:$true] %s43_s30 }
   0x4   :  { %s5361_s9 = scalar_lea.vmem %s23_s28, 1024  ;;  %p5366_p1 = scmp.lt.s32.totalorder %s23_s28, %s23_s28 }
   0x5   :  { %p5362_p0 = scmp.ne.s32.totalorder %s23_s28, %s5361_s9  ;;  %p5367_p2 = scmp.lt.s32.totalorder %s5361_s9, %s5361_s9 }
   0x7   :  { %p5368_p3 = por %p5367_p2, %p5366_p1 }
   0x9   :  { %p5369_p4 = pnand %p5368_p3, %p5362_p0 }
   0xb   :  { %5372 = shalt.err (!%p5369_p4)
}
   0xc   :  { %25 = dma.hbm_to_vmem [thread:$0]  %s9128_s0, 1024, %s23_s28, [#allocation4]  }
   0xd   :  { %s5381_s12 = scalar_lea.vmem %s44_s30, 4096  ;;  %p5386_p6 = scmp.lt.s32.totalorder %s44_s30, %s44_s30 }
   0xe   :  { %p5382_p5 = scmp.ne.s32.totalorder %s44_s30, %s5381_s12  ;;  %p5387_p7 = scmp.lt.s32.totalorder %s5381_s12, %s5381_s12 }
  0x10   :  { %p5388_p8 = por %p5387_p7, %p5386_p6 }
  0x12   :  { %p5389_p9 = pnand %p5388_p8, %p5382_p5 }
  0x14   :  { %5392 = shalt.err (!%p5389_p9)
}
  0x15   :  { %s5421_s13 = smov 1024   ;;  %s5422_s14 = smov 64  }
  0x16   :  { %49 = dma.hbm_to_vmem [thread:$0]  %s9135_s7, 4096, %s44_s30, [#allocation7], %s5421_s13, %s5421_s13, %s5422_s14  }
  0x17   :  { %5413 = dma.done.wait [#allocation4], 1024  }
  0x18   :  { %5414 = vsyncadd [#allocation4], 4294966272 }
  0x19   :  { %5415 = dma.done.wait [#allocation7], 4096  }
  0x1a   :  { %5416 = vsyncadd [#allocation7], 4294963200  ;;  %v5493_v0 = vld [vmem:[#allocation3 + $0x8] sm:$0xff]  ;;  %s5423_s0 = smov 121   ;;  %s5424_s17 = smov 127   ;;  %v5499_v1 = vld [vmem:[#allocation3 + $0x10] sm:$0xff]  ;;  %v81_v6 = vlaneseq }
  0x1b   :  { %1280 = vrot.lane.b32.xlu1 %v5493_v0, %s5423_s0  ;;  %1194 = vrot.lane.b32.xlu0 %v5493_v0, %s5424_s17  ;;  %v5505_v2 = vld [vmem:[#allocation3] sm:$0xff]  ;;  %s5425_s7 = smov 1   ;;  %v5517_v4 = vld [vmem:[#allocation3 + $0x18] sm:$0xff]  ;;  %s5426_s18 = smov 8   ;;  %vm9235_vm7 = vcmask 719872  }
  0x1c   :  { %v5515_v3 = vld [vmem:[#allocation3 + $0x20] sm:$0xff]  ;;  %v5527_v5 = vld [vmem:[#allocation3 + $0x38] sm:$0xff]  ;;  %s5427_s19 = smov 7   ;;  %s5428_s20 = smov 55   ;;  %v5613_v7 = vshrl.u32 %v81_v6, 7  ;;  %v5619_v12 = vand.u32 127, %v81_v6 }
  0x1d   :  { %s5429_s21 = smov 9   ;;  %s5430_s22 = smov 57   ;;  %v1218_v8 = vld [vmem:[#allocation6 + $0x46] ss:$8 sm:$0xf] }
  0x1e   :  { %s5431_s23 = smov 56   ;;  %s5432_s24 = smov 63   ;;  %9351 = vst [vmem:[#allocation12_spill] sm:$0xff] %v5613_v7  ;;  %v1219_v9 = vld [vmem:[#allocation6 + $0x46] ss:$8 sm:$0xf0] }
  0x1f   :  { %1282 = vrot.lane.b32.xlu1 %v5499_v1, %s5423_s0  ;;  %1196 = vrot.lane.b32.xlu0 %v5499_v1, %s5424_s17  ;;  %s5433_s25 = smov 71   ;;  %s5434_s26 = smov 65   ;;  %v1304_v10 = vld [vmem:[#allocation6 + $0x47] ss:$8 sm:$0xf]  ;;  %v5626_v13 = vsub.s32 1, %v5613_v7  ;;  %v5628_v14 = vor.u32 %v1219_v9, %v1218_v8 }
  0x20   :  { %v1305_v11 = vld [vmem:[#allocation6 + $0x47] ss:$8 sm:$0xf0]  ;;  %v5633_v18 = vsub.s32 0, %v5613_v7  ;;  %vm1294_vm0 = vcmp.lt.s32.totalorder %v5619_v12, 121  ;;  %vm1208_vm1 = vcmp.lt.s32.totalorder %v5619_v12, 127 }
  0x21   :  { %9352 = vst [vmem:[#allocation13_spill] sm:$0xff] %v5626_v13  ;;  %9353 = vst [vmem:[#allocation14_spill] sm:$0xff] %v5628_v14  ;;  %v5630_v15 = vor.u32 %v1305_v11, %v1304_v10  ;;  %v1229_v19 = vrot.slane %v5628_v14, %v5626_v13  ;;  %v1124_v21 = vld [vmem:[#allocation6 + $0x44] ss:$8 sm:$0xf]  ;;  %s5435_s27 = smov 73  }
  0x22   :  { %9355 = vst [vmem:[#allocation16_spill] sm:$0xff] %v5633_v18  ;;  %v1125_v22 = vld [vmem:[#allocation6 + $0x44] ss:$8 sm:$0xf0]  ;;  %v1225_v28 = vrot.slane %v5628_v14, %v5633_v18  ;;  %s5436_s28 = smov 72   ;;  %vm9236_vm2 = vcmp.lt.s32.totalorder %v5619_v12, 1 }
  0x23   :  { %1278 = vrot.lane.b32.xlu1 %v5505_v2, %s5423_s0  ;;  %1192 = vrot.lane.b32.xlu0 %v5505_v2, %s5424_s17  ;;  %9354 = vst [vmem:[#allocation15_spill] sm:$0xff] %v5630_v15  ;;  %v1315_v20 = vrot.slane %v5630_v15, %v5626_v13  ;;  %v5649_v27 = vor.u32 %v1125_v22, %v1124_v21  ;;  %v5679_v43 = vsub.s32 3, %v5613_v7  ;;  %v5685_v45 = vsub.s32 2, %v5613_v7  ;;  %v952_v8 = vld [vmem:[#allocation6 + $0x42] ss:$8 sm:$0xf] }
  0x24   :  { %v1311_v31 = vrot.slane %v5630_v15, %v5633_v18  ;;  %v953_v9 = vld [vmem:[#allocation6 + $0x42] ss:$8 sm:$0xf0]  ;;  %v1038_v10 = vld [vmem:[#allocation6 + $0x43] ss:$8 sm:$0xf] }
  0x25   :  { %9356 = vst [vmem:[#allocation17_spill] sm:$0xff] %v5649_v27  ;;  %v1135_v37 = vrot.slane %v5649_v27, %v5626_v13  ;;  %9359 = vst [vmem:[#allocation20_spill] sm:$0xff] %v5679_v43  ;;  %v1237_v50 = vrot.slane %v5628_v14, %v5679_v43  ;;  %v1323_v51 = vrot.slane %v5630_v15, %v5679_v43  ;;  %v1039_v11 = vld [vmem:[#allocation6 + $0x43] ss:$8 sm:$0xf0]  ;;  %vm942_vm3 = vcmp.lt.s32.totalorder %v5619_v12, 8 }
  0x26   :  { %9360 = vst [vmem:[#allocation21_spill] sm:$0xff] %v5685_v45  ;;  %v1233_v52 = vrot.slane %v5628_v14, %v5685_v45  ;;  %v1319_v53 = vrot.slane %v5630_v15, %v5685_v45  ;;  %v1131_v59 = vrot.slane %v5649_v27, %v5633_v18  ;;  %vm1028_vm4 = vcmp.lt.s32.totalorder %v5619_v12, 7  ;;  %s5437_s29 = smov 120   ;;  %s5438_s30 = smov 119  }
  0x27   :  { %1100 = vrot.lane.b32.xlu1 %v5493_v0, %s5425_s7  ;;  %1098 = vrot.lane.b32.xlu0 %v5505_v2, %s5425_s7  ;;  %vm770_vm5 = vcmp.lt.s32.totalorder %v5619_v12, 55  ;;  %vm9204_vm6 = vcmp.lt.s32.totalorder %v5619_v12, 9  ;;  %vm598_vm8 = vcmp.lt.s32.totalorder %v5619_v12, 57  ;;  %vm684_vm9 = vcmp.lt.s32.totalorder %v5619_v12, 56 }
  0x28   :  { %vm426_vm10 = vcmp.lt.s32.totalorder %v5619_v12, 64  ;;  %vm512_vm11 = vcmp.lt.s32.totalorder %v5619_v12, 63  ;;  %vm254_vm12 = vcmp.lt.s32.totalorder %v5619_v12, 71  ;;  %vm9241_vm13 = vcmp.lt.s32.totalorder %v5619_v12, 65 }
  0x29   :  { %v93_v15 = vld [vmem:[#allocation6] ss:$8 sm:$0xf0]  ;;  %vm9218_vm14 = vcmp.lt.s32.totalorder %v5619_v12, 73  ;;  %vm9240_vm15 = vcmp.lt.s32.totalorder %v5619_v12, 72 }
  0x2b   :  { %1200 = vrot.lane.b32.xlu1 %v5515_v3, %s5424_s17  ;;  %1198 = vrot.lane.b32.xlu0 %v5517_v4, %s5424_s17 }
  0x2f   :  { %1286 = vrot.lane.b32.xlu1 %v5515_v3, %s5423_s0  ;;  %1284 = vrot.lane.b32.xlu0 %v5517_v4, %s5423_s0 }
  0x33   :  { %926 = vrot.lane.b32.xlu1 %v5505_v2, %s5426_s18  ;;  %1112 = vrot.lane.b32.xlu0 %v5527_v5, %s5425_s7 }
  0x37   :  { %1012 = vrot.lane.b32.xlu1 %v5505_v2, %s5427_s19  ;;  %928 = vrot.lane.b32.xlu0 %v5493_v0, %s5426_s18 }
  0x3b   :  { %1102 = vrot.lane.b32.xlu1 %v5499_v1, %s5425_s7  ;;  %1014 = vrot.lane.b32.xlu0 %v5493_v0, %s5427_s19 }
  0x3f   :  { %940 = vrot.lane.b32.xlu1 %v5527_v5, %s5426_s18  ;;  %1104 = vrot.lane.b32.xlu0 %v5517_v4, %s5425_s7 }
  0x43   :  { %754 = vrot.lane.b32.xlu1 %v5505_v2, %s5428_s20  ;;  %1026 = vrot.lane.b32.xlu0 %v5527_v5, %s5427_s19 }
  0x47   :  { %840 = vrot.lane.b32.xlu1 %v5505_v2, %s5429_s21  ;;  %756 = vrot.lane.b32.xlu0 %v5493_v0, %s5428_s20 }
  0x4b   :  { %930 = vrot.lane.b32.xlu1 %v5499_v1, %s5426_s18  ;;  %842 = vrot.lane.b32.xlu0 %v5493_v0, %s5429_s21 }
  0x4f   :  { %1016 = vrot.lane.b32.xlu1 %v5499_v1, %s5427_s19  ;;  %932 = vrot.lane.b32.xlu0 %v5517_v4, %s5426_s18 }
  0x53   :  { %768 = vrot.lane.b32.xlu1 %v5527_v5, %s5428_s20  ;;  %1018 = vrot.lane.b32.xlu0 %v5517_v4, %s5427_s19 }
  0x57   :  { %582 = vrot.lane.b32.xlu1 %v5505_v2, %s5430_s22  ;;  %854 = vrot.lane.b32.xlu0 %v5527_v5, %s5429_s21 }
  0x5b   :  { %668 = vrot.lane.b32.xlu1 %v5505_v2, %s5431_s23  ;;  %584 = vrot.lane.b32.xlu0 %v5493_v0, %s5430_s22 }
  0x5f   :  { %758 = vrot.lane.b32.xlu1 %v5499_v1, %s5428_s20  ;;  %670 = vrot.lane.b32.xlu0 %v5493_v0, %s5431_s23 }
  0x63   :  { %844 = vrot.lane.b32.xlu1 %v5499_v1, %s5429_s21  ;;  %760 = vrot.lane.b32.xlu0 %v5517_v4, %s5428_s20 }
  0x67   :  { %596 = vrot.lane.b32.xlu1 %v5527_v5, %s5430_s22  ;;  %846 = vrot.lane.b32.xlu0 %v5517_v4, %s5429_s21 }
  0x6b   :  { %410 = vrot.lane.b32.xlu1 %v5505_v2, %s5422_s14  ;;  %682 = vrot.lane.b32.xlu0 %v5527_v5, %s5431_s23 }
  0x6f   :  { %496 = vrot.lane.b32.xlu1 %v5505_v2, %s5432_s24  ;;  %412 = vrot.lane.b32.xlu0 %v5493_v0, %s5422_s14 }
  0x73   :  { %586 = vrot.lane.b32.xlu1 %v5499_v1, %s5430_s22  ;;  %498 = vrot.lane.b32.xlu0 %v5493_v0, %s5432_s24 }
  0x77   :  { %672 = vrot.lane.b32.xlu1 %v5499_v1, %s5431_s23  ;;  %588 = vrot.lane.b32.xlu0 %v5517_v4, %s5430_s22 }
  0x7b   :  { %424 = vrot.lane.b32.xlu1 %v5527_v5, %s5422_s14  ;;  %674 = vrot.lane.b32.xlu0 %v5517_v4, %s5431_s23 }
  0x7f   :  { %238 = vrot.lane.b32.xlu1 %v5505_v2, %s5433_s25  ;;  %510 = vrot.lane.b32.xlu0 %v5527_v5, %s5432_s24 }
  0x83   :  { %324 = vrot.lane.b32.xlu1 %v5505_v2, %s5434_s26  ;;  %240 = vrot.lane.b32.xlu0 %v5493_v0, %s5433_s25 }
  0x87   :  { %414 = vrot.lane.b32.xlu1 %v5499_v1, %s5422_s14  ;;  %326 = vrot.lane.b32.xlu0 %v5493_v0, %s5434_s26 }
  0x8b   :  { %500 = vrot.lane.b32.xlu1 %v5499_v1, %s5432_s24  ;;  %416 = vrot.lane.b32.xlu0 %v5517_v4, %s5422_s14 }
  0x8d   :  { %v1281_v16 = vpop.permute.xlu1 %1280  ;;  %v1195_v17 = vpop.permute.xlu0 %1194 }
  0x8f   :  { %252 = vrot.lane.b32.xlu1 %v5527_v5, %s5433_s25  ;;  %502 = vrot.lane.b32.xlu0 %v5517_v4, %s5432_s24 }
  0x91   :  { %v1283_v23 = vpop.permute.xlu1 %1282  ;;  %v1197_v24 = vpop.permute.xlu0 %1196 }
  0x92   :  { %v1214_v25 = vsel %vm1208_vm1, %v1195_v17, %v1197_v24  ;;  %v1300_v26 = vsel %vm1294_vm0, %v1281_v16, %v1283_v23 }
  0x93   :  { %65 = vrot.lane.b32.xlu1 %v5505_v2, %s5435_s27  ;;  %338 = vrot.lane.b32.xlu0 %v5527_v5, %s5434_s26  ;;  %v1263_v29 = vmul.f32 %v1229_v19, %v1214_v25  ;;  %v1349_v30 = vmul.f32 %v1315_v20, %v1300_v26 }
  0x95   :  { %v5659_v32 = vpop.permute.xlu1 %1278  ;;  %v5661_v33 = vpop.permute.xlu0 %1192  ;;  %v2359_v34 = vpack.c.bf16 %v1349_v30, %v1263_v29 }
  0x96   :  { %9357 = vst [vmem:[#allocation18_spill] sm:$0xff] %v5659_v32  ;;  %9358 = vst [vmem:[#allocation19_spill] sm:$0xff] %v5661_v33  ;;  %v1301_v35 = vsel %vm1294_vm0, %v5659_v32, %v1281_v16  ;;  %v1215_v36 = vsel %vm1208_vm1, %v5661_v33, %v1195_v17 }
  0x97   :  { %2449 = vmatprep.subr.bf16.mxu0 %v2359_v34  ;;  %152 = vrot.lane.b32.xlu1 %v5505_v2, %s5436_s28  ;;  %v1262_v38 = vmul.f32 %v1225_v28, %v1215_v36  ;;  %v1348_v39 = vmul.f32 %v1311_v31, %v1301_v35  ;;  %v1139_v36 = vrot.slane %v5649_v27, %v5685_v45 }
  0x98   :  { %67 = vrot.lane.b32.xlu0 %v5493_v0, %s5435_s27 }
  0x99   :  { %v5676_v40 = vpop.permute.xlu1 %1100  ;;  %v1099_v41 = vpop.permute.xlu0 %1098  ;;  %v2358_v42 = vpack.c.bf16 %v1348_v39, %v1262_v38 }
  0x9a   :  { %v1121_v44 = vsel %vm9236_vm2, %v1099_v41, %v5676_v40 }
  0x9b   :  { %v1169_v46 = vmul.f32 %v1135_v37, %v1121_v44  ;;  %242 = vrot.lane.b32.xlu1 %v5499_v1, %s5433_s25  ;;  %2450 = vmatpush1.bf16.msra.mxu0 %v2358_v42  ;;  %v1143_v42 = vrot.slane %v5649_v27, %v5679_v43 }
  0x9c   :  { %154 = vrot.lane.b32.xlu0 %v5493_v0, %s5436_s28 }
  0x9d   :  { %v5691_v47 = vpop.permute.xlu1 %1200  ;;  %v1199_v48 = vpop.permute.xlu0 %1198  ;;  %v2351_v49 = vpack.c.bf16 %v5493_v0, %v1169_v46 }
  0x9e   :  { %9361 = vst [vmem:[#allocation22_spill] sm:$0xff] %v5691_v47  ;;  %v1213_v54 = vsel %vm1208_vm1, %v1197_v24, %v1199_v48  ;;  %v1212_v55 = vsel %vm1208_vm1, %v1199_v48, %v5691_v47  ;;  %v5733_v24 = vor.u32 %v1039_v11, %v1038_v10  ;;  %v92_v47 = vld [vmem:[#allocation6] ss:$8 sm:$0xf] }
  0x9f   :  { %328 = vrot.lane.b32.xlu1 %v5499_v1, %s5434_s26  ;;  %2451 = vmatprep.subr.bf16.mxu0 %v2351_v49  ;;  %v1265_v61 = vmul.f32 %v1237_v50, %v1212_v55  ;;  %v1264_v63 = vmul.f32 %v1233_v52, %v1213_v54  ;;  %v781_v54 = vld [vmem:[#allocation6 + $0x40] ss:$8 sm:$0xf0] }
  0xa0   :  { %244 = vrot.lane.b32.xlu0 %v5517_v4, %s5433_s25  ;;  %9365 = vst [vmem:[#allocation26_spill] sm:$0xff] %v5733_v24  ;;  %v1049_v30 = vrot.slane %v5733_v24, %v5626_v13  ;;  %v1045_v52 = vrot.slane %v5733_v24, %v5633_v18 }
  0xa1   :  { %v5711_v56 = vpop.permute.xlu1 %1286  ;;  %v1285_v57 = vpop.permute.xlu0 %1284 }
  0xa2   :  { %9362 = vst [vmem:[#allocation23_spill] sm:$0xff] %v5711_v56  ;;  %v1299_v58 = vsel %vm1294_vm0, %v1283_v23, %v1285_v57  ;;  %v1298_v60 = vsel %vm1294_vm0, %v1285_v57, %v5711_v56  ;;  %v5731_v23 = vor.u32 %v953_v9, %v952_v8  ;;  %v866_v57 = vld [vmem:[#allocation6 + $0x41] ss:$8 sm:$0xf] }
  0xa3   :  { %79 = vrot.lane.b32.xlu1 %v5527_v5, %s5435_s27  ;;  %v1351_v62 = vmul.f32 %v1323_v51, %v1298_v60  ;;  %v1350_v6 = vmul.f32 %v1319_v53, %v1299_v58  ;;  %v780_v53 = vld [vmem:[#allocation6 + $0x40] ss:$8 sm:$0xf]  ;;  %v867_v58 = vld [vmem:[#allocation6 + $0x41] ss:$8 sm:$0xf0] }
  0xa4   :  { %330 = vrot.lane.b32.xlu0 %v5517_v4, %s5434_s26  ;;  %9364 = vst [vmem:[#allocation25_spill] sm:$0xff] %v5731_v23  ;;  %v963_v29 = vrot.slane %v5731_v23, %v5626_v13  ;;  %v959_v50 = vrot.slane %v5731_v23, %v5633_v18  ;;  %v5797_v10 = vor.u32 %v867_v58, %v866_v57  ;;  %v694_v58 = vld [vmem:[#allocation6 + $0x7] ss:$8 sm:$0xf] }
  0xa5   :  { %v927_v16 = vpop.permute.xlu1 %926  ;;  %v5724_v17 = vpop.permute.xlu0 %1112  ;;  %v2361_v19 = vpack.c.bf16 %v1351_v62, %v1265_v61  ;;  %v2360_v20 = vpack.c.bf16 %v1350_v6, %v1264_v63  ;;  %v5793_v6 = vor.u32 %v781_v54, %v780_v53  ;;  %v1903_v53 = vld [vmem:[#allocation6 + $0xc0] ss:$8 sm:$0xf] }
  0xa6   :  { %9363 = vst [vmem:[#allocation24_spill] sm:$0xff] %v5724_v17  ;;  %v1122_v21 = vsel %vm9236_vm2, %v5724_v17, %v1099_v41  ;;  %9370 = vst [vmem:[#allocation31_spill] sm:$0xff] %v5797_v10  ;;  %v1904_v54 = vld [vmem:[#allocation6 + $0xc0] ss:$8 sm:$0xf0] }
  0xa7   :  { %v1168_v22 = vmul.f32 %v1131_v59, %v1122_v21  ;;  %69 = vrot.lane.b32.xlu1 %v5499_v1, %s5435_s27  ;;  %2490 = vmatprep.subr.bf16.mxu1 %v2361_v19  ;;  %9369 = vst [vmem:[#allocation30_spill] sm:$0xff] %v5793_v6  ;;  %v877_v21 = vrot.slane %v5797_v10, %v5626_v13 }
  0xa8   :  { %166 = vrot.lane.b32.xlu0 %v5527_v5, %s5436_s28  ;;  %2491 = vmatpush1.bf16.msra.mxu1 %v2360_v20  ;;  %v791_v20 = vrot.slane %v5793_v6, %v5626_v13 }
  0xa9   :  { %v1013_v25 = vpop.permute.xlu1 %1012  ;;  %v5738_v26 = vpop.permute.xlu0 %928  ;;  %v2350_v28 = vpack.c.bf16 %v5505_v2, %v1168_v22 }
  0xaa   :  { %v949_v31 = vsel %vm942_vm3, %v927_v16, %v5738_v26 }
  0xab   :  { %156 = vrot.lane.b32.xlu1 %v5499_v1, %s5436_s28  ;;  %2452 = vmatpush1.bf16.msra.mxu0 %v2350_v28  ;;  %v997_v38 = vmul.f32 %v963_v29, %v949_v31 }
  0xac   :  { %71 = vrot.lane.b32.xlu0 %v5517_v4, %s5435_s27 }
  0xad   :  { %v1103_v34 = vpop.permute.xlu1 %1102  ;;  %v1015_v35 = vpop.permute.xlu0 %1014 }
  0xae   :  { %v1035_v37 = vsel %vm1028_vm4, %v1013_v25, %v1015_v35  ;;  %v1120_v39 = vsel %vm9236_vm2, %v5676_v40, %v1103_v34 }
  0xaf   :  { %v1083_v41 = vmul.f32 %v1049_v30, %v1035_v37  ;;  %762 = vrot.lane.b32.xlu1 %v5515_v3, %s5428_s20  ;;  %v1170_v49 = vmul.f32 %v1139_v36, %v1120_v39 }
  0xb0   :  { %158 = vrot.lane.b32.xlu0 %v5517_v4, %s5436_s28 }
  0xb1   :  { %v5766_v44 = vpop.permute.xlu1 %940  ;;  %v5768_v46 = vpop.permute.xlu0 %1104  ;;  %v2343_v48 = vpack.c.bf16 %v1083_v41, %v997_v38  ;;  %v2352_v63 = vpack.c.bf16 %v5499_v1, %v1170_v49  ;;  %v1053_v38 = vrot.slane %v5733_v24, %v5685_v45  ;;  %v971_v41 = vrot.slane %v5731_v23, %v5679_v43 }
  0xb2   :  { %9366 = vst [vmem:[#allocation27_spill] sm:$0xff] %v5766_v44  ;;  %9367 = vst [vmem:[#allocation28_spill] sm:$0xff] %v5768_v46  ;;  %v1119_v40 = vsel %vm9236_vm2, %v1103_v34, %v5768_v46  ;;  %v950_v55 = vsel %vm942_vm3, %v5766_v44, %v927_v16 }
  0xb3   :  { %v1171_v51 = vmul.f32 %v1143_v42, %v1119_v40  ;;  %676 = vrot.lane.b32.xlu1 %v5515_v3, %s5431_s23  ;;  %2453 = vmatprep.subr.bf16.mxu0 %v2343_v48  ;;  %v996_v8 = vmul.f32 %v959_v50, %v950_v55  ;;  %v1057_v42 = vrot.slane %v5733_v24, %v5679_v43  ;;  %v609_v40 = vld [vmem:[#allocation6 + $0x6] ss:$8 sm:$0xf0] }
  0xb4   :  { %590 = vrot.lane.b32.xlu0 %v5515_v3, %s5430_s22  ;;  %v967_v48 = vrot.slane %v5731_v23, %v5685_v45 }
  0xb5   :  { %v5784_v59 = vpop.permute.xlu1 %754  ;;  %v5786_v60 = vpop.permute.xlu0 %1026  ;;  %v2353_v61 = vpack.c.bf16 %v5517_v4, %v1171_v51 }
  0xb6   :  { %9368 = vst [vmem:[#allocation29_spill] sm:$0xff] %v5786_v60  ;;  %v1036_v62 = vsel %vm1028_vm4, %v5786_v60, %v1013_v25 }
  0xb7   :  { %v1082_v9 = vmul.f32 %v1045_v52, %v1036_v62  ;;  %504 = vrot.lane.b32.xlu1 %v5515_v3, %s5432_s24  ;;  %2492 = vmatprep.subr.bf16.mxu1 %v2353_v61  ;;  %v695_v61 = vld [vmem:[#allocation6 + $0x7] ss:$8 sm:$0xf0] }
  0xb8   :  { %418 = vrot.lane.b32.xlu0 %v5515_v3, %s5422_s14  ;;  %2493 = vmatpush1.bf16.msra.mxu1 %v2352_v63  ;;  %v787_v63 = vrot.slane %v5793_v6, %v5633_v18 }
  0xb9   :  { %v841_v11 = vpop.permute.xlu1 %840  ;;  %v5802_v16 = vpop.permute.xlu0 %756  ;;  %v2342_v19 = vpack.c.bf16 %v1082_v9, %v996_v8  ;;  %v1964_v9 = vld [vmem:[#allocation6 + $0xc1] ss:$8 sm:$0xf] }
  0xba   :  { %v5815_v22 = vsel %vm770_vm5, %v5784_v59, %v5802_v16 }
  0xbb   :  { %332 = vrot.lane.b32.xlu1 %v5515_v3, %s5434_s26  ;;  %2454 = vmatpush1.bf16.msra.mxu0 %v2342_v19  ;;  %v825_v30 = vmul.f32 %v791_v20, %v5815_v22  ;;  %v1965_v19 = vld [vmem:[#allocation6 + $0xc1] ss:$8 sm:$0xf0] }
  0xbc   :  { %246 = vrot.lane.b32.xlu0 %v5515_v3, %s5433_s25 }
  0xbd   :  { %v931_v25 = vpop.permute.xlu1 %930  ;;  %v5819_v28 = vpop.permute.xlu0 %842 }
  0xbe   :  { %v863_v29 = vsel %vm9204_vm6, %v841_v11, %v5819_v28  ;;  %v948_v50 = vsel %vm942_vm3, %v5738_v26, %v931_v25  ;;  %v873_v26 = vrot.slane %v5797_v10, %v5633_v18 }
  0xbf   :  { %v911_v31 = vmul.f32 %v877_v21, %v863_v29  ;;  %160 = vrot.lane.b32.xlu1 %v5515_v3, %s5436_s28  ;;  %v998_v20 = vmul.f32 %v967_v48, %v948_v50 }
  0xc0   :  { %73 = vrot.lane.b32.xlu0 %v5515_v3, %s5435_s27 }
  0xc1   :  { %v1017_v34 = vpop.permute.xlu1 %1016  ;;  %v5829_v36 = vpop.permute.xlu0 %932  ;;  %v2335_v37 = vpack.c.bf16 %v911_v31, %v825_v30  ;;  %v5878_v31 = vor.u32 %v1904_v54, %v1903_v53 }
  0xc2   :  { %9371 = vst [vmem:[#allocation32_spill] sm:$0xff] %v5829_v36  ;;  %v1034_v39 = vsel %vm1028_vm4, %v1015_v35, %v1017_v34  ;;  %v947_v49 = vsel %vm942_vm3, %v931_v25, %v5829_v36  ;;  %v608_v35 = vld [vmem:[#allocation6 + $0x6] ss:$8 sm:$0xf] }
  0xc3   :  { %1368 = vrot.lane.b32.xlu1 %v5499_v1, %s5437_s29  ;;  %2455 = vmatprep.subr.bf16.mxu0 %v2335_v37  ;;  %v1084_v55 = vmul.f32 %v1053_v38, %v1034_v39  ;;  %v999_v62 = vmul.f32 %v971_v41, %v947_v49  ;;  %v5876_v30 = vor.u32 %v609_v40, %v608_v35  ;;  %v5908_v35 = vld [vmem:[#allocation3 + $0x28] sm:$0xff] }
  0xc4   :  { %1366 = vrot.lane.b32.xlu0 %v5493_v0, %s5437_s29  ;;  %v5883_v38 = vor.u32 %v695_v61, %v694_v58  ;;  %v1910_v50 = vrot.slane %v5878_v31, %v5633_v18 }
  0xc5   :  { %v5851_v51 = vpop.permute.xlu1 %768  ;;  %v5853_v52 = vpop.permute.xlu0 %1018  ;;  %v2344_v37 = vpack.c.bf16 %v1084_v55, %v998_v20 }
  0xc6   :  { %9372 = vst [vmem:[#allocation33_spill] sm:$0xff] %v5851_v51  ;;  %9373 = vst [vmem:[#allocation34_spill] sm:$0xff] %v5853_v52  ;;  %v1033_v57 = vsel %vm1028_vm4, %v1017_v34, %v5853_v52  ;;  %v5868_v21 = vsel %vm770_vm5, %v5851_v51, %v5784_v59  ;;  %v5885_v59 = vor.u32 %v1965_v19, %v1964_v9 }
  0xc7   :  { %v1085_v8 = vmul.f32 %v1057_v42, %v1033_v57  ;;  %1454 = vrot.lane.b32.xlu1 %v5499_v1, %s5438_s30  ;;  %9374 = vst [vmem:[#allocation35_spill] sm:$0xff] %v5868_v21  ;;  %v824_v39 = vmul.f32 %v787_v63, %v5868_v21  ;;  %v5901_v42 = vld [vmem:[#allocation3 + $0x30] sm:$0xff]  ;;  %v705_v53 = vrot.slane %v5883_v38, %v5626_v13 }
  0xc8   :  { %1452 = vrot.lane.b32.xlu0 %v5493_v0, %s5438_s30  ;;  %v5890_v0 = vld [vmem:[%s9129_s1] sm:$0xff]  ;;  %v1971_v54 = vrot.slane %v5885_v59, %v5633_v18 }
  0xc9   :  { %v5872_v25 = vpop.permute.xlu1 %582  ;;  %v5874_v29 = vpop.permute.xlu0 %854  ;;  %v2345_v1 = vpack.c.bf16 %v1085_v8, %v999_v62  ;;  %9376 = vst [vmem:[#allocation37_spill] sm:$0xff] %v5890_v0 }
  0xca   :  { %9375 = vst [vmem:[#allocation36_spill] sm:$0xff] %v5874_v29  ;;  %v864_v34 = vsel %vm9204_vm6, %v5874_v29, %v841_v11  ;;  %v5897_v11 = vcombine.high %v5890_v0, %v5890_v0  ;;  %v523_v29 = vld [vmem:[#allocation6 + $0x5] ss:$8 sm:$0xf0] }
  0xcb   :  { %v910_v41 = vmul.f32 %v873_v26, %v864_v34  ;;  %1450 = vrot.lane.b32.xlu1 %v5505_v2, %s5438_s30  ;;  %2494 = vmatprep.subr.bf16.mxu1 %v2345_v1  ;;  %v881_v34 = vrot.slane %v5797_v10, %v5685_v45 }
  0xcc   :  { %9377 = vst [vmem:[#allocation38_spill] sm:$0xff] %v5897_v11  ;;  %1364 = vrot.lane.b32.xlu0 %v5505_v2, %s5437_s29  ;;  %2495 = vmatpush1.bf16.msra.mxu1 %v2344_v37  ;;  %v619_v2 = vrot.slane %v5876_v30, %v5626_v13  ;;  %v5952_v37 = vsub.s32 7, %v5613_v7 }
  0xcd   :  { %v5903_v48 = vpop.permute.xlu1 %668  ;;  %v5906_v49 = vpop.permute.xlu0 %584  ;;  %v2334_v40 = vpack.c.bf16 %v910_v41, %v824_v39  ;;  %5292 = vmatprep.mubr.msk.bf16.mxu0 %vm9235_vm7, %v5897_v11  ;;  %5294 = vmatprep.mubr.msk.bf16.mxu1 %vm9235_vm7, %v5897_v11  ;;  %v799_v41 = vrot.slane %v5793_v6, %v5679_v43 }
  0xce   :  { %v605_v55 = vsel %vm598_vm8, %v5872_v25, %v5906_v49  ;;  %9378 = vst [vmem:[#allocation39_spill] sm:$0xff] %v5952_v37  ;;  %v1938_v21 = vrot.slane %v5878_v31, %v5952_v37 }
  0xcf   :  { %1204 = vrot.lane.b32.xlu1 %v5901_v42, %s5424_s17  ;;  %2456 = vmatpush1.bf16.msra.mxu0 %v2334_v40  ;;  %v653_v62 = vmul.f32 %v619_v2, %v605_v55  ;;  %v5937_v63 = vmul.f32 %v1910_v50, %v605_v55  ;;  %v885_v40 = vrot.slane %v5797_v10, %v5679_v43 }
  0xd0   :  { %1202 = vrot.lane.b32.xlu0 %v5908_v35, %s5424_s17  ;;  %v795_v2 = vrot.slane %v5793_v6, %v5685_v45  ;;  %v615_v55 = vrot.slane %v5876_v30, %v5633_v18 }
  0xd1   :  { %v759_v57 = vpop.permute.xlu1 %758  ;;  %v5931_v58 = vpop.permute.xlu0 %670 }
  0xd2   :  { %v691_v61 = vsel %vm684_vm9, %v5903_v48, %v5931_v58 }
  0xd3   :  { %v739_v8 = vmul.f32 %v705_v53, %v691_v61  ;;  %v5939_v26 = vmul.f32 %v1971_v54, %v691_v61  ;;  %1290 = vrot.lane.b32.xlu1 %v5901_v42, %s5423_s0  ;;  %v437_v53 = vld [vmem:[#allocation6 + $0x4] ss:$8 sm:$0xf0]  ;;  %v5975_v54 = vsel %vm770_vm5, %v5802_v16, %v759_v57  ;;  %v701_v16 = vrot.slane %v5883_v38, %v5633_v18 }
  0xd4   :  { %1288 = vrot.lane.b32.xlu0 %v5908_v35, %s5423_s0  ;;  %v826_v10 = vmul.f32 %v795_v2, %v5975_v54 }
  0xd5   :  { %v845_v9 = vpop.permute.xlu1 %844  ;;  %v5945_v19 = vpop.permute.xlu0 %760  ;;  %v2327_v20 = vpack.c.bf16 %v739_v8, %v653_v62  ;;  %v1781_v8 = vld [vmem:[#allocation6 + $0x86] ss:$8 sm:$0xf] }
  0xd6   :  { %v862_v39 = vsel %vm9204_vm6, %v5819_v28, %v845_v9  ;;  %v5968_v50 = vsel %vm770_vm5, %v759_v57, %v5945_v19  ;;  %v436_v28 = vld [vmem:[#allocation6 + $0x4] ss:$8 sm:$0xf]  ;;  %v522_v57 = vld [vmem:[#allocation6 + $0x5] ss:$8 sm:$0xf] }
  0xd7   :  { %1372 = vrot.lane.b32.xlu1 %v5515_v3, %s5437_s29  ;;  %2457 = vmatprep.subr.bf16.mxu0 %v2327_v20  ;;  %v1782_v20 = vld [vmem:[#allocation6 + $0x86] ss:$8 sm:$0xf0]  ;;  %v912_v1 = vmul.f32 %v881_v34, %v862_v39  ;;  %v827_v44 = vmul.f32 %v799_v41, %v5968_v50  ;;  %v1999_v39 = vrot.slane %v5885_v59, %v5952_v37 }
  0xd8   :  { %1370 = vrot.lane.b32.xlu0 %v5517_v4, %s5437_s29 }
  0xd9   :  { %v5979_v61 = vpop.permute.xlu1 %596  ;;  %v5981_v62 = vpop.permute.xlu0 %846  ;;  %v2336_v52 = vpack.c.bf16 %v912_v1, %v826_v10 }
  0xda   :  { %9379 = vst [vmem:[#allocation40_spill] sm:$0xff] %v5979_v61  ;;  %9380 = vst [vmem:[#allocation41_spill] sm:$0xff] %v5981_v62  ;;  %v861_v51 = vsel %vm9204_vm6, %v845_v9, %v5981_v62  ;;  %v606_v60 = vsel %vm598_vm8, %v5979_v61, %v5872_v25  ;;  %v1842_v9 = vld [vmem:[#allocation6 + $0x87] ss:$8 sm:$0xf]  ;;  %v6006_v25 = vor.u32 %v437_v53, %v436_v28  ;;  %vm9217_vm6 = vcmask 1043456  }
  0xdb   :  { %v913_v34 = vmul.f32 %v885_v40, %v861_v51  ;;  %1458 = vrot.lane.b32.xlu1 %v5515_v3, %s5438_s30  ;;  %v1843_v62 = vld [vmem:[#allocation6 + $0x87] ss:$8 sm:$0xf0]  ;;  %v6008_v51 = vor.u32 %v1782_v20, %v1781_v8  ;;  %v6010_v40 = vor.u32 %v523_v29, %v522_v57  ;;  %v652_v61 = vmul.f32 %v615_v55, %v606_v60  ;;  %v350_v57 = vld [vmem:[#allocation6 + $0x3] ss:$8 sm:$0xf] }
  0xdc   :  { %1456 = vrot.lane.b32.xlu0 %v5517_v4, %s5438_s30  ;;  %v6016_v36 = vor.u32 %v1843_v62, %v1842_v9  ;;  %v6018_v4 = vmul.f32 %v1938_v21, %v606_v60  ;;  %v447_v21 = vrot.slane %v6006_v25, %v5626_v13  ;;  %v627_v9 = vrot.slane %v5876_v30, %v5679_v43 }
  0xdd   :  { %v6002_v41 = vpop.permute.xlu1 %410  ;;  %v6004_v17 = vpop.permute.xlu0 %682  ;;  %v2337_v6 = vpack.c.bf16 %v913_v34, %v827_v44  ;;  %v709_v34 = vrot.slane %v5883_v38, %v5685_v45 }
  0xde   :  { %9381 = vst [vmem:[#allocation42_spill] sm:$0xff] %v6004_v17  ;;  %v692_v2 = vsel %vm684_vm9, %v6004_v17, %v5903_v48  ;;  %9382 = vst [vmem:[#allocation43_spill] sm:$0xff] %v6016_v36  ;;  %v1788_v48 = vrot.slane %v6008_v51, %v5633_v18 }
  0xdf   :  { %9383 = vst [vmem:[#allocation44_spill] sm:$0xff] %v6018_v4  ;;  %v738_v24 = vmul.f32 %v701_v16, %v692_v2  ;;  %v6020_v23 = vmul.f32 %v1999_v39, %v692_v2  ;;  %1108 = vrot.lane.b32.xlu1 %v5908_v35, %s5425_s7  ;;  %2496 = vmatprep.subr.bf16.mxu1 %v2337_v6  ;;  %v351_v4 = vld [vmem:[#allocation6 + $0x3] ss:$8 sm:$0xf0] }
  0xe0   :  { %1106 = vrot.lane.b32.xlu0 %v5515_v3, %s5425_s7  ;;  %2497 = vmatpush1.bf16.msra.mxu1 %v2336_v52  ;;  %v533_v6 = vrot.slane %v6010_v40, %v5626_v13  ;;  %v713_v2 = vrot.slane %v5883_v38, %v5679_v43  ;;  %v6128_v46 = vor.u32 %v351_v4, %v350_v57 }
  0xe1   :  { %9384 = vst [vmem:[#allocation45_spill] sm:$0xff] %v6020_v23  ;;  %v497_v44 = vpop.permute.xlu1 %496  ;;  %v6027_v29 = vpop.permute.xlu0 %412  ;;  %v2326_v10 = vpack.c.bf16 %v738_v24, %v652_v61  ;;  %v1849_v24 = vrot.slane %v6016_v36, %v5633_v18 }
  0xe2   :  { %v433_v52 = vsel %vm426_vm10, %v6002_v41, %v6027_v29 }
  0xe3   :  { %1292 = vrot.lane.b32.xlu1 %v5527_v5, %s5423_s0  ;;  %2458 = vmatpush1.bf16.msra.mxu0 %v2326_v10  ;;  %v481_v55 = vmul.f32 %v447_v21, %v433_v52  ;;  %v6053_v61 = vmul.f32 %v1788_v48, %v433_v52  ;;  %v623_v10 = vrot.slane %v5876_v30, %v5685_v45 }
  0xe4   :  { %1206 = vrot.lane.b32.xlu0 %v5527_v5, %s5424_s17  ;;  %v443_v48 = vrot.slane %v6006_v25, %v5633_v18 }
  0xe5   :  { %v587_v1 = vpop.permute.xlu1 %586  ;;  %v6048_v28 = vpop.permute.xlu0 %498  ;;  %9385 = vst [vmem:[#allocation46_spill] sm:$0xff] %v6053_v61  ;;  %v2025_v61 = vld [vmem:[#allocation6 + $0xc2] ss:$8 sm:$0xf] }
  0xe6   :  { %v519_v53 = vsel %vm512_vm11, %v497_v44, %v6048_v28 }
  0xe7   :  { %v567_v62 = vmul.f32 %v533_v6, %v519_v53  ;;  %v6055_v8 = vmul.f32 %v1849_v24, %v519_v53  ;;  %936 = vrot.lane.b32.xlu1 %v5908_v35, %s5426_s18  ;;  %v1816_v53 = vrot.slane %v6008_v51, %v5952_v37 }
  0xe8   :  { %934 = vrot.lane.b32.xlu0 %v5515_v3, %s5426_s18 }
  0xe9   :  { %9386 = vst [vmem:[#allocation47_spill] sm:$0xff] %v6055_v8  ;;  %v673_v5 = vpop.permute.xlu1 %672  ;;  %v6061_v20 = vpop.permute.xlu0 %588  ;;  %v2319_v16 = vpack.c.bf16 %v567_v62, %v481_v55  ;;  %v265_v62 = vld [vmem:[#allocation6 + $0x2] ss:$8 sm:$0xf0] }
  0xea   :  { %v6070_v39 = vsel %vm684_vm9, %v5931_v58, %v673_v5  ;;  %v6083_v21 = vsel %vm598_vm8, %v587_v1, %v6061_v20  ;;  %v6090_v58 = vsel %vm598_vm8, %v5906_v49, %v587_v1  ;;  %v529_v49 = vrot.slane %v6010_v40, %v5633_v18  ;;  %v264_v1 = vld [vmem:[#allocation6 + $0x2] ss:$8 sm:$0xf] }
  0xeb   :  { %1022 = vrot.lane.b32.xlu1 %v5908_v35, %s5427_s19  ;;  %9387 = vst [vmem:[#allocation48_spill] sm:$0xff] %v6083_v21  ;;  %2459 = vmatprep.subr.bf16.mxu0 %v2319_v16  ;;  %v740_v52 = vmul.f32 %v709_v34, %v6070_v39  ;;  %v655_v16 = vmul.f32 %v627_v9, %v6083_v21 }
  0xec   :  { %1020 = vrot.lane.b32.xlu0 %v5515_v3, %s5427_s19  ;;  %v654_v23 = vmul.f32 %v623_v10, %v6090_v58 }
  0xed   :  { %v6094_v6 = vpop.permute.xlu1 %424  ;;  %v6096_v24 = vpop.permute.xlu0 %674 }
  0xee   :  { %9388 = vst [vmem:[#allocation49_spill] sm:$0xff] %v6094_v6  ;;  %v6104_v55 = vsel %vm684_vm9, %v673_v5, %v6096_v24  ;;  %v434_v34 = vsel %vm426_vm10, %v6094_v6, %v6002_v41  ;;  %v1877_v5 = vrot.slane %v6016_v36, %v5952_v37  ;;  %v6123_v41 = vor.u32 %v265_v62, %v264_v1  ;;  %v1660_v1 = vld [vmem:[#allocation6 + $0x84] ss:$8 sm:$0xf0] }
  0xef   :  { %9389 = vst [vmem:[#allocation50_spill] sm:$0xff] %v6104_v55  ;;  %v741_v60 = vmul.f32 %v713_v2, %v6104_v55  ;;  %764 = vrot.lane.b32.xlu1 %v5908_v35, %s5428_s20  ;;  %v480_v2 = vmul.f32 %v443_v48, %v434_v34  ;;  %v2328_v32 = vpack.c.bf16 %v740_v52, %v654_v23 }
  0xf0   :  { %1110 = vrot.lane.b32.xlu0 %v5901_v42, %s5425_s7  ;;  %v6130_v27 = vmul.f32 %v1816_v53, %v434_v34  ;;  %v275_v57 = vrot.slane %v6123_v41, %v5626_v13 }
  0xf1   :  { %v239_v9 = vpop.permute.xlu1 %238  ;;  %v6121_v17 = vpop.permute.xlu0 %510  ;;  %v2329_v33 = vpack.c.bf16 %v741_v60, %v655_v16 }
  0xf2   :  { %9390 = vst [vmem:[#allocation51_spill] sm:$0xff] %v6121_v17  ;;  %v520_v6 = vsel %vm512_vm11, %v6121_v17, %v497_v44  ;;  %9391 = vst [vmem:[#allocation52_spill] sm:$0xff] %v6130_v27 }
  0xf3   :  { %v566_v10 = vmul.f32 %v529_v49, %v520_v6  ;;  %v6132_v11 = vmul.f32 %v1877_v5, %v520_v6  ;;  %850 = vrot.lane.b32.xlu1 %v5908_v35, %s5429_s21  ;;  %2498 = vmatprep.subr.bf16.mxu1 %v2329_v33  ;;  %v1659_v49 = vld [vmem:[#allocation6 + $0x84] ss:$8 sm:$0xf]  ;;  %v1720_v5 = vld [vmem:[#allocation6 + $0x85] ss:$8 sm:$0xf] }
  0xf4   :  { %848 = vrot.lane.b32.xlu0 %v5515_v3, %s5429_s21  ;;  %2499 = vmatpush1.bf16.msra.mxu1 %v2328_v32  ;;  %v361_v3 = vrot.slane %v6128_v46, %v5626_v13 }
  0xf5   :  { %9392 = vst [vmem:[#allocation53_spill] sm:$0xff] %v6132_v11  ;;  %v325_v60 = vpop.permute.xlu1 %324  ;;  %v6139_v44 = vpop.permute.xlu0 %240  ;;  %v2318_v23 = vpack.c.bf16 %v566_v10, %v480_v2  ;;  %v1721_v2 = vld [vmem:[#allocation6 + $0x85] ss:$8 sm:$0xf0]  ;;  %v537_v10 = vrot.slane %v6010_v40, %v5685_v45 }
  0xf6   :  { %v6153_v32 = vsel %vm254_vm12, %v239_v9, %v6139_v44  ;;  %v6201_v27 = vor.u32 %v1721_v2, %v1720_v5 }
  0xf7   :  { %1024 = vrot.lane.b32.xlu1 %v5901_v42, %s5427_s19  ;;  %2460 = vmatpush1.bf16.msra.mxu0 %v2318_v23  ;;  %9393 = vst [vmem:[#allocation54_spill] sm:$0xff] %v6153_v32  ;;  %v309_v52 = vmul.f32 %v275_v57, %v6153_v32  ;;  %v455_v57 = vrot.slane %v6006_v25, %v5679_v43 }
  0xf8   :  { %938 = vrot.lane.b32.xlu0 %v5901_v42, %s5426_s18  ;;  %9396 = vst [vmem:[#allocation57_spill] sm:$0xff] %v6201_v27 }
  0xf9   :  { %v415_v33 = vpop.permute.xlu1 %414  ;;  %v6157_v48 = vpop.permute.xlu0 %326 }
  0xfa   :  { %v6162_v6 = vsel %vm9241_vm13, %v325_v60, %v6157_v48 }
  0xfb   :  { %v395_v53 = vmul.f32 %v361_v3, %v6162_v6  ;;  %678 = vrot.lane.b32.xlu1 %v5908_v35, %s5431_s23  ;;  %v541_v3 = vrot.slane %v6010_v40, %v5679_v43 }
  0xfc   :  { %592 = vrot.lane.b32.xlu0 %v5908_v35, %s5430_s22 }
  0xfd   :  { %v501_v62 = vpop.permute.xlu1 %500  ;;  %v6170_v16 = vpop.permute.xlu0 %416  ;;  %v2311_v34 = vpack.c.bf16 %v395_v53, %v309_v52  ;;  %v6185_v52 = vor.u32 %v1660_v1, %v1659_v49  ;;  %v451_v53 = vrot.slane %v6006_v25, %v5685_v45  ;;  %v271_v49 = vrot.slane %v6123_v41, %v5633_v18 }
  0xfe   :  { %9394 = vst [vmem:[#allocation55_spill] sm:$0xff] %v6170_v16  ;;  %v6177_v23 = vsel %vm512_vm11, %v6048_v28, %v501_v62  ;;  %v6192_v4 = vsel %vm426_vm10, %v415_v33, %v6170_v16  ;;  %v6199_v28 = vsel %vm426_vm10, %v6027_v29, %v415_v33  ;;  %v357_v29 = vrot.slane %v6128_v46, %v5633_v18 }
  0xff   :  { %852 = vrot.lane.b32.xlu1 %v5901_v42, %s5429_s21  ;;  %9395 = vst [vmem:[#allocation56_spill] sm:$0xff] %v6192_v4  ;;  %2461 = vmatprep.subr.bf16.mxu0 %v2311_v34  ;;  %v568_v17 = vmul.f32 %v537_v10, %v6177_v23  ;;  %v1694_v56 = vrot.slane %v6185_v52, %v5952_v37 }
 0x100   :  { %766 = vrot.lane.b32.xlu0 %v5901_v42, %s5428_s20  ;;  %v483_v33 = vmul.f32 %v455_v57, %v6192_v4  ;;  %v1755_v10 = vrot.slane %v6201_v27, %v5952_v37 }
 0x101   :  { %v6205_v1 = vpop.permute.xlu1 %252  ;;  %v6207_v11 = vpop.permute.xlu0 %502 }
 0x102   :  { %9397 = vst [vmem:[#allocation58_spill] sm:$0xff] %v6205_v1  ;;  %9398 = vst [vmem:[#allocation59_spill] sm:$0xff] %v6207_v11  ;;  %v6215_v34 = vsel %vm512_vm11, %v501_v62, %v6207_v11  ;;  %v262_v5 = vsel %vm254_vm12, %v6205_v1, %v239_v9  ;;  %v482_v62 = vmul.f32 %v451_v53, %v6199_v28  ;;  %v178_v1 = vld [vmem:[#allocation6 + $0x1] ss:$8 sm:$0xf] }
 0x103   :  { %9399 = vst [vmem:[#allocation60_spill] sm:$0xff] %v6215_v34  ;;  %v569_v2 = vmul.f32 %v541_v3, %v6215_v34  ;;  %506 = vrot.lane.b32.xlu1 %v5908_v35, %s5432_s24  ;;  %v179_v3 = vld [vmem:[#allocation6 + $0x1] ss:$8 sm:$0xf0]  ;;  %v308_v0 = vmul.f32 %v271_v49, %v262_v5  ;;  %v6238_v8 = vmul.f32 %v1694_v56, %v262_v5 }
 0x104   :  { %420 = vrot.lane.b32.xlu0 %v5908_v35, %s5422_s14  ;;  %v2320_v34 = vpack.c.bf16 %v568_v17, %v482_v62  ;;  %v2026_v53 = vld [vmem:[#allocation6 + $0xc2] ss:$8 sm:$0xf0]  ;;  %v6246_v49 = vor.u32 %v93_v15, %v92_v47  ;;  %v1598_v15 = vld [vmem:[#allocation6 + $0x83] ss:$8 sm:$0xf] }
 0x105   :  { %v6231_v57 = vpop.permute.xlu1 %65  ;;  %v6233_v14 = vpop.permute.xlu0 %338  ;;  %v2321_v9 = vpack.c.bf16 %v569_v2, %v483_v33  ;;  %9401 = vst [vmem:[#allocation62_spill] sm:$0xff] %v6238_v8  ;;  %v6248_v33 = vor.u32 %v179_v3, %v178_v1  ;;  %v1538_v2 = vld [vmem:[#allocation6 + $0x82] ss:$8 sm:$0xf0]  ;;  %v6333_v8 = vsub.s32 4, %v5613_v7 }
 0x106   :  { %9400 = vst [vmem:[#allocation61_spill] sm:$0xff] %v6233_v14  ;;  %v348_v4 = vsel %vm9241_vm13, %v6233_v14, %v325_v60  ;;  %9403 = vst [vmem:[#allocation64_spill] sm:$0xff] %v6246_v49  ;;  %v103_v47 = vrot.slane %v6246_v49, %v5626_v13  ;;  %v99_v14 = vrot.slane %v6246_v49, %v5633_v18 }
 0x107   :  { %v394_v32 = vmul.f32 %v357_v29, %v348_v4  ;;  %v6240_v55 = vmul.f32 %v1755_v10, %v348_v4  ;;  %680 = vrot.lane.b32.xlu1 %v5901_v42, %s5431_s23  ;;  %2500 = vmatprep.subr.bf16.mxu1 %v2321_v9  ;;  %v6254_v4 = vor.u32 %v2026_v53, %v2025_v61  ;;  %v1537_v29 = vld [vmem:[#allocation6 + $0x82] ss:$8 sm:$0xf]  ;;  %v1599_v61 = vld [vmem:[#allocation6 + $0x83] ss:$8 sm:$0xf0] }
 0x108   :  { %594 = vrot.lane.b32.xlu0 %v5901_v42, %s5430_s22  ;;  %2501 = vmatpush1.bf16.msra.mxu1 %v2320_v34  ;;  %v6276_v10 = vor.u32 %v1538_v2, %v1537_v29  ;;  %v6288_v56 = vor.u32 %v1599_v61, %v1598_v15 }
 0x109   :  { %9402 = vst [vmem:[#allocation63_spill] sm:$0xff] %v6240_v55  ;;  %v6250_v17 = vpop.permute.xlu1 %152  ;;  %v2310_v60 = vpack.c.bf16 %v394_v32, %v308_v0  ;;  %v189_v0 = vrot.slane %v6248_v33, %v5626_v13  ;;  %v2032_v9 = vrot.slane %v6254_v4, %v5633_v18 }
 0x10a   :  { %v6257_v5 = vpop.permute.xlu0 %67  ;;  %9405 = vst [vmem:[#allocation66_spill] sm:$0xff] %v6276_v10  ;;  %v1572_v2 = vrot.slane %v6276_v10, %v5952_v37 }
 0x10b   :  { %334 = vrot.lane.b32.xlu1 %v5908_v35, %s5434_s26  ;;  %2462 = vmatpush1.bf16.msra.mxu0 %v2310_v60  ;;  %v6272_v32 = vsel %vm9218_vm14, %v6231_v57, %v6257_v5  ;;  %v279_v60 = vrot.slane %v6123_v41, %v5685_v45  ;;  %v2069_v16 = vmul.f32 %v2032_v9, %v5815_v22 }
 0x10c   :  { %248 = vrot.lane.b32.xlu0 %v5908_v35, %s5433_s25  ;;  %9404 = vst [vmem:[#allocation65_spill] sm:$0xff] %v6272_v32  ;;  %v137_v53 = vmul.f32 %v103_v47, %v6272_v32  ;;  %v365_v47 = vrot.slane %v6128_v46, %v5685_v45  ;;  %v1983_v9 = vrot.slane %v5885_v59, %v5679_v43 }
 0x10d   :  { %v243_v1 = vpop.permute.xlu1 %242 }
 0x10e   :  { %v6278_v62 = vpop.permute.xlu0 %154 }
 0x10f   :  { %v6294_v29 = vsel %vm9240_vm15, %v6250_v17, %v6278_v62  ;;  %508 = vrot.lane.b32.xlu1 %v5901_v42, %s5432_s24 }
 0x110   :  { %9406 = vst [vmem:[#allocation67_spill] sm:$0xff] %v6294_v29  ;;  %v223_v15 = vmul.f32 %v189_v0, %v6294_v29  ;;  %422 = vrot.lane.b32.xlu0 %v5901_v42, %s5422_s14  ;;  %v369_v0 = vrot.slane %v6128_v46, %v5679_v43 }
 0x111   :  { %v329_v3 = vpop.permute.xlu1 %328 }
 0x112   :  { %v6320_v61 = vpop.permute.xlu0 %244  ;;  %v2303_v55 = vpack.c.bf16 %v223_v15, %v137_v53  ;;  %v6338_v53 = vsel %vm9241_vm13, %v6157_v48, %v329_v3  ;;  %v283_v15 = vrot.slane %v6123_v41, %v5679_v43 }
 0x113   :  { %9407 = vst [vmem:[#allocation68_spill] sm:$0xff] %v6320_v61  ;;  %162 = vrot.lane.b32.xlu1 %v5908_v35, %s5436_s28  ;;  %v6353_v48 = vsel %vm254_vm12, %v243_v1, %v6320_v61  ;;  %v396_v29 = vmul.f32 %v365_v47, %v6338_v53  ;;  %v193_v47 = vrot.slane %v6248_v33, %v5685_v45 }
 0x114   :  { %75 = vrot.lane.b32.xlu0 %v5908_v35, %s5435_s27  ;;  %2463 = vmatprep.subr.bf16.mxu0 %v2303_v55  ;;  %9408 = vst [vmem:[#allocation69_spill] sm:$0xff] %v6353_v48  ;;  %v6362_v55 = vsel %vm254_vm12, %v6139_v44, %v243_v1  ;;  %v185_v1 = vrot.slane %v6248_v33, %v5633_v18 }
 0x115   :  { %v6357_v7 = vpop.permute.xlu1 %79  ;;  %v311_v34 = vmul.f32 %v283_v15, %v6353_v48  ;;  %v111_v15 = vrot.slane %v6246_v49, %v5679_v43 }
 0x116   :  { %9409 = vst [vmem:[#allocation70_spill] sm:$0xff] %v6357_v7  ;;  %v6368_v32 = vpop.permute.xlu0 %330  ;;  %v91_v44 = vsel %vm9218_vm14, %v6357_v7, %v6231_v57  ;;  %v9413_v57 = vrot.slane %v6254_v4, %v5626_v13 }
 0x117   :  { %9410 = vst [vmem:[#allocation71_spill] sm:$0xff] %v6368_v32  ;;  %v6376_v21 = vsel %vm9241_vm13, %v329_v3, %v6368_v32  ;;  %336 = vrot.lane.b32.xlu1 %v5901_v42, %s5434_s26  ;;  %v1633_v3 = vrot.slane %v6288_v56, %v5952_v37  ;;  %v310_v32 = vmul.f32 %v279_v60, %v6362_v55 }
 0x118   :  { %9411 = vst [vmem:[#allocation72_spill] sm:$0xff] %v6376_v21  ;;  %v397_v61 = vmul.f32 %v369_v0, %v6376_v21  ;;  %250 = vrot.lane.b32.xlu0 %v5901_v42, %s5433_s25  ;;  %v2044_v21 = vrot.slane %v6254_v4, %v5679_v43  ;;  %v197_v60 = vrot.slane %v6248_v33, %v5679_v43 }
 0x119   :  { %v70_v10 = vpop.permute.xlu1 %69  ;;  %v2070_v7 = vmul.f32 %v9413_v57, %v5975_v54  ;;  %v136_v11 = vmul.f32 %v99_v14, %v91_v44  ;;  %v6424_v54 = vmul.f32 %v1572_v2, %v91_v44  ;;  %v1922_v14 = vrot.slane %v5878_v31, %v5679_v43 }
 0x11a   :  { %v6401_v48 = vpop.permute.xlu0 %166  ;;  %v2313_v37 = vpack.c.bf16 %v397_v61, %v311_v34  ;;  %v2312_v34 = vpack.c.bf16 %v396_v29, %v310_v32  ;;  %v717_v61 = vrot.slane %v5883_v38, %v6333_v8  ;;  %v631_v32 = vrot.slane %v5876_v30, %v6333_v8 }
 0x11b   :  { %9412 = vst [vmem:[#allocation73_spill] sm:$0xff] %v6401_v48  ;;  %v176_v0 = vsel %vm9240_vm15, %v6401_v48, %v6250_v17  ;;  %164 = vrot.lane.b32.xlu1 %v5901_v42, %s5436_s28  ;;  %9415 = vst [vmem:[#allocation75_spill] sm:$0xff] %v6424_v54  ;;  %v2407_v44 = vpack.c.bf16 %v2070_v7, %v2070_v7  ;;  %v9418_v7 = vrot.slane %v6254_v4, %v5685_v45  ;;  %v9445_v54 = vld [vmem:[#allocation67_spill] sm:$0xff] }
 0x11c   :  { %v222_v18 = vmul.f32 %v185_v1, %v176_v0  ;;  %v6420_v22 = vmul.f32 %v1633_v3, %v176_v0  ;;  %77 = vrot.lane.b32.xlu0 %v5901_v42, %s5435_s27  ;;  %2502 = vmatprep.subr.bf16.mxu1 %v2313_v37  ;;  %v2406_v3 = vpack.c.bf16 %v2069_v16, %v2069_v16 }
 0x11d   :  { %2503 = vmatpush1.bf16.msra.mxu1 %v2312_v34  ;;  %v157_v17 = vpop.permute.xlu1 %156  ;;  %v9416_v0 = vrot.slane %v5885_v59, %v5626_v13  ;;  %v9417_v16 = vrot.slane %v5878_v31, %v5626_v13 }
 0x11e   :  { %9414 = vst [vmem:[#allocation74_spill] sm:$0xff] %v6420_v22  ;;  %v6432_v29 = vpop.permute.xlu0 %71  ;;  %v2302_v1 = vpack.c.bf16 %v222_v18, %v136_v11  ;;  %v174_v18 = vsel %vm9240_vm15, %v6278_v62, %v157_v17  ;;  %v2426_v62 = vsel %vm9217_vm6, %v2406_v3, 0  ;;  %v9457_v22 = vrot.slane %v6201_v27, %v5679_v43 }
 0x11f   :  { %v2009_v57 = vmul.f32 %v9416_v0, %v6070_v39  ;;  %1376 = vrot.lane.b32.xlu1 %v5901_v42, %s5437_s29  ;;  %v1948_v0 = vmul.f32 %v9417_v16, %v6090_v58  ;;  %v9419_v39 = vrot.slane %v6016_v36, %v5626_v13 }
 0x120   :  { %1374 = vrot.lane.b32.xlu0 %v5908_v35, %s5437_s29  ;;  %2464 = vmatpush1.bf16.msra.mxu0 %v2302_v1  ;;  %v6466_v1 = vsel %vm9218_vm14, %v70_v10, %v6432_v29 }
 0x121   :  { %5291 = vmatprep.subr.msk.bf16.mxu0 %vm9217_vm6, %v2407_v44  ;;  %v6469_v11 = vpop.permute.xlu1 %762  ;;  %v2071_v44 = vmul.f32 %v9418_v7, %v5968_v50  ;;  %v1887_v34 = vmul.f32 %v9419_v39, %v6177_v23  ;;  %v2399_v50 = vpack.c.bf16 %v2009_v57, %v1948_v0  ;;  %v224_v7 = vmul.f32 %v193_v47, %v174_v18 }
 0x122   :  { %v6477_v58 = vsel %vm770_vm5, %v5945_v19, %v6469_v11  ;;  %v6479_v16 = vpop.permute.xlu0 %158  ;;  %v89_v19 = vsel %vm9218_vm14, %v6257_v5, %v70_v10  ;;  %v139_v2 = vmul.f32 %v111_v15, %v6466_v1  ;;  %v9420_v23 = vrot.slane %v6008_v51, %v5626_v13 }
 0x123   :  { %v6498_v3 = vsel %vm9240_vm15, %v157_v17, %v6479_v16  ;;  %1462 = vrot.lane.b32.xlu1 %v5901_v42, %s5438_s30  ;;  %v2072_v10 = vmul.f32 %v2044_v21, %v6477_v58  ;;  %v2408_v57 = vpack.c.bf16 %v2071_v44, %v2071_v44  ;;  %v9422_v39 = vrot.slane %v6201_v27, %v5626_v13 }
 0x124   :  { %v225_v37 = vmul.f32 %v197_v60, %v6498_v3  ;;  %1460 = vrot.lane.b32.xlu0 %v5908_v35, %s5438_s30  ;;  %2470 = vmatpush2.bf16.msra.mxu0 %v2426_v62  ;;  %v1826_v5 = vmul.f32 %v9420_v23, %v6199_v28  ;;  %v9421_v35 = vrot.slane %v6246_v49, %v5685_v45  ;;  %v6536_v23 = vld [vmem:[#allocation3 + $0x38] sm:$0xff] }
 0x125   :  { %2471 = vmatprep.subr.bf16.mxu0 %v2399_v50  ;;  %v6511_v17 = vpop.permute.xlu1 %676  ;;  %v1765_v0 = vmul.f32 %v9422_v39, %v6338_v53  ;;  %v9424_v53 = vpack.c.bf16 %v5939_v26, %v5937_v63  ;;  %v9427_v63 = vld [vmem:[#allocation59_spill] sm:$0xff] }
 0x126   :  { %v138_v15 = vmul.f32 %v9421_v35, %v89_v19  ;;  %v688_v28 = vsel %vm684_vm9, %v6096_v24, %v6511_v17  ;;  %v6524_v60 = vpop.permute.xlu0 %590  ;;  %v2305_v21 = vpack.c.bf16 %v225_v37, %v139_v2  ;;  %v2391_v24 = vpack.c.bf16 %v1887_v34, %v1826_v5 }
 0x127   :  { %v6530_v62 = vmul.f32 %v717_v61, %v688_v28  ;;  %v602_v50 = vsel %vm598_vm8, %v6061_v20, %v6524_v60  ;;  %1464 = vrot.lane.b32.xlu1 %v6536_v23, %s5438_s30  ;;  %v9423_v37 = vrot.slane %v6185_v52, %v5626_v13  ;;  %v2409_v61 = vpack.c.bf16 %v2072_v10, %v2072_v10 }
 0x128   :  { %v6544_v44 = vmul.f32 %v631_v32, %v602_v50  ;;  %1378 = vrot.lane.b32.xlu0 %v6536_v23, %s5437_s29  ;;  %2472 = vmatpush2.bf16.msra.mxu0 %v9424_v53  ;;  %v2304_v20 = vpack.c.bf16 %v224_v7, %v138_v15  ;;  %v2011_v35 = vmul.f32 %v1983_v9, %v688_v28  ;;  %v9430_v28 = vld [vmem:[#allocation55_spill] sm:$0xff] }
 0x129   :  { %v1704_v2 = vmul.f32 %v9423_v37, %v6362_v55  ;;  %v1950_v39 = vmul.f32 %v1922_v14, %v602_v50  ;;  %2504 = vmatprep.subr.bf16.mxu1 %v2305_v21  ;;  %2473 = vmatprep.subr.bf16.mxu0 %v2391_v24  ;;  %v6551_v34 = vpop.permute.xlu1 %504  ;;  %v9425_v55 = vld [vmem:[#allocation16_spill] sm:$0xff]  ;;  %v2432_v14 = vsel %vm9217_vm6, %v2408_v57, 0  ;;  %v9428_v7 = vrot.slane %v6288_v56, %v5626_v13 }
 0x12a   :  { %v9426_v32 = vrot.slane %v6201_v27, %v9425_v55  ;;  %2505 = vmatpush1.bf16.msra.mxu1 %v2304_v20  ;;  %v516_v26 = vsel %vm512_vm11, %v9427_v63, %v6551_v34  ;;  %v6563_v9 = vpop.permute.xlu0 %418  ;;  %v9431_v24 = vld [vmem:[#allocation48_spill] sm:$0xff]  ;;  %v9432_v57 = vrot.slane %v5878_v31, %v5685_v45  ;;  %v9433_v20 = vld [vmem:[#allocation50_spill] sm:$0xff] }
 0x12b   :  { %v1643_v10 = vmul.f32 %v9428_v7, %v174_v18  ;;  %5293 = vmatprep.subr.msk.bf16.mxu1 %vm9217_vm6, %v2409_v61  ;;  %v430_v21 = vsel %vm426_vm10, %v9430_v28, %v6563_v9  ;;  %v2383_v50 = vpack.c.bf16 %v1765_v0, %v1704_v2  ;;  %v9434_v18 = vrot.slane %v5885_v59, %v5685_v45  ;;  %v9435_v63 = vld [vmem:[#allocation54_spill] sm:$0xff]  ;;  %v9438_v0 = vld [vmem:[#allocation47_spill] sm:$0xff] }
 0x12c   :  { %v1764_v5 = vmul.f32 %v9426_v32, %v6162_v6  ;;  %v9429_v6 = vrot.slane %v6010_v40, %v6333_v8  ;;  %v1949_v53 = vmul.f32 %v9432_v57, %v9431_v24  ;;  %v9436_v61 = vrot.slane %v6185_v52, %v9425_v55  ;;  %v9439_v2 = vld [vmem:[#allocation46_spill] sm:$0xff] }
 0x12d   :  { %v2010_v32 = vmul.f32 %v9434_v18, %v9433_v20  ;;  %v9440_v37 = vpack.c.bf16 %v9438_v0, %v9439_v2  ;;  %v9441_v24 = vld [vmem:[#allocation66_spill] sm:$0xff]  ;;  %v9443_v20 = vrot.slane %v6016_v36, %v5679_v43  ;;  %v6608_v42 = vpop.permute.xlu1 %332  ;;  %v9447_v2 = vld [vmem:[#allocation71_spill] sm:$0xff]  ;;  %vm1380_vm6 = vcmp.lt.s32.totalorder %v5619_v12, 120 }
 0x12e   :  { %v6572_v15 = vmul.f32 %v9429_v6, %v516_v26  ;;  %v1703_v7 = vmul.f32 %v9436_v61, %v9435_v63  ;;  %v9437_v6 = vrot.slane %v6006_v25, %v6333_v8  ;;  %v9442_v57 = vrot.slane %v9441_v24, %v5626_v13  ;;  %2511 = vmatpush2.bf16.msra.mxu1 %v2432_v14 }
 0x12f   :  { %2474 = vmatpush2.bf16.msra.mxu0 %v9440_v37  ;;  %v1889_v18 = vmul.f32 %v9443_v20, %v516_v26  ;;  %v9444_v63 = vrot.slane %v6008_v51, %v5679_v43  ;;  %v9446_v37 = vrot.slane %v6288_v56, %v9425_v55  ;;  %v344_v26 = vsel %vm9241_vm13, %v9447_v2, %v6608_v42 }
 0x130   :  { %v6594_v28 = vmul.f32 %v9437_v6, %v430_v21  ;;  %v1582_v47 = vmul.f32 %v9442_v57, %v89_v19  ;;  %2475 = vmatprep.subr.bf16.mxu0 %v2383_v50  ;;  %v2401_v6 = vpack.c.bf16 %v2011_v35, %v1950_v39  ;;  %v6620_v57 = vpop.permute.xlu0 %246  ;;  %v9448_v35 = vrot.slane %v6128_v46, %v6333_v8 }
 0x131   :  { %v1828_v61 = vmul.f32 %v9444_v63, %v430_v21  ;;  %v1642_v0 = vmul.f32 %v9446_v37, %v9445_v54  ;;  %v2382_v21 = vpack.c.bf16 %v1764_v5, %v1703_v7  ;;  %v9450_v54 = vld [vmem:[#allocation68_spill] sm:$0xff]  ;;  %v115_v20 = vrot.slane %v6246_v49, %v6333_v8  ;;  %v9453_v7 = vld [vmem:[#allocation65_spill] sm:$0xff]  ;;  %v6652_v49 = vpop.permute.xlu1 %160 }
 0x132   :  { %v6625_v39 = vmul.f32 %v9448_v35, %v344_v26  ;;  %2512 = vmatprep.subr.bf16.mxu1 %v2401_v6  ;;  %v258_v50 = vsel %vm254_vm12, %v9450_v54, %v6620_v57  ;;  %v2375_v14 = vpack.c.bf16 %v1643_v10, %v1582_v47  ;;  %v9451_v63 = vld [vmem:[#allocation60_spill] sm:$0xff]  ;;  %v9452_v37 = vrot.slane %v6016_v36, %v5685_v45 }
 0x133   :  { %v9454_v2 = vrot.slane %v9441_v24, %v9425_v55  ;;  %v9455_v6 = vrot.slane %v6123_v41, %v6333_v8  ;;  %2476 = vmatpush2.bf16.msra.mxu0 %v2382_v21  ;;  %v2400_v47 = vpack.c.bf16 %v2010_v32, %v1949_v53  ;;  %v1390_v10 = vld [vmem:[#allocation6 + $0x80] ss:$8 sm:$0xf]  ;;  %v1767_v48 = vmul.f32 %v9457_v22, %v344_v26  ;;  %v1477_v21 = vld [vmem:[#allocation6 + $0x81] ss:$8 sm:$0xf0] }
 0x134   :  { %9449 = vst [vmem:[#allocation59_spill] sm:$0xff] %v6625_v39  ;;  %v1888_v5 = vmul.f32 %v9452_v37, %v9451_v63  ;;  %v1391_v54 = vld [vmem:[#allocation6 + $0x80] ss:$8 sm:$0xf0]  ;;  %v9458_v63 = vrot.slane %v6185_v52, %v5679_v43  ;;  %2477 = vmatprep.subr.bf16.mxu0 %v2375_v14  ;;  %9459 = vst [vmem:[#allocation48_spill] sm:$0xff] %v6652_v49  ;;  %v9461_v32 = vrot.slane %v6008_v51, %v5685_v45 }
 0x135   :  { %v1581_v35 = vmul.f32 %v9454_v2, %v9453_v7  ;;  %v6644_v19 = vmul.f32 %v9455_v6, %v258_v50  ;;  %v2393_v7 = vpack.c.bf16 %v1889_v18, %v1828_v61  ;;  %v1556_v2 = vrot.slane %v9441_v24, %v5679_v43  ;;  %v1476_v6 = vld [vmem:[#allocation6 + $0x81] ss:$8 sm:$0xf]  ;;  %2513 = vmatpush2.bf16.msra.mxu1 %v2400_v47  ;;  %v6666_v18 = vpop.permute.xlu0 %73 }
 0x136   :  { %v1706_v37 = vmul.f32 %v9458_v63, %v258_v50  ;;  %v9460_v53 = vld [vmem:[#allocation56_spill] sm:$0xff]  ;;  %v172_v26 = vsel %vm9240_vm15, %v6479_v16, %v6652_v49  ;;  %v1613_v50 = vrot.slane %v6288_v56, %v5685_v45  ;;  %v9462_v14 = vrot.slane %v6248_v33, %v6333_v8  ;;  %v6692_v49 = vpop.permute.xlu1 %1368 }
 0x137   :  { %9456 = vst [vmem:[#allocation55_spill] sm:$0xff] %v6644_v19  ;;  %v1827_v36 = vmul.f32 %v9461_v32, %v9460_v53  ;;  %v2374_v61 = vpack.c.bf16 %v1642_v0, %v1581_v35  ;;  %2514 = vmatprep.subr.bf16.mxu1 %v2393_v7  ;;  %v87_v47 = vsel %vm9218_vm14, %v6432_v29, %v6666_v18  ;;  %v9463_v16 = vld [vmem:[#allocation72_spill] sm:$0xff]  ;;  %vm1466_vm14 = vcmp.lt.s32.totalorder %v5619_v12, 119 }
 0x138   :  { %v6673_v63 = vmul.f32 %v9462_v14, %v172_v26  ;;  %v6679_v53 = vor.u32 %v1391_v54, %v1390_v10  ;;  %v9464_v0 = vrot.slane %v6201_v27, %v5685_v45  ;;  %v6685_v32 = vmul.f32 %v115_v20, %v87_v47  ;;  %v9467_v10 = vld [vmem:[#allocation69_spill] sm:$0xff] }
 0x139   :  { %2478 = vmatpush2.bf16.msra.mxu0 %v2374_v61  ;;  %v2392_v22 = vpack.c.bf16 %v1888_v5, %v1827_v36  ;;  %v6687_v19 = vor.u32 %v1477_v21, %v1476_v6  ;;  %v9466_v7 = vrot.slane %v6288_v56, %v5679_v43  ;;  %v1584_v39 = vmul.f32 %v1556_v2, %v87_v47  ;;  %v1367_v5 = vpop.permute.xlu0 %1366 }
 0x13a   :  { %v1766_v35 = vmul.f32 %v9464_v0, %v9463_v16  ;;  %v2385_v29 = vpack.c.bf16 %v1767_v48, %v1706_v37  ;;  %v9468_v54 = vrot.slane %v6185_v52, %v5685_v45  ;;  %v1552_v20 = vrot.slane %v9441_v24, %v5685_v45 }
 0x13b   :  { %9465 = vst [vmem:[#allocation50_spill] sm:$0xff] %v6687_v19  ;;  %v1645_v14 = vmul.f32 %v9466_v7, %v172_v26  ;;  %2515 = vmatpush2.bf16.msra.mxu1 %v2392_v22  ;;  %v1401_v2 = vrot.slane %v6679_v53, %v5626_v13  ;;  %v1644_v48 = vmul.f32 %v1613_v50, %v6498_v3  ;;  %v1455_v22 = vpop.permute.xlu1 %1454 }
 0x13c   :  { %v1705_v27 = vmul.f32 %v9468_v54, %v9467_v10  ;;  %2516 = vmatprep.subr.bf16.mxu1 %v2385_v29  ;;  %v1487_v6 = vrot.slane %v6687_v19, %v5626_v13  ;;  %v1386_v21 = vsel %vm1380_vm6, %v1367_v5, %v6692_v49  ;;  %v1583_v61 = vmul.f32 %v1552_v20, %v6466_v1  ;;  %v9471_v54 = vld [vmem:[#allocation12_spill] sm:$0xff]  ;;  %v9479_v13 = vld [vmem:[#allocation38_spill] sm:$0xff] }
 0x13d   :  { %v2377_v26 = vpack.c.bf16 %v1645_v14, %v1584_v39  ;;  %v1453_v47 = vpop.permute.xlu0 %1452  ;;  %v1435_v50 = vmul.f32 %v1401_v2, %v1386_v21  ;;  %v6730_v20 = vsub.s32 5, %v9471_v54  ;;  %v9473_v21 = vld [vmem:[#allocation37_spill] sm:$0xff]  ;;  %v1405_v24 = vrot.slane %v6679_v53, %v5685_v45 }
 0x13e   :  { %v2384_v37 = vpack.c.bf16 %v1766_v35, %v1705_v27  ;;  %v1472_v3 = vsel %vm1466_vm14, %v1453_v47, %v1455_v22  ;;  %v1483_v27 = vrot.slane %v6687_v19, %v9425_v55  ;;  %v2376_v0 = vpack.c.bf16 %v1644_v48, %v1583_v61  ;;  %v9475_v61 = vld [vmem:[#allocation14_spill] sm:$0xff] }
 0x13f   :  { %v1521_v16 = vmul.f32 %v1487_v6, %v1472_v3  ;;  %v1397_v35 = vrot.slane %v6679_v53, %v9425_v55  ;;  %v6719_v7 = vpop.permute.xlu1 %1450  ;;  %9472 = vst [vmem:[#allocation46_spill] sm:$0xff] %v6730_v20  ;;  %v1245_v3 = vrot.slane %v9475_v61, %v6730_v20 }
 0x140   :  { %2517 = vmatpush2.bf16.msra.mxu1 %v2384_v37  ;;  %9469 = vst [vmem:[#allocation54_spill] sm:$0xff] %v6719_v7  ;;  %v1473_v1 = vsel %vm1466_vm14, %v6719_v7, %v1453_v47  ;;  %v1241_v47 = vrot.slane %v9475_v61, %v6333_v8 }
 0x141   :  { %2518 = vmatprep.subr.bf16.mxu1 %v2377_v26  ;;  %v6724_v39 = vpop.permute.xlu0 %1364  ;;  %v2367_v14 = vpack.c.bf16 %v1521_v16, %v1435_v50  ;;  %v1520_v29 = vmul.f32 %v1483_v27, %v1473_v1  ;;  %v6736_v26 = vcombine.low %v9473_v21, %v9473_v21 }
 0x142   :  { %9470 = vst [vmem:[#allocation47_spill] sm:$0xff] %v6724_v39  ;;  %v1387_v10 = vsel %vm1380_vm6, %v6724_v39, %v1367_v5  ;;  %v9476_v5 = vld [vmem:[#allocation15_spill] sm:$0xff] }
 0x143   :  { %v1434_v2 = vmul.f32 %v1397_v35, %v1387_v10  ;;  %2479 = vmatprep.subr.bf16.mxu0 %v2367_v14  ;;  %v6732_v48 = vpop.permute.xlu1 %1204  ;;  %9474 = vst [vmem:[#allocation67_spill] sm:$0xff] %v6736_v26  ;;  %v1327_v27 = vrot.slane %v9476_v5, %v6333_v8  ;;  %v1331_v50 = vrot.slane %v9476_v5, %v6730_v20  ;;  %v9478_v10 = vld [vmem:[#allocation23_spill] sm:$0xff] }
 0x144   :  { %2519 = vmatpush2.bf16.msra.mxu1 %v2376_v0  ;;  %v9477_v0 = vld [vmem:[#allocation22_spill] sm:$0xff] }
 0x145   :  { %v1203_v37 = vpop.permute.xlu0 %1202  ;;  %v2366_v6 = vpack.c.bf16 %v1520_v29, %v1434_v2 }
 0x146   :  { %v1210_v16 = vsel %vm1208_vm1, %v1203_v37, %v6732_v48  ;;  %v1211_v35 = vsel %vm1208_vm1, %v9477_v0, %v1203_v37 }
 0x147   :  { %2480 = vmatpush2.bf16.msra.mxu0 %v2366_v6  ;;  %v1291_v1 = vpop.permute.xlu1 %1290  ;;  %v1266_v6 = vmul.f32 %v1241_v47, %v1211_v35  ;;  %v1267_v21 = vmul.f32 %v1245_v3, %v1210_v16  ;;  %v1491_v47 = vrot.slane %v6687_v19, %v5685_v45  ;;  %v1495_v3 = vrot.slane %v6687_v19, %v5679_v43  ;;  %v9485_v19 = vld [vmem:[#allocation39_spill] sm:$0xff] }
 0x149   :  { %v1289_v14 = vpop.permute.xlu0 %1288 }
 0x14a   :  { %v1296_v29 = vsel %vm1294_vm0, %v1289_v14, %v1291_v1  ;;  %v1297_v2 = vsel %vm1294_vm0, %v9478_v10, %v1289_v14  ;;  %2482 = vmatmul.mubr.bf16.vlgmr.msra.gmra.mxu0 %v6736_v26  ;;  %v1409_v14 = vrot.slane %v6679_v53, %v5679_v43 }
 0x14b   :  { %v1352_v36 = vmul.f32 %v1327_v27, %v1297_v2  ;;  %v1353_v55 = vmul.f32 %v1331_v50, %v1296_v29  ;;  %5296 = vmatprep.mubr.msk.bf16.mxu0 %vm9235_vm7, %v9479_v13  ;;  %v6760_v39 = vpop.permute.xlu1 %1372  ;;  %v6779_v50 = vsub.s32 6, %v9471_v54  ;;  %v9483_v29 = vld [vmem:[#allocation17_spill] sm:$0xff] }
 0x14c   :  { %9480 = vst [vmem:[#allocation71_spill] sm:$0xff] %v6760_v39  ;;  %v1147_v10 = vrot.slane %v9483_v29, %v6333_v8 }
 0x14d   :  { %v2362_v37 = vpack.c.bf16 %v1352_v36, %v1266_v6  ;;  %v1371_v0 = vpop.permute.xlu0 %1370  ;;  %v2363_v7 = vpack.c.bf16 %v1353_v55, %v1267_v21  ;;  %9482 = vst [vmem:[#allocation60_spill] sm:$0xff] %v6779_v50 }
 0x14e   :  { %v1384_v27 = vsel %vm1380_vm6, %v1371_v0, %v6760_v39  ;;  %v1385_v55 = vsel %vm1380_vm6, %v6692_v49, %v1371_v0  ;;  %v1151_v49 = vrot.slane %v9483_v29, %v6730_v20 }
 0x14f   :  { %2531 = vmatprep.subr.bf16.mxu0 %v2363_v7  ;;  %v6776_v36 = vpop.permute.xlu1 %1458  ;;  %v1436_v2 = vmul.f32 %v1405_v24, %v1385_v55  ;;  %v1437_v6 = vmul.f32 %v1409_v14, %v1384_v27  ;;  %v1339_v24 = vrot.slane %v9476_v5, %v9485_v19  ;;  %v1253_v27 = vrot.slane %v9475_v61, %v9485_v19 }
 0x150   :  { %2532 = vmatpush1.bf16.msra.mxu0 %v2362_v37  ;;  %9481 = vst [vmem:[#allocation68_spill] sm:$0xff] %v6776_v36 }
 0x151   :  { %v1457_v7 = vpop.permute.xlu0 %1456 }
 0x152   :  { %v1470_v16 = vsel %vm1466_vm14, %v1457_v7, %v6776_v36  ;;  %v1471_v35 = vsel %vm1466_vm14, %v1455_v22, %v1457_v7  ;;  %v9484_v36 = vld [vmem:[#allocation28_spill] sm:$0xff]  ;;  %v1335_v7 = vrot.slane %v9476_v5, %v6779_v50 }
 0x153   :  { %v1522_v21 = vmul.f32 %v1491_v47, %v1471_v35  ;;  %v1523_v37 = vmul.f32 %v1495_v3, %v1470_v16  ;;  %v1109_v54 = vpop.permute.xlu1 %1108  ;;  %v1249_v3 = vrot.slane %v9475_v61, %v6779_v50  ;;  %v5342_v16 = vld [vmem:[#allocation3 + $0x20] sm:$0xff] }
 0x155   :  { %v1107_v0 = vpop.permute.xlu0 %1106  ;;  %v2369_v43 = vpack.c.bf16 %v1523_v37, %v1437_v6  ;;  %v2368_v45 = vpack.c.bf16 %v1522_v21, %v1436_v2  ;;  %v9486_v2 = vld [vmem:[#allocation18_spill] sm:$0xff] }
 0x156   :  { %v1117_v39 = vsel %vm9236_vm2, %v1107_v0, %v1109_v54  ;;  %v1118_v22 = vsel %vm9236_vm2, %v9484_v36, %v1107_v0 }
 0x157   :  { %v1172_v14 = vmul.f32 %v1147_v10, %v1118_v22  ;;  %v1173_v47 = vmul.f32 %v1151_v49, %v1117_v39  ;;  %2520 = vmatprep.subr.bf16.mxu1 %v2369_v43  ;;  %v1293_v55 = vpop.permute.xlu1 %1292  ;;  %v5343_v39 = vld [vmem:[#allocation3 + $0x28] sm:$0xff] }
 0x158   :  { %2521 = vmatpush2.bf16.msra.mxu1 %v2368_v45  ;;  %v1295_v36 = vsel %vm1294_vm0, %v1291_v1, %v1293_v55  ;;  %v1302_v5 = vsel %vm1294_vm0, %v1293_v55, %v9486_v2  ;;  %v9487_v45 = vld [vmem:[#allocation19_spill] sm:$0xff] }
 0x159   :  { %v2354_v35 = vpack.c.bf16 %v5342_v16, %v1172_v14  ;;  %v1207_v10 = vpop.permute.xlu0 %1206  ;;  %v2355_v43 = vpack.c.bf16 %v5343_v39, %v1173_v47  ;;  %v1354_v49 = vmul.f32 %v1335_v7, %v1295_v36  ;;  %v1355_v6 = vmul.f32 %v1339_v24, %v1302_v5  ;;  %v9490_v16 = vld [vmem:[#allocation32_spill] sm:$0xff] }
 0x15a   :  { %v1209_v61 = vsel %vm1208_vm1, %v6732_v48, %v1207_v10  ;;  %v1216_v21 = vsel %vm1208_vm1, %v1207_v10, %v9487_v45  ;;  %v9488_v48 = vld [vmem:[#allocation25_spill] sm:$0xff]  ;;  %v9491_v10 = vld [vmem:[#allocation34_spill] sm:$0xff] }
 0x15b   :  { %v1268_v37 = vmul.f32 %v1249_v3, %v1209_v61  ;;  %v1269_v0 = vmul.f32 %v1253_v27, %v1216_v21  ;;  %2533 = vmatprep.subr.bf16.mxu0 %v2355_v43  ;;  %2523 = vmatmul.mubr.bf16.vlgmr.msra.gmra.mxu1 %v6736_v26  ;;  %v6815_v1 = vpop.permute.xlu1 %936  ;;  %v975_v14 = vrot.slane %v9488_v48, %v6333_v8  ;;  %v9489_v3 = vld [vmem:[#allocation26_spill] sm:$0xff] }
 0x15c   :  { %2534 = vmatpush1.bf16.msra.mxu0 %v2354_v35  ;;  %5298 = vmatprep.mubr.msk.bf16.mxu1 %vm9235_vm7, %v9479_v13  ;;  %v979_v47 = vrot.slane %v9488_v48, %v6730_v20  ;;  %v1061_v27 = vrot.slane %v9489_v3, %v6333_v8  ;;  %v1065_v55 = vrot.slane %v9489_v3, %v6730_v20  ;;  %vm9495_vm7 = vcmp.lt.s32.totalorder %v5619_v12, 9 }
 0x15d   :  { %v2364_v22 = vpack.c.bf16 %v1354_v49, %v1268_v37  ;;  %v935_v7 = vpop.permute.xlu0 %934  ;;  %v2365_v24 = vpack.c.bf16 %v1355_v6, %v1269_v0  ;;  %v1155_v43 = vrot.slane %v9483_v29, %v6779_v50  ;;  %v1159_v49 = vrot.slane %v9483_v29, %v9485_v19 }
 0x15e   :  { %v945_v13 = vsel %vm942_vm3, %v935_v7, %v6815_v1  ;;  %v946_v35 = vsel %vm942_vm3, %v9490_v16, %v935_v7 }
 0x15f   :  { %2572 = vmatprep.subr.bf16.mxu1 %v2365_v24  ;;  %v1023_v36 = vpop.permute.xlu1 %1022  ;;  %v1000_v6 = vmul.f32 %v975_v14, %v946_v35  ;;  %v1001_v61 = vmul.f32 %v979_v47, %v945_v13  ;;  %v9492_v24 = vld [vmem:[#allocation30_spill] sm:$0xff] }
 0x160   :  { %2573 = vmatpush1.bf16.msra.mxu1 %v2364_v22  ;;  %v803_v16 = vrot.slane %v9492_v24, %v6333_v8 }
 0x161   :  { %v1021_v2 = vpop.permute.xlu0 %1020 }
 0x162   :  { %v1031_v5 = vsel %vm1028_vm4, %v1021_v2, %v1023_v36  ;;  %v1032_v39 = vsel %vm1028_vm4, %v9491_v10, %v1021_v2  ;;  %v807_v2 = vrot.slane %v9492_v24, %v6730_v20  ;;  %v9493_v10 = vld [vmem:[#allocation24_spill] sm:$0xff] }
 0x163   :  { %v1086_v45 = vmul.f32 %v1061_v27, %v1032_v39  ;;  %v1087_v21 = vmul.f32 %v1065_v55, %v1031_v5  ;;  %v6842_v37 = vpop.permute.xlu1 %764  ;;  %v9494_v27 = vld [vmem:[#allocation31_spill] sm:$0xff]  ;;  %v5344_v39 = vld [vmem:[#allocation3 + $0x30] sm:$0xff] }
 0x164   :  { %v889_v55 = vrot.slane %v9494_v27, %v6333_v8  ;;  %v893_v13 = vrot.slane %v9494_v27, %v6730_v20  ;;  %v6861_v35 = vsel %vm770_vm5, %v6469_v11, %v6842_v37 }
 0x165   :  { %v2346_v0 = vpack.c.bf16 %v1086_v45, %v1000_v6  ;;  %v1111_v22 = vpop.permute.xlu0 %1110  ;;  %v2347_v7 = vpack.c.bf16 %v1087_v21, %v1001_v61  ;;  %v9496_v45 = vld [vmem:[#allocation41_spill] sm:$0xff]  ;;  %v983_v21 = vrot.slane %v9488_v48, %v6779_v50 }
 0x166   :  { %v1115_v26 = vsel %vm9236_vm2, %v1111_v22, %v9493_v10  ;;  %v1116_v29 = vsel %vm9236_vm2, %v1109_v54, %v1111_v22  ;;  %vm9497_vm2 = vmmov %vm9495_vm7  ;;  %v829_v22 = vmul.f32 %v807_v2, %v6861_v35 }
 0x167   :  { %v1174_v14 = vmul.f32 %v1155_v43, %v1116_v29  ;;  %v1175_v47 = vmul.f32 %v1159_v49, %v1115_v26  ;;  %2535 = vmatprep.subr.bf16.mxu0 %v2347_v7  ;;  %v851_v5 = vpop.permute.xlu1 %850  ;;  %v1069_v43 = vrot.slane %v9489_v3, %v6779_v50  ;;  %v1073_v49 = vrot.slane %v9489_v3, %v9485_v19 }
 0x168   :  { %2536 = vmatpush1.bf16.msra.mxu0 %v2346_v0  ;;  %v987_v0 = vrot.slane %v9488_v48, %v9485_v19  ;;  %v721_v29 = vrot.slane %v5883_v38, %v6730_v20 }
 0x169   :  { %v2356_v6 = vpack.c.bf16 %v5344_v39, %v1174_v14  ;;  %v849_v54 = vpop.permute.xlu0 %848  ;;  %v2357_v26 = vpack.c.bf16 %v6536_v23, %v1175_v47  ;;  %v828_v23 = vmul.f32 %v803_v16, %v6477_v58  ;;  %v9498_v47 = vld [vmem:[#allocation29_spill] sm:$0xff] }
 0x16a   :  { %v859_v61 = vsel %vm9495_vm7, %v849_v54, %v851_v5  ;;  %v860_v11 = vsel %vm9497_vm2, %v9496_v45, %v849_v54  ;;  %v635_v45 = vrot.slane %v5876_v30, %v6730_v20  ;;  %vm9501_vm7 = vmmov %vm9497_vm2 }
 0x16b   :  { %v914_v7 = vmul.f32 %v889_v55, %v860_v11  ;;  %v915_v10 = vmul.f32 %v893_v13, %v859_v61  ;;  %2574 = vmatprep.subr.bf16.mxu1 %v2357_v26  ;;  %v1025_v3 = vpop.permute.xlu1 %1024  ;;  %v9499_v55 = vld [vmem:[#allocation27_spill] sm:$0xff] }
 0x16c   :  { %2575 = vmatpush1.bf16.msra.mxu1 %v2356_v6  ;;  %v1029_v39 = vsel %vm1028_vm4, %v1025_v3, %v9498_v47  ;;  %v1030_v48 = vsel %vm1028_vm4, %v1023_v36, %v1025_v3 }
 0x16d   :  { %v2338_v14 = vpack.c.bf16 %v914_v7, %v828_v23  ;;  %v939_v54 = vpop.permute.xlu0 %938  ;;  %v2339_v58 = vpack.c.bf16 %v915_v10, %v829_v22  ;;  %v1088_v16 = vmul.f32 %v1069_v43, %v1030_v48  ;;  %v1089_v2 = vmul.f32 %v1073_v49, %v1029_v39 }
 0x16e   :  { %v943_v13 = vsel %vm942_vm3, %v939_v54, %v9499_v55  ;;  %v944_v6 = vsel %vm942_vm3, %v6815_v1, %v939_v54  ;;  %v815_v10 = vrot.slane %v9492_v24, %v9485_v19  ;;  %v549_v39 = vrot.slane %v6010_v40, %v6730_v20 }
 0x16f   :  { %v1002_v26 = vmul.f32 %v983_v21, %v944_v6  ;;  %v1003_v61 = vmul.f32 %v987_v0, %v943_v13  ;;  %2537 = vmatprep.subr.bf16.mxu0 %v2339_v58  ;;  %v679_v36 = vpop.permute.xlu1 %678  ;;  %v897_v21 = vrot.slane %v9494_v27, %v6779_v50  ;;  %v901_v0 = vrot.slane %v9494_v27, %v9485_v19  ;;  %v9502_v58 = vld [vmem:[#allocation33_spill] sm:$0xff] }
 0x170   :  { %2538 = vmatpush1.bf16.msra.mxu0 %v2338_v14  ;;  %v6897_v43 = vsel %vm684_vm9, %v6511_v17, %v679_v36  ;;  %v811_v17 = vrot.slane %v9492_v24, %v6779_v50  ;;  %v463_v55 = vrot.slane %v6006_v25, %v6730_v20  ;;  %v9503_v13 = vpack.c.bf16 %v6530_v62, %v6544_v44 }
 0x171   :  { %v2348_v11 = vpack.c.bf16 %v1088_v16, %v1002_v26  ;;  %v593_v49 = vpop.permute.xlu0 %592  ;;  %v2349_v23 = vpack.c.bf16 %v1089_v2, %v1003_v61  ;;  %v743_v22 = vmul.f32 %v721_v29, %v6897_v43  ;;  %v9500_v29 = vld [vmem:[#allocation36_spill] sm:$0xff]  ;;  %v725_v62 = vrot.slane %v5883_v38, %v6779_v50 }
 0x172   :  { %v6903_v1 = vsel %vm598_vm8, %v6524_v60, %v593_v49 }
 0x173   :  { %v657_v7 = vmul.f32 %v635_v45, %v6903_v1  ;;  %2576 = vmatprep.subr.bf16.mxu1 %v2349_v23  ;;  %v853_v3 = vpop.permute.xlu1 %852 }
 0x174   :  { %2577 = vmatpush1.bf16.msra.mxu1 %v2348_v11  ;;  %v857_v60 = vsel %vm9497_vm2, %v853_v3, %v9500_v29  ;;  %v858_v14 = vsel %vm9501_vm7, %v851_v5, %v853_v3  ;;  %v2060_v3 = vrot.slane %v6254_v4, %v9485_v19  ;;  %vm9518_vm2 = vcmp.lt.s32.totalorder %v5619_v12, 73 }
 0x175   :  { %v767_v47 = vpop.permute.xlu0 %766  ;;  %v2331_v27 = vpack.c.bf16 %v743_v22, %v657_v7  ;;  %v916_v48 = vmul.f32 %v897_v21, %v858_v14  ;;  %v917_v54 = vmul.f32 %v901_v0, %v857_v60  ;;  %v729_v22 = vrot.slane %v5883_v38, %v9485_v19 }
 0x176   :  { %v6924_v24 = vsel %vm770_vm5, %v767_v47, %v9502_v58  ;;  %v6929_v16 = vsel %vm770_vm5, %v6842_v37, %v767_v47  ;;  %v639_v21 = vrot.slane %v5876_v30, %v6779_v50  ;;  %v643_v0 = vrot.slane %v5876_v30, %v9485_v19  ;;  %v9505_v30 = vld [vmem:[#allocation40_spill] sm:$0xff] }
 0x177   :  { %v830_v2 = vmul.f32 %v811_v17, %v6929_v16  ;;  %v831_v5 = vmul.f32 %v815_v10, %v6924_v24  ;;  %2539 = vmatprep.subr.bf16.mxu0 %v2331_v27  ;;  %v507_v6 = vpop.permute.xlu1 %506  ;;  %v291_v58 = vrot.slane %v6123_v41, %v6730_v20  ;;  %vm9525_vm7 = vcmask 1043456  }
 0x178   :  { %2540 = vmatpush1.bf16.msra.mxu0 %v9503_v13  ;;  %v6941_v61 = vsel %vm512_vm11, %v6551_v34, %v507_v6 }
 0x179   :  { %v2340_v26 = vpack.c.bf16 %v916_v48, %v830_v2  ;;  %v421_v37 = vpop.permute.xlu0 %420  ;;  %v571_v45 = vmul.f32 %v549_v39, %v6941_v61  ;;  %v2341_v23 = vpack.c.bf16 %v917_v54, %v831_v5  ;;  %v9506_v48 = vpack.c.bf16 %v6572_v15, %v6594_v28  ;;  %v9507_v5 = vld [vmem:[#allocation35_spill] sm:$0xff] }
 0x17a   :  { %v6947_v11 = vsel %vm426_vm10, %v6563_v9, %v421_v37  ;;  %v9504_v9 = vld [vmem:[#allocation42_spill] sm:$0xff] }
 0x17b   :  { %v485_v44 = vmul.f32 %v463_v55, %v6947_v11  ;;  %2578 = vmatprep.subr.bf16.mxu1 %v2341_v23  ;;  %v681_v34 = vpop.permute.xlu1 %680  ;;  %v6997_v55 = vmul.f32 %v2060_v3, %v9507_v5  ;;  %v2048_v23 = vrot.slane %v6254_v4, %v6333_v8 }
 0x17c   :  { %2579 = vmatpush1.bf16.msra.mxu1 %v2340_v26  ;;  %v6961_v7 = vsel %vm684_vm9, %v681_v34, %v9504_v9  ;;  %v6965_v17 = vsel %vm684_vm9, %v679_v36, %v681_v34  ;;  %v377_v36 = vrot.slane %v6128_v46, %v6730_v20  ;;  %v553_v26 = vrot.slane %v6010_v40, %v6779_v50 }
 0x17d   :  { %v595_v10 = vpop.permute.xlu0 %594  ;;  %v2323_v38 = vpack.c.bf16 %v571_v45, %v485_v44  ;;  %v744_v29 = vmul.f32 %v725_v62, %v6965_v17  ;;  %v745_v60 = vmul.f32 %v729_v22, %v6961_v7  ;;  %v467_v22 = vrot.slane %v6006_v25, %v6779_v50 }
 0x17e   :  { %v6974_v14 = vsel %vm598_vm8, %v595_v10, %v9505_v30  ;;  %v6978_v47 = vsel %vm598_vm8, %v593_v49, %v595_v10  ;;  %v471_v34 = vrot.slane %v6006_v25, %v9485_v19  ;;  %v2052_v25 = vrot.slane %v6254_v4, %v6730_v20  ;;  %v9510_v30 = vld [vmem:[#allocation49_spill] sm:$0xff] }
 0x17f   :  { %2541 = vmatprep.subr.bf16.mxu0 %v2323_v38  ;;  %v658_v27 = vmul.f32 %v639_v21, %v6978_v47  ;;  %v659_v39 = vmul.f32 %v643_v0, %v6974_v14  ;;  %v335_v54 = vpop.permute.xlu1 %334 }
 0x180   :  { %2542 = vmatpush1.bf16.msra.mxu0 %v9506_v48  ;;  %v6992_v49 = vsel %vm9241_vm13, %v6608_v42, %v335_v54  ;;  %v557_v42 = vrot.slane %v6010_v40, %v9485_v19  ;;  %v9508_v40 = vld [vmem:[#allocation51_spill] sm:$0xff] }
 0x181   :  { %v6994_v2 = vpop.permute.xlu0 %248  ;;  %v2332_v13 = vpack.c.bf16 %v744_v29, %v658_v27  ;;  %v399_v15 = vmul.f32 %v377_v36, %v6992_v49  ;;  %v2333_v45 = vpack.c.bf16 %v745_v60, %v659_v39  ;;  %v205_v29 = vrot.slane %v6248_v33, %v6730_v20  ;;  %v9512_v39 = vld [vmem:[#allocation43_spill] sm:$0xff] }
 0x182   :  { %v7006_v28 = vsel %vm254_vm12, %v6620_v57, %v6994_v2  ;;  %v9516_v48 = vld [vmem:[#allocation55_spill] sm:$0xff]  ;;  %v381_v57 = vrot.slane %v6128_v46, %v6779_v50 }
 0x183   :  { %v313_v62 = vmul.f32 %v291_v58, %v7006_v28  ;;  %v509_v44 = vpop.permute.xlu1 %508  ;;  %2580 = vmatprep.subr.bf16.mxu1 %v2333_v45 }
 0x184   :  { %v7024_v0 = vsel %vm512_vm11, %v509_v44, %v9508_v40  ;;  %v7028_v9 = vsel %vm512_vm11, %v507_v6, %v509_v44  ;;  %2581 = vmatpush1.bf16.msra.mxu1 %v2332_v13  ;;  %v1991_v44 = vrot.slane %v5885_v59, %v6730_v20  ;;  %v1869_v40 = vrot.slane %v9512_v39, %v6730_v20 }
 0x185   :  { %9509 = vst [vmem:[#allocation65_spill] sm:$0xff] %v7024_v0  ;;  %v423_v10 = vpop.permute.xlu0 %422  ;;  %v572_v3 = vmul.f32 %v553_v26, %v7028_v9  ;;  %v573_v60 = vmul.f32 %v557_v42, %v7024_v0  ;;  %v2315_v27 = vpack.c.bf16 %v399_v15, %v313_v62  ;;  %v9513_v26 = vld [vmem:[#allocation64_spill] sm:$0xff]  ;;  %v9515_v42 = vld [vmem:[#allocation59_spill] sm:$0xff] }
 0x186   :  { %v7041_v6 = vsel %vm426_vm10, %v423_v10, %v9510_v30  ;;  %v7045_v36 = vsel %vm426_vm10, %v421_v37, %v423_v10  ;;  %v119_v45 = vrot.slane %v9513_v26, %v6730_v20  ;;  %v1930_v37 = vrot.slane %v5878_v31, %v6730_v20  ;;  %v9514_v15 = vld [vmem:[#allocation48_spill] sm:$0xff] }
 0x187   :  { %9511 = vst [vmem:[#allocation56_spill] sm:$0xff] %v7041_v6  ;;  %v486_v58 = vmul.f32 %v467_v22, %v7045_v36  ;;  %v487_v5 = vmul.f32 %v471_v34, %v7041_v6  ;;  %v163_v13 = vpop.permute.xlu1 %162  ;;  %2543 = vmatprep.subr.bf16.mxu0 %v2315_v27  ;;  %v2073_v34 = vmul.f32 %v2048_v23, %v6861_v35 }
 0x188   :  { %v7062_v62 = vsel %vm9240_vm15, %v9514_v15, %v163_v13  ;;  %v1808_v10 = vrot.slane %v6008_v51, %v6730_v20  ;;  %v9517_v38 = vpack.c.bf16 %v9515_v42, %v9516_v48  ;;  %v2074_v27 = vmul.f32 %v2052_v25, %v6929_v16  ;;  %v9520_v42 = vld [vmem:[#allocation58_spill] sm:$0xff] }
 0x189   :  { %v76_v22 = vpop.permute.xlu0 %75  ;;  %v2324_v30 = vpack.c.bf16 %v572_v3, %v486_v58  ;;  %v227_v21 = vmul.f32 %v205_v29, %v7062_v62  ;;  %v2325_v35 = vpack.c.bf16 %v573_v60, %v487_v5  ;;  %v385_v3 = vrot.slane %v6128_v46, %v9485_v19  ;;  %v9519_v46 = vld [vmem:[#allocation61_spill] sm:$0xff] }
 0x18a   :  { %2544 = vmatpush1.bf16.msra.mxu0 %v9517_v38  ;;  %v7077_v15 = vsel %vm9518_vm2, %v6666_v18, %v76_v22  ;;  %v295_v16 = vrot.slane %v6123_v41, %v6779_v50  ;;  %v299_v18 = vrot.slane %v6123_v41, %v9485_v19  ;;  %v209_v29 = vrot.slane %v6248_v33, %v6779_v50  ;;  %vm9527_vm2 = vmmov %vm9525_vm7 }
 0x18b   :  { %v141_v23 = vmul.f32 %v119_v45, %v7077_v15  ;;  %v337_v48 = vpop.permute.xlu1 %336  ;;  %2582 = vmatprep.subr.bf16.mxu1 %v2325_v35  ;;  %v213_v60 = vrot.slane %v6248_v33, %v9485_v19  ;;  %v2410_v58 = vpack.c.bf16 %v2073_v34, %v2073_v34  ;;  %v127_v41 = vrot.slane %v9513_v26, %v9485_v19  ;;  %v9521_v19 = vld [vmem:[#allocation73_spill] sm:$0xff] }
 0x18c   :  { %v342_v25 = vsel %vm9241_vm13, %v335_v54, %v337_v48  ;;  %2583 = vmatpush1.bf16.msra.mxu1 %v2324_v30  ;;  %v7097_v5 = vsel %vm9241_vm13, %v337_v48, %v9519_v46  ;;  %v123_v54 = vrot.slane %v9513_v26, %v6779_v50  ;;  %v2411_v45 = vpack.c.bf16 %v2074_v27, %v2074_v27 }
 0x18d   :  { %v251_v38 = vpop.permute.xlu0 %250  ;;  %v2307_v34 = vpack.c.bf16 %v227_v21, %v141_v23  ;;  %v2013_v30 = vmul.f32 %v1991_v44, %v6965_v17  ;;  %v1952_v48 = vmul.f32 %v1930_v37, %v6978_v47  ;;  %v400_v46 = vmul.f32 %v381_v57, %v342_v25  ;;  %v9523_v57 = vld [vmem:[#allocation57_spill] sm:$0xff] }
 0x18e   :  { %v7106_v35 = vsel %vm254_vm12, %v251_v38, %v9520_v42  ;;  %v256_v33 = vsel %vm254_vm12, %v6994_v2, %v251_v38  ;;  %v401_v26 = vmul.f32 %v385_v3, %v7097_v5  ;;  %v9522_v17 = vrot.slane %v5885_v59, %v6333_v8 }
 0x18f   :  { %v314_v6 = vmul.f32 %v295_v16, %v256_v33  ;;  %v165_v0 = vpop.permute.xlu1 %164  ;;  %v315_v27 = vmul.f32 %v299_v18, %v7106_v35  ;;  %2545 = vmatprep.subr.bf16.mxu0 %v2307_v34  ;;  %v1747_v44 = vrot.slane %v9523_v57, %v6730_v20  ;;  %v1686_v37 = vrot.slane %v6185_v52, %v6730_v20 }
 0x190   :  { %v7118_v42 = vsel %vm9240_vm15, %v165_v0, %v9521_v19  ;;  %v170_v2 = vsel %vm9240_vm15, %v163_v13, %v165_v0  ;;  %v2012_v47 = vmul.f32 %v9522_v17, %v6897_v43  ;;  %v9524_v23 = vpack.c.bf16 %v6673_v63, %v6685_v32  ;;  %v9528_v43 = vld [vmem:[#allocation70_spill] sm:$0xff] }
 0x191   :  { %v78_v21 = vpop.permute.xlu0 %77  ;;  %v2438_v19 = vsel %vm9525_vm7, %v2410_v58, 0  ;;  %v9526_v0 = vrot.slane %v5878_v31, %v6333_v8  ;;  %v229_v3 = vmul.f32 %v213_v60, %v7118_v42  ;;  %vm9529_vm15 = vcmp.lt.s32.totalorder %v5619_v12, 73 }
 0x192   :  { %2546 = vmatpush1.bf16.msra.mxu0 %v9524_v23  ;;  %v7143_v16 = vsel %vm9529_vm15, %v78_v21, %v9528_v43  ;;  %vm9530_vm13 = vmmov %vm9529_vm15  ;;  %v2316_v32 = vpack.c.bf16 %v400_v46, %v314_v6  ;;  %v228_v18 = vmul.f32 %v209_v29, %v170_v2  ;;  %v1891_v34 = vmul.f32 %v1869_v40, %v7028_v9 }
 0x193   :  { %v1951_v13 = vmul.f32 %v9526_v0, %v6903_v1  ;;  %5295 = vmatprep.subr.msk.bf16.mxu0 %vm9527_vm2, %v2411_v45  ;;  %v85_v63 = vsel %vm9530_vm13, %v76_v22, %v78_v21  ;;  %v143_v58 = vmul.f32 %v127_v41, %v7143_v16  ;;  %v1830_v1 = vmul.f32 %v1808_v10, %v7045_v36  ;;  %v7150_v17 = vpop.permute.xlu1 %1376  ;;  %vm9536_vm13 = vmmov %vm9527_vm2 }
 0x194   :  { %v142_v38 = vmul.f32 %v123_v54, %v85_v63  ;;  %v2317_v60 = vpack.c.bf16 %v401_v26, %v315_v27  ;;  %v2403_v45 = vpack.c.bf16 %v2013_v30, %v1952_v48  ;;  %v2413_v0 = vpack.c.bf16 %v6997_v55, %v6997_v55  ;;  %vm9537_vm15 = vmmov %vm9527_vm2 }
 0x195   :  { %v7152_v23 = vpop.permute.xlu0 %1374  ;;  %v9531_v6 = vrot.slane %v6254_v4, %v6779_v50  ;;  %v1743_v29 = vrot.slane %v9523_v57, %v6333_v8  ;;  %v9532_v9 = vrot.slane %v9512_v39, %v6333_v8  ;;  %v9533_v40 = vrot.slane %v6008_v51, %v6333_v8 }
 0x196   :  { %2552 = vmatpush2.bf16.msra.mxu0 %v2438_v19  ;;  %2584 = vmatprep.subr.bf16.mxu1 %v2317_v60  ;;  %v2309_v55 = vpack.c.bf16 %v229_v3, %v143_v58  ;;  %v2402_v54 = vpack.c.bf16 %v2012_v47, %v1951_v13  ;;  %v1682_v4 = vrot.slane %v6185_v52, %v6333_v8  ;;  %vm9568_vm7 = vcmp.lt.s32.totalorder %v5619_v12, 1 }
 0x197   :  { %v2075_v22 = vmul.f32 %v9531_v6, %v6924_v24  ;;  %v1890_v36 = vmul.f32 %v9532_v9, %v6941_v61  ;;  %v1829_v10 = vmul.f32 %v9533_v40, %v6947_v11  ;;  %2553 = vmatprep.subr.bf16.mxu0 %v2403_v45  ;;  %v1625_v24 = vrot.slane %v6288_v56, %v6730_v20  ;;  %v9534_v61 = vld [vmem:[#allocation66_spill] sm:$0xff]  ;;  %v9540_v9 = vld [vmem:[#allocation44_spill] sm:$0xff]  ;;  %v9542_v40 = vld [vmem:[#allocation65_spill] sm:$0xff] }
 0x198   :  { %v2308_v41 = vpack.c.bf16 %v228_v18, %v142_v38  ;;  %2585 = vmatpush1.bf16.msra.mxu1 %v2316_v32  ;;  %v1769_v30 = vmul.f32 %v1747_v44, %v342_v25  ;;  %v1708_v48 = vmul.f32 %v1686_v37, %v256_v33  ;;  %v1564_v46 = vrot.slane %v9534_v61, %v6730_v20  ;;  %v7186_v37 = vpop.permute.xlu1 %1462  ;;  %vm9570_vm2 = vmmov %vm9568_vm7 }
 0x199   :  { %2586 = vmatprep.subr.bf16.mxu1 %v2309_v55  ;;  %v2395_v26 = vpack.c.bf16 %v1891_v34, %v1830_v1  ;;  %v1995_v11 = vrot.slane %v5885_v59, %v6779_v50  ;;  %v1934_v27 = vrot.slane %v5878_v31, %v6779_v50  ;;  %v1621_v21 = vrot.slane %v6288_v56, %v6333_v8  ;;  %v9535_v59 = vld [vmem:[#allocation50_spill] sm:$0xff]  ;;  %v1461_v13 = vpop.permute.xlu0 %1460  ;;  %v9543_v55 = vld [vmem:[#allocation56_spill] sm:$0xff] }
 0x19a   :  { %v1560_v47 = vrot.slane %v9534_v61, %v6333_v8  ;;  %2554 = vmatpush2.bf16.msra.mxu0 %v2402_v54  ;;  %v2412_v25 = vpack.c.bf16 %v2075_v22, %v2075_v22  ;;  %v2394_v33 = vpack.c.bf16 %v1890_v36, %v1829_v10  ;;  %v1417_v44 = vrot.slane %v6679_v53, %v6730_v20 }
 0x19b   :  { %2555 = vmatprep.subr.bf16.mxu0 %v2395_v26  ;;  %v1503_v19 = vrot.slane %v9535_v59, %v6730_v20  ;;  %v1768_v31 = vmul.f32 %v1743_v29, %v6992_v49  ;;  %v1707_v3 = vmul.f32 %v1682_v4, %v7006_v28  ;;  %v1382_v43 = vsel %vm1380_vm6, %v7152_v23, %v7150_v17  ;;  %v9539_v29 = vld [vmem:[#allocation45_spill] sm:$0xff] }
 0x19c   :  { %2587 = vmatpush1.bf16.msra.mxu1 %v2308_v41  ;;  %v1468_v32 = vsel %vm1466_vm14, %v1461_v13, %v7186_v37  ;;  %v1647_v18 = vmul.f32 %v1625_v24, %v170_v2  ;;  %v1586_v38 = vmul.f32 %v1564_v46, %v85_v63  ;;  %v2387_v58 = vpack.c.bf16 %v1769_v30, %v1708_v48  ;;  %v1465_v26 = vpop.permute.xlu1 %1464 }
 0x19d   :  { %5297 = vmatprep.subr.msk.bf16.mxu1 %vm9536_vm13, %v2413_v0  ;;  %v2014_v34 = vmul.f32 %v1995_v11, %v6961_v7  ;;  %v1953_v49 = vmul.f32 %v1934_v27, %v6974_v14  ;;  %v1873_v28 = vrot.slane %v9512_v39, %v6779_v50  ;;  %v1812_v1 = vrot.slane %v6008_v51, %v6779_v50  ;;  %v9538_v39 = vld [vmem:[#allocation68_spill] sm:$0xff]  ;;  %v1379_v11 = vpop.permute.xlu0 %1378  ;;  %v9545_v27 = vld [vmem:[#allocation53_spill] sm:$0xff]  ;;  %vm9580_vm13 = vmmov %vm9570_vm2 }
 0x19e   :  { %2556 = vmatpush2.bf16.msra.mxu0 %v2394_v33  ;;  %v1439_v60 = vmul.f32 %v1417_v44, %v1382_v43  ;;  %v1525_v45 = vmul.f32 %v1503_v19, %v1468_v32  ;;  %v2444_v6 = vsel %vm9537_vm15, %v2412_v25, 0  ;;  %v2386_v2 = vpack.c.bf16 %v1768_v31, %v1707_v3  ;;  %v9548_v19 = vld [vmem:[#allocation39_spill] sm:$0xff]  ;;  %v9549_v31 = vld [vmem:[#allocation54_spill] sm:$0xff]  ;;  %vm9581_vm15 = vmmov %vm9570_vm2 }
 0x19f   :  { %2557 = vmatprep.subr.bf16.mxu0 %v2387_v58  ;;  %v1646_v63 = vmul.f32 %v1621_v21, %v7062_v62  ;;  %v1585_v0 = vmul.f32 %v1560_v47, %v7077_v15  ;;  %v1499_v7 = vrot.slane %v9535_v59, %v6333_v8  ;;  %v1751_v14 = vrot.slane %v9523_v57, %v6779_v50  ;;  %v9546_v21 = vld [vmem:[#allocation52_spill] sm:$0xff]  ;;  %v9550_v43 = vld [vmem:[#allocation47_spill] sm:$0xff] }
 0x1a0   :  { %2593 = vmatpush2.bf16.msra.mxu1 %v2444_v6  ;;  %v1690_v51 = vrot.slane %v6185_v52, %v6779_v50  ;;  %v1469_v22 = vsel %vm1466_vm14, %v9538_v39, %v1461_v13  ;;  %v9541_v36 = vpack.c.bf16 %v9539_v29, %v9540_v9  ;;  %v2379_v62 = vpack.c.bf16 %v1647_v18, %v1586_v38  ;;  %v9544_v52 = vld [vmem:[#allocation71_spill] sm:$0xff]  ;;  %v9552_v18 = vld [vmem:[#allocation62_spill] sm:$0xff] }
 0x1a1   :  { %v2404_v15 = vpack.c.bf16 %v2014_v34, %v1953_v49  ;;  %v1892_v10 = vmul.f32 %v1873_v28, %v9542_v40  ;;  %v1831_v54 = vmul.f32 %v1812_v1, %v9543_v55  ;;  %v1413_v57 = vrot.slane %v6679_v53, %v6333_v8  ;;  %v9551_v32 = vld [vmem:[#allocation63_spill] sm:$0xff]  ;;  %v9554_v6 = vld [vmem:[#allocation74_spill] sm:$0xff] }
 0x1a2   :  { %2594 = vmatprep.subr.bf16.mxu1 %v9541_v36  ;;  %2558 = vmatpush2.bf16.msra.mxu0 %v2386_v2  ;;  %v1383_v4 = vsel %vm1380_vm6, %v9544_v52, %v7152_v23  ;;  %v2371_v24 = vpack.c.bf16 %v1525_v45, %v1439_v60  ;;  %v2378_v41 = vpack.c.bf16 %v1646_v63, %v1585_v0  ;;  %v9555_v2 = vld [vmem:[#allocation75_spill] sm:$0xff] }
 0x1a3   :  { %2559 = vmatprep.subr.bf16.mxu0 %v2379_v62  ;;  %v1524_v30 = vmul.f32 %v1499_v7, %v1469_v22  ;;  %v1629_v48 = vrot.slane %v6288_v56, %v6779_v50  ;;  %v1568_v46 = vrot.slane %v9534_v61, %v6779_v50  ;;  %v9547_v47 = vpack.c.bf16 %v9545_v27, %v9546_v21 }
 0x1a4   :  { %2595 = vmatpush2.bf16.msra.mxu1 %v2404_v15  ;;  %v2396_v25 = vpack.c.bf16 %v1892_v10, %v1831_v54  ;;  %v1770_v23 = vmul.f32 %v1751_v14, %v7097_v5  ;;  %v1709_v33 = vmul.f32 %v1690_v51, %v7106_v35  ;;  %v1438_v44 = vmul.f32 %v1413_v57, %v1383_v4 }
 0x1a5   :  { %2596 = vmatprep.subr.bf16.mxu1 %v9547_v47  ;;  %v1511_v13 = vrot.slane %v9535_v59, %v9548_v19  ;;  %v1425_v56 = vrot.slane %v6679_v53, %v9548_v19  ;;  %v1474_v3 = vsel %vm1466_vm14, %v1465_v26, %v9549_v31  ;;  %v1388_v5 = vsel %vm1380_vm6, %v1379_v11, %v9550_v43 }
 0x1a6   :  { %2560 = vmatpush2.bf16.msra.mxu0 %v2378_v41  ;;  %v2370_v61 = vpack.c.bf16 %v1524_v30, %v1438_v44  ;;  %v1507_v35 = vrot.slane %v9535_v59, %v6779_v50  ;;  %v9553_v38 = vpack.c.bf16 %v9551_v32, %v9552_v18  ;;  %v2388_v58 = vpack.c.bf16 %v1770_v23, %v1709_v33 }
 0x1a7   :  { %2561 = vmatprep.subr.bf16.mxu0 %v2371_v24  ;;  %v1648_v34 = vmul.f32 %v1629_v48, %v7118_v42  ;;  %v1587_v49 = vmul.f32 %v1568_v46, %v7143_v16  ;;  %v1421_v28 = vrot.slane %v6679_v53, %v6779_v50  ;;  %v1467_v1 = vsel %vm1466_vm14, %v7186_v37, %v1465_v26  ;;  %v9557_v16 = vld [vmem:[#allocation67_spill] sm:$0xff] }
 0x1a8   :  { %2597 = vmatpush2.bf16.msra.mxu1 %v2396_v25  ;;  %v1527_v60 = vmul.f32 %v1511_v13, %v1474_v3  ;;  %v1381_v59 = vsel %vm1380_vm6, %v7150_v17, %v1379_v11  ;;  %v1441_v45 = vmul.f32 %v1425_v56, %v1388_v5  ;;  %v9556_v42 = vpack.c.bf16 %v9554_v6, %v9555_v2 }
 0x1a9   :  { %2598 = vmatprep.subr.bf16.mxu1 %v9553_v38  ;;  %v2380_v63 = vpack.c.bf16 %v1648_v34, %v1587_v49  ;;  %v1526_v53 = vmul.f32 %v1507_v35, %v1467_v1  ;;  %v1440_v0 = vmul.f32 %v1421_v28, %v1381_v59  ;;  %v5439_v35 = vmov 0   ;;  %v2643_v1 = vld [vmem:[%s9130_s2] sm:$0xff] }
 0x1aa   :  { %2562 = vmatpush2.bf16.msra.mxu0 %v2370_v61  ;;  %v2373_v7 = vpack.c.bf16 %v1527_v60, %v1441_v45  ;;  %5331 = vset.pattern.permute.xlu0 %v5439_v35  ;;  %v2647_v45 = vld [vmem:[%s9131_s3] sm:$0xff] }
 0x1ab   :  { %v2372_v37 = vpack.c.bf16 %v1526_v53, %v1440_v0  ;;  %5332 = vset.pattern.permute.xlu1 %v5439_v35 }
 0x1ac   :  { %2599 = vmatpush2.bf16.msra.mxu1 %v2388_v58 }
 0x1ad   :  { %2600 = vmatprep.subr.bf16.mxu1 %v9556_v42  ;;  %2564 = vmatmul.mubr.bf16.vlgmr.msra.gmra.mxu0 %v9557_v16 }
 0x1b0   :  { %2601 = vmatpush2.bf16.msra.mxu1 %v2380_v63 }
 0x1b1   :  { %2602 = vmatprep.subr.bf16.mxu1 %v2373_v7 }
 0x1b4   :  { %2603 = vmatpush2.bf16.msra.mxu1 %v2372_v37 }
 0x1b7   :  { %2605 = vmatmul.mubr.bf16.vlgmr.msra.gmra.mxu1 %v9557_v16 }
 0x20a   :  { %v2483_v14 = vpop.f32.mrf.mxu0 }
 0x20b   :  { %v2623_v62 = vmul.f32 %v2483_v14, %v2483_v14 }
 0x20c   :  { %v2485_v17 = vpop.f32.mrf.mxu0 }
 0x20d   :  { %v2624_v15 = vmul.f32 %v2485_v17, %v2485_v17  ;;  %v2613_v40 = vadd.f32 %v2485_v17, %v2483_v14 }
 0x20e   :  { %v2487_v51 = vpop.f32.mrf.mxu0 }
 0x20f   :  { %v2631_v10 = vadd.f32 %v2624_v15, %v2623_v62 }
 0x210   :  { %v2488_v39 = vpop.f32.mrf.mxu0 }
 0x21b   :  { %v2524_v22 = vpop.f32.mrf.mxu1 }
 0x21c   :  { %v2625_v55 = vmul.f32 %v2524_v22, %v2524_v22  ;;  %v2614_v54 = vadd.f32 %v2613_v40, %v2524_v22 }
 0x21d   :  { %v2526_v29 = vpop.f32.mrf.mxu1 }
 0x21e   :  { %v2632_v52 = vadd.f32 %v2631_v10, %v2625_v55  ;;  %v2626_v4 = vmul.f32 %v2526_v29, %v2526_v29  ;;  %v2615_v41 = vadd.f32 %v2614_v54, %v2526_v29 }
 0x21f   :  { %v2528_v9 = vpop.f32.mrf.mxu1 }
 0x220   :  { %v2633_v46 = vadd.f32 %v2632_v52, %v2626_v4  ;;  %v3808_v52 = vld [vmem:[#allocation6 + $0x46] ss:$8 sm:$0xf] }
 0x221   :  { %v2529_v36 = vpop.f32.mrf.mxu1  ;;  %v3809_v4 = vld [vmem:[#allocation6 + $0x46] ss:$8 sm:$0xf0] }
 0x26d   :  { %v7268_v57 = vpop.f32.mrf.mxu0 }
 0x26e   :  { %v2627_v30 = vmul.f32 %v7268_v57, %v7268_v57  ;;  %v2616_v26 = vadd.f32 %v2615_v41, %v7268_v57  ;;  %v3892_v41 = vld [vmem:[#allocation6 + $0x47] ss:$8 sm:$0xf] }
 0x26f   :  { %v7270_v24 = vpop.f32.mrf.mxu0 }
 0x270   :  { %v2634_v27 = vadd.f32 %v2633_v46, %v2627_v30  ;;  %v2628_v21 = vmul.f32 %v7270_v24, %v7270_v24  ;;  %v2617_v47 = vadd.f32 %v2616_v26, %v7270_v24  ;;  %v3893_v30 = vld [vmem:[#allocation6 + $0x47] ss:$8 sm:$0xf0]  ;;  %v7442_v26 = vor.u32 %v3809_v4, %v3808_v52 }
 0x271   :  { %v2569_v48 = vpop.f32.mrf.mxu0  ;;  %v9574_v4 = vld [vmem:[#allocation20_spill] sm:$0xff] }
 0x272   :  { %v2635_v23 = vadd.f32 %v2634_v27, %v2628_v21  ;;  %9560 = vst [vmem:[#allocation12_spill] sm:$0xff] %v7442_v26 }
 0x273   :  { %v2570_v11 = vpop.f32.mrf.mxu0 }
 0x274   :  { %v7448_v11 = vor.u32 %v3893_v30, %v3892_v41  ;;  %v3827_v41 = vrot.slane %v7442_v26, %v9574_v4 }
 0x276   :  { %9561 = vst [vmem:[#allocation37_spill] sm:$0xff] %v7448_v11  ;;  %v3911_v30 = vrot.slane %v7448_v11, %v9574_v4 }
 0x277   :  { %v7278_v25 = vpop.f32.mrf.mxu1 }
 0x278   :  { %v2618_v33 = vadd.f32 %v2617_v47, %v7278_v25  ;;  %v2629_v44 = vmul.f32 %v7278_v25, %v7278_v25  ;;  %v9562_v47 = vld [vmem:[#allocation13_spill] sm:$0xff] }
 0x279   :  { %v2608_v13 = vpop.f32.mrf.mxu1 }
 0x27a   :  { %v2636_v56 = vadd.f32 %v2635_v23, %v2629_v44  ;;  %v2619_v61 = vadd.f32 %v2618_v33, %v2608_v13  ;;  %v2630_v31 = vmul.f32 %v2608_v13, %v2608_v13  ;;  %v3819_v23 = vrot.slane %v7442_v26, %v9562_v47 }
 0x27b   :  { %v2610_v3 = vpop.f32.mrf.mxu1  ;;  %v3903_v33 = vrot.slane %v7448_v11, %v9562_v47 }
 0x27c   :  { %2620 = vadd.xlane.f32.xlu0 %v2619_v61  ;;  %v2637_v43 = vadd.f32 %v2636_v56, %v2630_v31 }
 0x27d   :  { %v2611_v5 = vpop.f32.mrf.mxu1 }
 0x27e   :  { %2638 = vadd.xlane.f32.xlu1 %v2637_v43  ;;  %v3716_v43 = vld [vmem:[#allocation6 + $0x44] ss:$8 sm:$0xf] }
 0x27f   :  { %v3717_v5 = vld [vmem:[#allocation6 + $0x44] ss:$8 sm:$0xf0] }
 0x305   :  { %v2621_v32 = vpop.xlane.xlu0 %2620 }
 0x306   :  { %v2622_v18 = vmul.f32 0.0009765625, %v2621_v32 }
 0x307   :  { %v2639_v38 = vpop.xlane.xlu1 %2638 }
 0x308   :  { %v2641_v58 = vmul.f32 %v2622_v18, %v2622_v18  ;;  %v2640_v34 = vmul.f32 0.0009765625, %v2639_v38  ;;  %v7475_v38 = vor.u32 %v3717_v5, %v3716_v43 }
 0x30a   :  { %v2642_v49 = vsub.f32 %v2640_v34, %v2641_v58  ;;  %9565 = vst [vmem:[#allocation22_spill] sm:$0xff] %v7475_v38  ;;  %v9566_v58 = vld [vmem:[#allocation16_spill] sm:$0xff] }
 0x30b   :  { %v3815_v34 = vrot.slane %v7442_v26, %v9566_v58 }
 0x30c   :  { %v2644_v28 = vadd.f32 1e-05, %v2642_v49  ;;  %v3899_v49 = vrot.slane %v7448_v11, %v9566_v58 }
 0x30e   :  { %5337 = vrsqrt.f32 %v2644_v28 }
 0x31b   :  { %v5338_v60 = vpop.eup %5337 }
 0x31c   :  { %v2646_v59 = vmul.f32 %v5338_v60, %v2643_v1 }
 0x31e   :  { %2652 = vperm.xlu0 %5331, %v2646_v59   ;;  %v2648_v6 = vmul.f32 %v2646_v59, %v2622_v18  ;;  %v3723_v59 = vrot.slane %v7475_v38, %v9566_v58 }
 0x320   :  { %v2649_v2 = vsub.f32 %v2647_v45, %v2648_v6 }
 0x322   :  { %2665 = vperm.xlu1 %5332, %v2649_v2  }
 0x399   :  { %v7289_v42 = vpop.permute.xlu0 %2652 }
 0x39a   :  { %v2655_v16 = vmul.f32 %v7289_v42, %v2483_v14  ;;  %v2656_v63 = vmul.f32 %v7289_v42, %v2485_v17  ;;  %v2657_v0 = vmul.f32 %v7289_v42, %v2524_v22  ;;  %v2658_v7 = vmul.f32 %v7289_v42, %v2526_v29 }
 0x39b   :  { %v2662_v22 = vmul.f32 %v7289_v42, %v2608_v13  ;;  %v2659_v40 = vmul.f32 %v7289_v42, %v7268_v57 }
 0x39d   :  { %v7293_v53 = vpop.permute.xlu1 %2665 }
 0x39e   :  { %v2668_v37 = vadd.f32 %v7293_v53, %v2655_v16  ;;  %v2669_v51 = vadd.f32 %v7293_v53, %v2656_v63  ;;  %v2670_v39 = vadd.f32 %v7293_v53, %v2657_v0  ;;  %v2671_v9 = vadd.f32 %v7293_v53, %v2658_v7 }
 0x39f   :  { %v2675_v29 = vadd.f32 %v7293_v53, %v2662_v22  ;;  %v2672_v10 = vadd.f32 %v7293_v53, %v2659_v40  ;;  %v3727_v63 = vrot.slane %v7475_v38, %v9562_v47 }
 0x3a0   :  { %v7301_v36 = vmax.f32 %v2668_v37, 0.0  ;;  %v7303_v62 = vmax.f32 %v2669_v51, 0.0  ;;  %v7309_v14 = vmax.f32 %v2670_v39, 0.0  ;;  %v7311_v17 = vmax.f32 %v2671_v9, 0.0 }
 0x3a1   :  { %v7323_v15 = vmax.f32 %v2675_v29, 0.0  ;;  %v7344_v55 = vmax.f32 %v2672_v10, 0.0  ;;  %v9573_v10 = vld [vmem:[#allocation21_spill] sm:$0xff] }
 0x3a2   :  { %3786 = vrot.lane.b32.xlu1 %v7303_v62, %s5424_s17  ;;  %3692 = vrot.lane.b32.xlu0 %v7301_v36, %s5425_s7 }
 0x3a3   :  { %9558 = vst [vmem:[#allocation72_spill] sm:$0xff] %v7323_v15  ;;  %9559 = vst [vmem:[#allocation69_spill] sm:$0xff] %v7344_v55 }
 0x3a6   :  { %3788 = vrot.lane.b32.xlu1 %v7309_v14, %s5424_s17  ;;  %3790 = vrot.lane.b32.xlu0 %v7311_v17, %s5424_s17 }
 0x3aa   :  { %3870 = vrot.lane.b32.xlu1 %v7303_v62, %s5423_s0  ;;  %3874 = vrot.lane.b32.xlu0 %v7311_v17, %s5423_s0 }
 0x3ae   :  { %3872 = vrot.lane.b32.xlu1 %v7309_v14, %s5423_s0  ;;  %3706 = vrot.lane.b32.xlu0 %v7323_v15, %s5425_s7 }
 0x3b2   :  { %3526 = vrot.lane.b32.xlu0 %v7303_v62, %s5426_s18  ;;  %3784 = vrot.lane.b32.xlu1 %v7301_v36, %s5424_s17 }
 0x3b6   :  { %3610 = vrot.lane.b32.xlu0 %v7303_v62, %s5427_s19  ;;  %3868 = vrot.lane.b32.xlu1 %v7301_v36, %s5423_s0 }
 0x3ba   :  { %3698 = vrot.lane.b32.xlu0 %v7311_v17, %s5425_s7  ;;  %3694 = vrot.lane.b32.xlu1 %v7303_v62, %s5425_s7 }
 0x3be   :  { %3622 = vrot.lane.b32.xlu0 %v7323_v15, %s5427_s19  ;;  %3792 = vrot.lane.b32.xlu1 %v7344_v55, %s5424_s17 }
 0x3c2   :  { %3358 = vrot.lane.b32.xlu0 %v7303_v62, %s5428_s20  ;;  %3876 = vrot.lane.b32.xlu1 %v7344_v55, %s5423_s0 }
 0x3c6   :  { %3442 = vrot.lane.b32.xlu0 %v7303_v62, %s5429_s21  ;;  %3524 = vrot.lane.b32.xlu1 %v7301_v36, %s5426_s18 }
 0x3ca   :  { %3530 = vrot.lane.b32.xlu0 %v7311_v17, %s5426_s18  ;;  %3608 = vrot.lane.b32.xlu1 %v7301_v36, %s5427_s19 }
 0x3ce   :  { %3614 = vrot.lane.b32.xlu0 %v7311_v17, %s5427_s19  ;;  %3696 = vrot.lane.b32.xlu1 %v7309_v14, %s5425_s7 }
 0x3d2   :  { %3454 = vrot.lane.b32.xlu0 %v7323_v15, %s5429_s21  ;;  %3538 = vrot.lane.b32.xlu1 %v7323_v15, %s5426_s18 }
 0x3d6   :  { %3190 = vrot.lane.b32.xlu0 %v7303_v62, %s5430_s22  ;;  %3356 = vrot.lane.b32.xlu1 %v7301_v36, %s5428_s20 }
 0x3da   :  { %3274 = vrot.lane.b32.xlu0 %v7303_v62, %s5431_s23  ;;  %3440 = vrot.lane.b32.xlu1 %v7301_v36, %s5429_s21 }
 0x3de   :  { %3362 = vrot.lane.b32.xlu0 %v7311_v17, %s5428_s20  ;;  %3528 = vrot.lane.b32.xlu1 %v7309_v14, %s5426_s18 }
 0x3e2   :  { %3446 = vrot.lane.b32.xlu0 %v7311_v17, %s5429_s21  ;;  %3612 = vrot.lane.b32.xlu1 %v7309_v14, %s5427_s19 }
 0x3e6   :  { %3286 = vrot.lane.b32.xlu0 %v7323_v15, %s5431_s23  ;;  %3370 = vrot.lane.b32.xlu1 %v7323_v15, %s5428_s20 }
 0x3ea   :  { %3022 = vrot.lane.b32.xlu0 %v7303_v62, %s5422_s14  ;;  %3188 = vrot.lane.b32.xlu1 %v7301_v36, %s5430_s22 }
 0x3ee   :  { %3106 = vrot.lane.b32.xlu0 %v7303_v62, %s5432_s24  ;;  %3272 = vrot.lane.b32.xlu1 %v7301_v36, %s5431_s23 }
 0x3f2   :  { %3194 = vrot.lane.b32.xlu0 %v7311_v17, %s5430_s22  ;;  %3360 = vrot.lane.b32.xlu1 %v7309_v14, %s5428_s20 }
 0x3f6   :  { %3278 = vrot.lane.b32.xlu0 %v7311_v17, %s5431_s23  ;;  %3444 = vrot.lane.b32.xlu1 %v7309_v14, %s5429_s21 }
 0x3fa   :  { %3118 = vrot.lane.b32.xlu0 %v7323_v15, %s5432_s24  ;;  %3202 = vrot.lane.b32.xlu1 %v7323_v15, %s5430_s22 }
 0x3fe   :  { %2854 = vrot.lane.b32.xlu0 %v7303_v62, %s5433_s25  ;;  %3020 = vrot.lane.b32.xlu1 %v7301_v36, %s5422_s14 }
 0x402   :  { %2938 = vrot.lane.b32.xlu0 %v7303_v62, %s5434_s26  ;;  %3104 = vrot.lane.b32.xlu1 %v7301_v36, %s5432_s24 }
 0x406   :  { %3026 = vrot.lane.b32.xlu0 %v7311_v17, %s5422_s14  ;;  %3192 = vrot.lane.b32.xlu1 %v7309_v14, %s5430_s22 }
 0x40a   :  { %3110 = vrot.lane.b32.xlu0 %v7311_v17, %s5432_s24  ;;  %3276 = vrot.lane.b32.xlu1 %v7309_v14, %s5431_s23 }
 0x40e   :  { %2950 = vrot.lane.b32.xlu0 %v7323_v15, %s5434_s26  ;;  %3034 = vrot.lane.b32.xlu1 %v7323_v15, %s5422_s14 }
 0x412   :  { %2686 = vrot.lane.b32.xlu0 %v7303_v62, %s5435_s27  ;;  %2852 = vrot.lane.b32.xlu1 %v7301_v36, %s5433_s25 }
 0x414   :  { %v3787_v54 = vpop.permute.xlu1 %3786  ;;  %v3693_v57 = vpop.permute.xlu0 %3692 }
 0x416   :  { %2770 = vrot.lane.b32.xlu0 %v7303_v62, %s5436_s28  ;;  %2936 = vrot.lane.b32.xlu1 %v7301_v36, %s5434_s26 }
 0x418   :  { %v7438_v48 = vpop.permute.xlu1 %3788  ;;  %v7440_v46 = vpop.permute.xlu0 %3790 }
 0x419   :  { %v3805_v44 = vsel %vm1208_vm1, %v3787_v54, %v7438_v48 }
 0x41a   :  { %2858 = vrot.lane.b32.xlu0 %v7311_v17, %s5433_s25  ;;  %3024 = vrot.lane.b32.xlu1 %v7309_v14, %s5422_s14  ;;  %v3853_v31 = vmul.f32 %v3819_v23, %v3805_v44  ;;  %v3549_v23 = vld [vmem:[#allocation6 + $0x42] ss:$8 sm:$0xf0] }
 0x41c   :  { %v3871_v27 = vpop.permute.xlu1 %3870  ;;  %v7450_v21 = vpop.permute.xlu0 %3874 }
 0x41e   :  { %2942 = vrot.lane.b32.xlu0 %v7311_v17, %s5434_s26  ;;  %3108 = vrot.lane.b32.xlu1 %v7309_v14, %s5432_s24 }
 0x420   :  { %v3873_v13 = vpop.permute.xlu1 %3872  ;;  %v7463_v56 = vpop.permute.xlu0 %3706 }
 0x421   :  { %9563 = vst [vmem:[#allocation14_spill] sm:$0xff] %v7463_v56  ;;  %v3889_v61 = vsel %vm1294_vm0, %v3871_v27, %v3873_v13  ;;  %v3715_v6 = vsel %vm9568_vm7, %v7463_v56, %v3693_v57  ;;  %vm9587_vm7 = vcmp.lt.s32.totalorder %v5619_v12, 9 }
 0x422   :  { %v3937_v3 = vmul.f32 %v3903_v33, %v3889_v61  ;;  %2782 = vrot.lane.b32.xlu0 %v7323_v15, %s5436_s28  ;;  %2866 = vrot.lane.b32.xlu1 %v7323_v15, %s5433_s25  ;;  %v3760_v51 = vmul.f32 %v3723_v59, %v3715_v6  ;;  %v3823_v33 = vrot.slane %v7442_v26, %v9573_v10  ;;  %v3633_v61 = vld [vmem:[#allocation6 + $0x43] ss:$8 sm:$0xf0] }
 0x424   :  { %v7471_v35 = vpop.permute.xlu0 %3526  ;;  %v7473_v32 = vpop.permute.xlu1 %3784  ;;  %v4934_v18 = vpack.c.bf16 %v3937_v3, %v3853_v31  ;;  %v4925_v52 = vpack.c.bf16 %v7301_v36, %v3760_v51  ;;  %v3804_v31 = vsel %vm1208_vm1, %v7438_v48, %v7440_v46 }
 0x425   :  { %9564 = vst [vmem:[#allocation15_spill] sm:$0xff] %v7473_v32  ;;  %v3806_v28 = vsel %vm1208_vm1, %v7473_v32, %v3787_v54  ;;  %v3907_v54 = vrot.slane %v7448_v11, %v9573_v10  ;;  %v3854_v48 = vmul.f32 %v3823_v33, %v3804_v31  ;;  %v3380_v31 = vld [vmem:[#allocation6 + $0x40] ss:$8 sm:$0xf] }
 0x426   :  { %5022 = vmatprep.subr.bf16.mxu0 %v4934_v18  ;;  %2690 = vrot.lane.b32.xlu0 %v7311_v17, %s5435_s27  ;;  %v3852_v2 = vmul.f32 %v3815_v34, %v3806_v28 }
 0x427   :  { %2684 = vrot.lane.b32.xlu1 %v7301_v36, %s5435_s27 }
 0x428   :  { %v7488_v1 = vpop.permute.xlu0 %3610  ;;  %v7490_v60 = vpop.permute.xlu1 %3868 }
 0x429   :  { %9567 = vst [vmem:[#allocation23_spill] sm:$0xff] %v7490_v60  ;;  %v3890_v45 = vsel %vm1294_vm0, %v7490_v60, %v3871_v27  ;;  %v3548_v27 = vld [vmem:[#allocation6 + $0x42] ss:$8 sm:$0xf] }
 0x42a   :  { %v3936_v16 = vmul.f32 %v3899_v49, %v3890_v45  ;;  %2774 = vrot.lane.b32.xlu0 %v7311_v17, %s5436_s28  ;;  %v7556_v28 = vor.u32 %v3549_v23, %v3548_v27  ;;  %v2660_v27 = vmul.f32 %v7289_v42, %v7270_v24 }
 0x42b   :  { %2768 = vrot.lane.b32.xlu1 %v7301_v36, %s5436_s28 }
 0x42c   :  { %v4933_v0 = vpack.c.bf16 %v3936_v16, %v3852_v2  ;;  %v7506_v7 = vpop.permute.xlu0 %3698  ;;  %v7508_v37 = vpop.permute.xlu1 %3694  ;;  %9576 = vst [vmem:[#allocation19_spill] sm:$0xff] %v7556_v28  ;;  %v3555_v24 = vrot.slane %v7556_v28, %v9566_v58 }
 0x42d   :  { %9569 = vst [vmem:[#allocation38_spill] sm:$0xff] %v7506_v7  ;;  %v3714_v39 = vsel %vm9570_vm2, %v3693_v57, %v7508_v37  ;;  %v3888_v57 = vsel %vm1294_vm0, %v3873_v13, %v7450_v21  ;;  %v3632_v13 = vld [vmem:[#allocation6 + $0x43] ss:$8 sm:$0xf]  ;;  %vm9589_vm2 = vmmov %vm9587_vm7 }
 0x42e   :  { %v3761_v9 = vmul.f32 %v3727_v63, %v3714_v39  ;;  %3196 = vrot.lane.b32.xlu0 %v7344_v55, %s5430_s22  ;;  %5023 = vmatpush1.bf16.msra.mxu0 %v4933_v0  ;;  %v3938_v5 = vmul.f32 %v3907_v54, %v3888_v57  ;;  %v7558_v59 = vor.u32 %v3633_v61, %v3632_v13 }
 0x42f   :  { %2856 = vrot.lane.b32.xlu1 %v7309_v14, %s5433_s25  ;;  %v3731_v54 = vrot.slane %v7475_v38, %v9573_v10 }
 0x430   :  { %v7517_v22 = vpop.permute.xlu0 %3622  ;;  %v7519_v29 = vpop.permute.xlu1 %3792  ;;  %v4926_v40 = vpack.c.bf16 %v7303_v62, %v3761_v9  ;;  %9577 = vst [vmem:[#allocation25_spill] sm:$0xff] %v7558_v59  ;;  %v4935_v2 = vpack.c.bf16 %v3938_v5, %v3854_v48  ;;  %v3643_v16 = vrot.slane %v7558_v59, %v9562_v47  ;;  %v3639_v23 = vrot.slane %v7558_v59, %v9566_v58  ;;  %v3381_v5 = vld [vmem:[#allocation6 + $0x40] ss:$8 sm:$0xf0] }
 0x431   :  { %9571 = vst [vmem:[#allocation17_spill] sm:$0xff] %v7517_v22  ;;  %9572 = vst [vmem:[#allocation28_spill] sm:$0xff] %v7519_v29  ;;  %v3803_v44 = vsel %vm1208_vm1, %v7440_v46, %v7519_v29 }
 0x432   :  { %3028 = vrot.lane.b32.xlu0 %v7344_v55, %s5422_s14  ;;  %5024 = vmatprep.subr.bf16.mxu0 %v4926_v40  ;;  %v3855_v34 = vmul.f32 %v3827_v41, %v3803_v44 }
 0x433   :  { %2940 = vrot.lane.b32.xlu1 %v7309_v14, %s5434_s26  ;;  %5025 = vmatpush1.bf16.msra.mxu0 %v4925_v52  ;;  %v3735_v52 = vrot.slane %v7475_v38, %v9574_v4  ;;  %v2960_v38 = vld [vmem:[#allocation6 + $0x3] ss:$8 sm:$0xf] }
 0x434   :  { %v7546_v3 = vpop.permute.xlu0 %3358  ;;  %v7548_v43 = vpop.permute.xlu1 %3876 }
 0x435   :  { %9575 = vst [vmem:[#allocation18_spill] sm:$0xff] %v7548_v43  ;;  %v3887_v18 = vsel %vm1294_vm0, %v7450_v21, %v7548_v43  ;;  %v3559_v21 = vrot.slane %v7556_v28, %v9562_v47 }
 0x436   :  { %v3939_v49 = vmul.f32 %v3911_v30, %v3887_v18  ;;  %2860 = vrot.lane.b32.xlu0 %v7344_v55, %s5433_s25 }
 0x437   :  { %2698 = vrot.lane.b32.xlu1 %v7323_v15, %s5435_s27 }
 0x438   :  { %v7562_v46 = vpop.permute.xlu0 %3442  ;;  %v3525_v45 = vpop.permute.xlu1 %3524  ;;  %v4936_v6 = vpack.c.bf16 %v3939_v49, %v3855_v34  ;;  %v3464_v34 = vld [vmem:[#allocation6 + $0x41] ss:$8 sm:$0xf]  ;;  %v2673_v49 = vadd.f32 %v7293_v53, %v2660_v27 }
 0x439   :  { %v3546_v63 = vsel %vm942_vm3, %v3525_v45, %v7471_v35 }
 0x43a   :  { %2692 = vrot.lane.b32.xlu0 %v7344_v55, %s5435_s27  ;;  %5063 = vmatprep.subr.bf16.mxu1 %v4936_v6  ;;  %v3593_v9 = vmul.f32 %v3559_v21, %v3546_v63 }
 0x43b   :  { %2688 = vrot.lane.b32.xlu1 %v7309_v14, %s5435_s27  ;;  %5064 = vmatpush1.bf16.msra.mxu1 %v4935_v2 }
 0x43c   :  { %v7575_v0 = vpop.permute.xlu0 %3530  ;;  %v3609_v51 = vpop.permute.xlu1 %3608 }
 0x43d   :  { %9578 = vst [vmem:[#allocation26_spill] sm:$0xff] %v7575_v0  ;;  %v3630_v39 = vsel %vm1028_vm4, %v3609_v51, %v7488_v1  ;;  %v3631_v18 = vsel %vm1028_vm4, %v7517_v22, %v3609_v51 }
 0x43e   :  { %v3677_v40 = vmul.f32 %v3643_v16, %v3630_v39  ;;  %3954 = vrot.lane.b32.xlu0 %v7303_v62, %s5437_s29  ;;  %v7619_v16 = vor.u32 %v3381_v5, %v3380_v31  ;;  %v3676_v63 = vmul.f32 %v3639_v23, %v3631_v18  ;;  %v3563_v5 = vrot.slane %v7556_v28, %v9573_v10 }
 0x43f   :  { %2772 = vrot.lane.b32.xlu1 %v7309_v14, %s5436_s28  ;;  %v3567_v18 = vrot.slane %v7556_v28, %v9574_v4 }
 0x440   :  { %v7588_v57 = vpop.permute.xlu0 %3614  ;;  %v3697_v41 = vpop.permute.xlu1 %3696  ;;  %v4918_v30 = vpack.c.bf16 %v3677_v40, %v3593_v9  ;;  %9584 = vst [vmem:[#allocation24_spill] sm:$0xff] %v7619_v16  ;;  %v7627_v9 = vmax.f32 %v2673_v49, 0.0 }
 0x441   :  { %9579 = vst [vmem:[#allocation32_spill] sm:$0xff] %v7588_v57  ;;  %v3712_v33 = vsel %vm9580_vm13, %v3697_v41, %v7506_v7  ;;  %v3713_v44 = vsel %vm9581_vm15, %v7508_v37, %v3697_v41  ;;  %v3465_v37 = vld [vmem:[#allocation6 + $0x41] ss:$8 sm:$0xf0]  ;;  %vm9598_vm13 = vcmask 719872  }
 0x442   :  { %v3762_v13 = vmul.f32 %v3731_v54, %v3713_v44  ;;  %v3763_v61 = vmul.f32 %v3735_v52, %v3712_v33  ;;  %4038 = vrot.lane.b32.xlu0 %v7303_v62, %s5438_s30  ;;  %5026 = vmatprep.subr.bf16.mxu0 %v4918_v30  ;;  %v7623_v39 = vor.u32 %v3465_v37, %v3464_v34  ;;  %vm9599_vm15 = vmmov %vm9598_vm13 }
 0x443   :  { %3364 = vrot.lane.b32.xlu1 %v7344_v55, %s5428_s20  ;;  %9586 = vst [vmem:[#allocation41_spill] sm:$0xff] %v7627_v9  ;;  %v3391_v52 = vrot.slane %v7619_v16, %v9562_v47  ;;  %v3647_v34 = vrot.slane %v7558_v59, %v9573_v10  ;;  %v3651_v37 = vrot.slane %v7558_v59, %v9574_v4 }
 0x444   :  { %v4927_v48 = vpack.c.bf16 %v7309_v14, %v3762_v13  ;;  %v7611_v62 = vpop.permute.xlu0 %3454  ;;  %v7613_v6 = vpop.permute.xlu1 %3538  ;;  %v4928_v2 = vpack.c.bf16 %v7311_v17, %v3763_v61  ;;  %9585 = vst [vmem:[#allocation31_spill] sm:$0xff] %v7623_v39  ;;  %v3475_v41 = vrot.slane %v7623_v39, %v9562_v47 }
 0x445   :  { %9582 = vst [vmem:[#allocation34_spill] sm:$0xff] %v7611_v62  ;;  %9583 = vst [vmem:[#allocation30_spill] sm:$0xff] %v7613_v6  ;;  %v3547_v21 = vsel %vm942_vm3, %v7613_v6, %v3525_v45  ;;  %v3296_v6 = vld [vmem:[#allocation6 + $0x7] ss:$8 sm:$0xf] }
 0x446   :  { %v3592_v51 = vmul.f32 %v3555_v24, %v3547_v21  ;;  %3952 = vrot.lane.b32.xlu0 %v7301_v36, %s5437_s29  ;;  %5065 = vmatprep.subr.bf16.mxu1 %v4928_v2 }
 0x447   :  { %3280 = vrot.lane.b32.xlu1 %v7344_v55, %s5431_s23  ;;  %5066 = vmatpush1.bf16.msra.mxu1 %v4927_v48 }
 0x448   :  { %v4917_v40 = vpack.c.bf16 %v3676_v63, %v3592_v51  ;;  %v7629_v54 = vpop.permute.xlu0 %3190  ;;  %v3357_v45 = vpop.permute.xlu1 %3356  ;;  %v3212_v63 = vld [vmem:[#allocation6 + $0x6] ss:$8 sm:$0xf] }
 0x449   :  { %v7640_v30 = vsel %vm770_vm5, %v3357_v45, %v7546_v3  ;;  %v3213_v51 = vld [vmem:[#allocation6 + $0x6] ss:$8 sm:$0xf0] }
 0x44a   :  { %3794 = vrot.lane.b32.xlu0 %v7627_v9, %s5424_s17  ;;  %5027 = vmatpush1.bf16.msra.mxu0 %v4917_v40  ;;  %v3425_v44 = vmul.f32 %v3391_v52, %v7640_v30  ;;  %v3471_v40 = vrot.slane %v7623_v39, %v9566_v58 }
 0x44b   :  { %3112 = vrot.lane.b32.xlu1 %v7344_v55, %s5432_s24 }
 0x44c   :  { %v7644_v27 = vpop.permute.xlu0 %3274  ;;  %v3441_v23 = vpop.permute.xlu1 %3440 }
 0x44d   :  { %v3462_v33 = vsel %vm9587_vm7, %v3441_v23, %v7562_v46  ;;  %v3463_v28 = vsel %vm9589_vm2, %v7611_v62, %v3441_v23  ;;  %vm9603_vm7 = vmmov %vm9589_vm2 }
 0x44e   :  { %v3509_v13 = vmul.f32 %v3475_v41, %v3462_v33  ;;  %3878 = vrot.lane.b32.xlu0 %v7627_v9, %s5423_s0  ;;  %v4480_v33 = vld [vmem:[#allocation6 + $0xc0] ss:$8 sm:$0xf] }
 0x44f   :  { %2944 = vrot.lane.b32.xlu1 %v7344_v55, %s5434_s26 }
 0x450   :  { %v7654_v61 = vpop.permute.xlu0 %3362  ;;  %v3529_v24 = vpop.permute.xlu1 %3528  ;;  %v4910_v31 = vpack.c.bf16 %v3509_v13, %v3425_v44  ;;  %v4481_v44 = vld [vmem:[#allocation6 + $0xc0] ss:$8 sm:$0xf0] }
 0x451   :  { %v3544_v49 = vsel %vm942_vm3, %v3529_v24, %v7575_v0  ;;  %v3545_v48 = vsel %vm942_vm3, %v7471_v35, %v3529_v24  ;;  %v3387_v35 = vrot.slane %v7619_v16, %v9566_v58  ;;  %v3297_v0 = vld [vmem:[#allocation6 + $0x7] ss:$8 sm:$0xf0] }
 0x452   :  { %3958 = vrot.lane.b32.xlu0 %v7311_v17, %s5437_s29  ;;  %5028 = vmatprep.subr.bf16.mxu0 %v4910_v31  ;;  %v3594_v13 = vmul.f32 %v3563_v5, %v3545_v48  ;;  %v3595_v24 = vmul.f32 %v3567_v18, %v3544_v49  ;;  %v7706_v23 = vor.u32 %v3297_v0, %v3296_v6 }
 0x453   :  { %2776 = vrot.lane.b32.xlu1 %v7344_v55, %s5436_s28  ;;  %v3508_v49 = vmul.f32 %v3471_v40, %v3463_v28 }
 0x454   :  { %v7674_v2 = vpop.permute.xlu0 %3446  ;;  %v3613_v21 = vpop.permute.xlu1 %3612  ;;  %9594 = vst [vmem:[#allocation40_spill] sm:$0xff] %v7706_v23 }
 0x455   :  { %9588 = vst [vmem:[#allocation29_spill] sm:$0xff] %v7674_v2  ;;  %v3628_v52 = vsel %vm1028_vm4, %v3613_v21, %v7588_v57  ;;  %v3629_v41 = vsel %vm1028_vm4, %v7488_v1, %v3613_v21  ;;  %v4540_v1 = vld [vmem:[#allocation6 + $0xc1] ss:$8 sm:$0xf] }
 0x456   :  { %v3678_v31 = vmul.f32 %v3647_v34, %v3629_v41  ;;  %v3679_v22 = vmul.f32 %v3651_v37, %v3628_v52  ;;  %4042 = vrot.lane.b32.xlu0 %v7311_v17, %s5438_s30  ;;  %v4541_v21 = vld [vmem:[#allocation6 + $0xc1] ss:$8 sm:$0xf0]  ;;  %v7702_v34 = vor.u32 %v3213_v51, %v3212_v63  ;;  %v7704_v37 = vor.u32 %v4481_v44, %v4480_v33 }
 0x457   :  { %3956 = vrot.lane.b32.xlu1 %v7309_v14, %s5437_s29  ;;  %v7711_v52 = vor.u32 %v4541_v21, %v4540_v1  ;;  %v7727_v51 = vld [vmem:[%s9132_s4] sm:$0xff] }
 0x458   :  { %v4919_v57 = vpack.c.bf16 %v3678_v31, %v3594_v13  ;;  %v7693_v59 = vpop.permute.xlu0 %3286  ;;  %v7695_v5 = vpop.permute.xlu1 %3370  ;;  %v4920_v18 = vpack.c.bf16 %v3679_v22, %v3595_v24  ;;  %9593 = vst [vmem:[#allocation42_spill] sm:$0xff] %v7704_v37  ;;  %v2661_v22 = vmul.f32 %v7289_v42, %v7278_v25  ;;  %v3223_v6 = vrot.slane %v7702_v34, %v9562_v47 }
 0x459   :  { %9590 = vst [vmem:[#allocation27_spill] sm:$0xff] %v7693_v59  ;;  %9591 = vst [vmem:[#allocation36_spill] sm:$0xff] %v7695_v5  ;;  %v7700_v17 = vsel %vm770_vm5, %v7695_v5, %v3357_v45  ;;  %v4487_v25 = vrot.slane %v7704_v37, %v9566_v58  ;;  %v3307_v42 = vrot.slane %v7706_v23, %v9562_v47 }
 0x45a   :  { %9592 = vst [vmem:[#allocation33_spill] sm:$0xff] %v7700_v17  ;;  %v3424_v48 = vmul.f32 %v3387_v35, %v7700_v17  ;;  %3700 = vrot.lane.b32.xlu0 %v7344_v55, %s5425_s7  ;;  %5067 = vmatprep.subr.bf16.mxu1 %v4920_v18  ;;  %9595 = vst [vmem:[#allocation35_spill] sm:$0xff] %v7711_v52  ;;  %v2674_v28 = vadd.f32 %v7293_v53, %v2661_v22  ;;  %v3128_v17 = vld [vmem:[#allocation6 + $0x5] ss:$8 sm:$0xf] }
 0x45b   :  { %4040 = vrot.lane.b32.xlu1 %v7309_v14, %s5438_s30  ;;  %5068 = vmatpush1.bf16.msra.mxu1 %v4919_v57  ;;  %9596 = vst [vmem:[#allocation51_spill] sm:$0xff] %v7727_v51  ;;  %v4547_v53 = vrot.slane %v7711_v52, %v9566_v58  ;;  %v7745_v57 = vcombine.high %v7727_v51, %v7727_v51 }
 0x45c   :  { %v4909_v45 = vpack.c.bf16 %v3508_v49, %v3424_v48  ;;  %v7717_v63 = vpop.permute.xlu0 %3022  ;;  %v7719_v0 = vpop.permute.xlu1 %3188  ;;  %v7749_v35 = vmax.f32 %v2674_v28, 0.0  ;;  %v3395_v49 = vrot.slane %v7619_v16, %v9573_v10  ;;  %v3399_v48 = vrot.slane %v7619_v16, %v9574_v4  ;;  %v3129_v16 = vld [vmem:[#allocation6 + $0x5] ss:$8 sm:$0xf0] }
 0x45d   :  { %v3210_v14 = vsel %vm598_vm8, %v7719_v0, %v7629_v54  ;;  %9597 = vst [vmem:[#allocation49_spill] sm:$0xff] %v7745_v57  ;;  %5302 = vmatprep.mubr.msk.bf16.mxu0 %vm9598_vm13, %v7745_v57  ;;  %5304 = vmatprep.mubr.msk.bf16.mxu1 %vm9599_vm15, %v7745_v57  ;;  %v3479_v22 = vrot.slane %v7623_v39, %v9573_v10  ;;  %v2961_v57 = vld [vmem:[#allocation6 + $0x3] ss:$8 sm:$0xf0]  ;;  %vm9621_vm13 = vcmp.lt.s32.totalorder %v5619_v12, 65 }
 0x45e   :  { %3798 = vrot.lane.b32.xlu0 %v7323_v15, %s5424_s17  ;;  %5029 = vmatpush1.bf16.msra.mxu0 %v4909_v45  ;;  %v7758_v44 = vmul.f32 %v4487_v25, %v3210_v14  ;;  %v3483_v45 = vrot.slane %v7623_v39, %v9574_v4  ;;  %v3044_v25 = vld [vmem:[#allocation6 + $0x4] ss:$8 sm:$0xf]  ;;  %v4515_v5 = vrot.slane %v7704_v37, %v9548_v19  ;;  %vm9628_vm15 = vmmov %vm9621_vm13 }
 0x45f   :  { %4036 = vrot.lane.b32.xlu1 %v7301_v36, %s5438_s30  ;;  %v3257_v36 = vmul.f32 %v3223_v6, %v3210_v14  ;;  %v4575_v14 = vrot.slane %v7711_v52, %v9548_v19 }
 0x460   :  { %v7747_v40 = vpop.permute.xlu0 %3106  ;;  %v3273_v41 = vpop.permute.xlu1 %3272  ;;  %9600 = vst [vmem:[#allocation43_spill] sm:$0xff] %v7758_v44 }
 0x461   :  { %v3294_v33 = vsel %vm684_vm9, %v3273_v41, %v7644_v27 }
 0x462   :  { %v3341_v13 = vmul.f32 %v3307_v42, %v3294_v33  ;;  %v7760_v24 = vmul.f32 %v4547_v53, %v3294_v33  ;;  %3532 = vrot.lane.b32.xlu0 %v7344_v55, %s5426_s18  ;;  %v3045_v42 = vld [vmem:[#allocation6 + $0x4] ss:$8 sm:$0xf0]  ;;  %v3303_v53 = vrot.slane %v7706_v23, %v9566_v58 }
 0x463   :  { %3796 = vrot.lane.b32.xlu1 %v7749_v35, %s5424_s17  ;;  %v7821_v7 = vor.u32 %v3045_v42, %v3044_v25 }
 0x464   :  { %9601 = vst [vmem:[#allocation64_spill] sm:$0xff] %v7760_v24  ;;  %v7768_v1 = vpop.permute.xlu0 %3194  ;;  %v3361_v21 = vpop.permute.xlu1 %3360  ;;  %v4902_v18 = vpack.c.bf16 %v3341_v13, %v3257_v36  ;;  %v3219_v13 = vrot.slane %v7702_v34, %v9566_v58 }
 0x465   :  { %v7783_v28 = vsel %vm770_vm5, %v3361_v21, %v7654_v61  ;;  %v7788_v6 = vsel %vm770_vm5, %v7546_v3, %v3361_v21  ;;  %v4360_v3 = vld [vmem:[#allocation6 + $0x86] ss:$8 sm:$0xf] }
 0x466   :  { %3616 = vrot.lane.b32.xlu0 %v7344_v55, %s5427_s19  ;;  %5030 = vmatprep.subr.bf16.mxu0 %v4902_v18  ;;  %v4361_v21 = vld [vmem:[#allocation6 + $0x86] ss:$8 sm:$0xf0]  ;;  %v3295_v18 = vsel %vm684_vm9, %v7693_v59, %v3273_v41  ;;  %v3426_v39 = vmul.f32 %v3395_v49, %v7788_v6  ;;  %v3427_v60 = vmul.f32 %v3399_v48, %v7783_v28  ;;  %v4420_v41 = vld [vmem:[#allocation6 + $0x87] ss:$8 sm:$0xf] }
 0x467   :  { %3880 = vrot.lane.b32.xlu1 %v7749_v35, %s5423_s0  ;;  %v4421_v59 = vld [vmem:[#allocation6 + $0x87] ss:$8 sm:$0xf0]  ;;  %v7823_v49 = vor.u32 %v4361_v21, %v4360_v3  ;;  %v7829_v48 = vor.u32 %v3129_v16, %v3128_v17  ;;  %v3055_v17 = vrot.slane %v7821_v7, %v9562_v47 }
 0x468   :  { %v7796_v33 = vpop.permute.xlu0 %3278  ;;  %v3445_v36 = vpop.permute.xlu1 %3444 }
 0x469   :  { %9602 = vst [vmem:[#allocation48_spill] sm:$0xff] %v7796_v33  ;;  %v3460_v31 = vsel %vm9603_vm7, %v3445_v36, %v7674_v2  ;;  %v3461_v62 = vsel %vm9589_vm2, %v7562_v46, %v3445_v36  ;;  %9606 = vst [vmem:[#allocation61_spill] sm:$0xff] %v7829_v48  ;;  %vm9635_vm7 = vcmp.lt.s32.totalorder %v5619_v12, 73  ;;  %vm9637_vm2 = vcmp.lt.s32.totalorder %v5619_v12, 72 }
 0x46a   :  { %v3510_v56 = vmul.f32 %v3479_v22, %v3461_v62  ;;  %v3511_v32 = vmul.f32 %v3483_v45, %v3460_v31  ;;  %3704 = vrot.lane.b32.xlu0 %v7749_v35, %s5425_s7  ;;  %v3340_v62 = vmul.f32 %v3303_v53, %v3295_v18  ;;  %v7831_v22 = vor.u32 %v4421_v59, %v4420_v41 }
 0x46b   :  { %3960 = vrot.lane.b32.xlu1 %v7344_v55, %s5437_s29  ;;  %v3051_v59 = vrot.slane %v7821_v7, %v9566_v58  ;;  %v4395_v41 = vrot.slane %v7823_v49, %v9548_v19 }
 0x46c   :  { %v4911_v46 = vpack.c.bf16 %v3510_v56, %v3426_v39  ;;  %v7817_v36 = vpop.permute.xlu0 %3118  ;;  %v7819_v2 = vpop.permute.xlu1 %3202  ;;  %v4912_v50 = vpack.c.bf16 %v3511_v32, %v3427_v60  ;;  %9607 = vst [vmem:[#allocation58_spill] sm:$0xff] %v7831_v22  ;;  %v7833_v56 = vmul.f32 %v4575_v14, %v3295_v18 }
 0x46d   :  { %9604 = vst [vmem:[#allocation59_spill] sm:$0xff] %v7817_v36  ;;  %9605 = vst [vmem:[#allocation55_spill] sm:$0xff] %v7819_v2  ;;  %v3211_v31 = vsel %vm598_vm8, %v7819_v2, %v7719_v0  ;;  %v4427_v0 = vrot.slane %v7831_v22, %v9566_v58 }
 0x46e   :  { %9608 = vst [vmem:[#allocation73_spill] sm:$0xff] %v7833_v56  ;;  %v3256_v39 = vmul.f32 %v3219_v13, %v3211_v31  ;;  %v7835_v45 = vmul.f32 %v4515_v5, %v3211_v31  ;;  %3448 = vrot.lane.b32.xlu0 %v7344_v55, %s5429_s21  ;;  %5069 = vmatprep.subr.bf16.mxu1 %v4912_v50  ;;  %v2877_v56 = vld [vmem:[#allocation6 + $0x2] ss:$8 sm:$0xf0] }
 0x46f   :  { %4044 = vrot.lane.b32.xlu1 %v7344_v55, %s5438_s30  ;;  %5070 = vmatpush1.bf16.msra.mxu1 %v4911_v46  ;;  %v4367_v5 = vrot.slane %v7823_v49, %v9566_v58  ;;  %v3139_v50 = vrot.slane %v7829_v48, %v9562_v47 }
 0x470   :  { %9609 = vst [vmem:[#allocation57_spill] sm:$0xff] %v7835_v45  ;;  %v4901_v32 = vpack.c.bf16 %v3340_v62, %v3256_v39  ;;  %v7841_v60 = vpop.permute.xlu0 %2854  ;;  %v3021_v16 = vpop.permute.xlu1 %3020  ;;  %v3227_v39 = vrot.slane %v7702_v34, %v9573_v10  ;;  %v2876_v45 = vld [vmem:[#allocation6 + $0x2] ss:$8 sm:$0xf] }
 0x471   :  { %v3042_v25 = vsel %vm426_vm10, %v3021_v16, %v7717_v63 }
 0x472   :  { %3536 = vrot.lane.b32.xlu0 %v7749_v35, %s5426_s18  ;;  %5031 = vmatpush1.bf16.msra.mxu0 %v4901_v32  ;;  %v3089_v13 = vmul.f32 %v3055_v17, %v3042_v25  ;;  %v7865_v3 = vmul.f32 %v4367_v5, %v3042_v25  ;;  %v3231_v32 = vrot.slane %v7702_v34, %v9574_v4 }
 0x473   :  { %3702 = vrot.lane.b32.xlu1 %v7627_v9, %s5425_s7  ;;  %v3311_v17 = vrot.slane %v7706_v23, %v9573_v10  ;;  %v3315_v5 = vrot.slane %v7706_v23, %v9574_v4  ;;  %v3135_v25 = vrot.slane %v7829_v48, %v9566_v58 }
 0x474   :  { %v7860_v42 = vpop.permute.xlu0 %2938  ;;  %v3105_v53 = vpop.permute.xlu1 %3104  ;;  %9610 = vst [vmem:[#allocation70_spill] sm:$0xff] %v7865_v3 }
 0x475   :  { %v3126_v14 = vsel %vm512_vm11, %v3105_v53, %v7747_v40 }
 0x476   :  { %v3173_v21 = vmul.f32 %v3139_v50, %v3126_v14  ;;  %v7867_v18 = vmul.f32 %v4427_v0, %v3126_v14  ;;  %3198 = vrot.lane.b32.xlu0 %v7627_v9, %s5430_s22  ;;  %v4455_v14 = vrot.slane %v7831_v22, %v9548_v19 }
 0x477   :  { %3882 = vrot.lane.b32.xlu1 %v7323_v15, %s5423_s0 }
 0x478   :  { %9611 = vst [vmem:[#allocation66_spill] sm:$0xff] %v7867_v18  ;;  %v7875_v46 = vpop.permute.xlu0 %3026  ;;  %v3193_v62 = vpop.permute.xlu1 %3192  ;;  %v4894_v31 = vpack.c.bf16 %v3173_v21, %v3089_v13 }
 0x479   :  { %9612 = vst [vmem:[#allocation50_spill] sm:$0xff] %v7875_v46  ;;  %v7890_v50 = vsel %vm598_vm8, %v3193_v62, %v7768_v1  ;;  %v7895_v0 = vsel %vm598_vm8, %v7629_v54, %v3193_v62  ;;  %v3127_v54 = vsel %vm512_vm11, %v7817_v36, %v3105_v53 }
 0x47a   :  { %3368 = vrot.lane.b32.xlu0 %v7749_v35, %s5428_s20  ;;  %5032 = vmatprep.subr.bf16.mxu0 %v4894_v31  ;;  %v3258_v2 = vmul.f32 %v3227_v39, %v7895_v0  ;;  %v3259_v55 = vmul.f32 %v3231_v32, %v7890_v50  ;;  %v3172_v26 = vmul.f32 %v3135_v25, %v3127_v54 }
 0x47b   :  { %3534 = vrot.lane.b32.xlu1 %v7627_v9, %s5426_s18  ;;  %v7941_v20 = vmul.f32 %v4455_v14, %v3127_v54  ;;  %v4240_v54 = vld [vmem:[#allocation6 + $0x84] ss:$8 sm:$0xf] }
 0x47c   :  { %v7903_v13 = vpop.permute.xlu0 %3110  ;;  %v3277_v21 = vpop.permute.xlu1 %3276 }
 0x47d   :  { %9613 = vst [vmem:[#allocation68_spill] sm:$0xff] %v7903_v13  ;;  %v7913_v62 = vsel %vm684_vm9, %v3277_v21, %v7796_v33  ;;  %v7918_v31 = vsel %vm684_vm9, %v7644_v27, %v3277_v21  ;;  %9618 = vst [vmem:[#allocation71_spill] sm:$0xff] %v7941_v20 }
 0x47e   :  { %9614 = vst [vmem:[#allocation45_spill] sm:$0xff] %v7913_v62  ;;  %v3342_v53 = vmul.f32 %v3311_v17, %v7918_v31  ;;  %v3343_v36 = vmul.f32 %v3315_v5, %v7913_v62  ;;  %3030 = vrot.lane.b32.xlu0 %v7627_v9, %s5422_s14  ;;  %v7937_v17 = vor.u32 %v2877_v56, %v2876_v45 }
 0x47f   :  { %3618 = vrot.lane.b32.xlu1 %v7627_v9, %s5427_s19  ;;  %v7939_v5 = vor.u32 %v2961_v57, %v2960_v38  ;;  %v3059_v38 = vrot.slane %v7821_v7, %v9573_v10 }
 0x480   :  { %v4903_v27 = vpack.c.bf16 %v3342_v53, %v3258_v2  ;;  %v7930_v21 = vpop.permute.xlu0 %2950  ;;  %v7932_v29 = vpop.permute.xlu1 %3034  ;;  %v4904_v39 = vpack.c.bf16 %v3343_v36, %v3259_v55  ;;  %v2887_v57 = vrot.slane %v7937_v17, %v9562_v47  ;;  %v4241_v53 = vld [vmem:[#allocation6 + $0x84] ss:$8 sm:$0xf0] }
 0x481   :  { %9615 = vst [vmem:[#allocation44_spill] sm:$0xff] %v7930_v21  ;;  %9616 = vst [vmem:[#allocation65_spill] sm:$0xff] %v7932_v29  ;;  %v3043_v32 = vsel %vm426_vm10, %v7932_v29, %v3021_v16  ;;  %v2971_v56 = vrot.slane %v7939_v5, %v9562_v47  ;;  %v4300_v16 = vld [vmem:[#allocation6 + $0x85] ss:$8 sm:$0xf]  ;;  %v2883_v29 = vrot.slane %v7937_v17, %v9566_v58 }
 0x482   :  { %9617 = vst [vmem:[#allocation56_spill] sm:$0xff] %v7939_v5  ;;  %v3088_v43 = vmul.f32 %v3051_v59, %v3043_v32  ;;  %v7943_v51 = vmul.f32 %v4395_v41, %v3043_v32  ;;  %3200 = vrot.lane.b32.xlu0 %v7749_v35, %s5430_s22  ;;  %5071 = vmatprep.subr.bf16.mxu1 %v4904_v39  ;;  %v4301_v59 = vld [vmem:[#allocation6 + $0x85] ss:$8 sm:$0xf0] }
 0x483   :  { %3366 = vrot.lane.b32.xlu1 %v7627_v9, %s5428_s20  ;;  %5072 = vmatpush1.bf16.msra.mxu1 %v4903_v27  ;;  %v7979_v27 = vor.u32 %v4301_v59, %v4300_v16  ;;  %v3147_v16 = vrot.slane %v7829_v48, %v9574_v4  ;;  %v7993_v59 = vor.u32 %v4241_v53, %v4240_v54 }
 0x484   :  { %9619 = vst [vmem:[#allocation53_spill] sm:$0xff] %v7943_v51  ;;  %v4893_v55 = vpack.c.bf16 %v3172_v26, %v3088_v43  ;;  %v7949_v2 = vpop.permute.xlu0 %2686  ;;  %v2853_v36 = vpop.permute.xlu1 %2852  ;;  %v2967_v51 = vrot.slane %v7939_v5, %v9566_v58 }
 0x485   :  { %v7962_v26 = vsel %vm254_vm12, %v2853_v36, %v7841_v60  ;;  %9623 = vst [vmem:[#allocation54_spill] sm:$0xff] %v7979_v27  ;;  %9625 = vst [vmem:[#allocation63_spill] sm:$0xff] %v7993_v59  ;;  %v4335_v54 = vrot.slane %v7979_v27, %v9548_v19  ;;  %v4275_v11 = vrot.slane %v7993_v59, %v9548_v19 }
 0x486   :  { %2862 = vrot.lane.b32.xlu0 %v7627_v9, %s5433_s25  ;;  %5033 = vmatpush1.bf16.msra.mxu0 %v4893_v55  ;;  %9620 = vst [vmem:[#allocation52_spill] sm:$0xff] %v7962_v26  ;;  %v2921_v25 = vmul.f32 %v2887_v57, %v7962_v26  ;;  %v3063_v57 = vrot.slane %v7821_v7, %v9574_v4 }
 0x487   :  { %3450 = vrot.lane.b32.xlu1 %v7627_v9, %s5429_s21 }
 0x488   :  { %v7966_v43 = vpop.permute.xlu0 %2770  ;;  %v2937_v45 = vpop.permute.xlu1 %2936 }
 0x489   :  { %v7971_v41 = vsel %vm9621_vm13, %v2937_v45, %v7860_v42 }
 0x48a   :  { %9622 = vst [vmem:[#allocation39_spill] sm:$0xff] %v7971_v41  ;;  %v3005_v14 = vmul.f32 %v2971_v56, %v7971_v41  ;;  %3032 = vrot.lane.b32.xlu0 %v7749_v35, %s5422_s14  ;;  %v3143_v56 = vrot.slane %v7829_v48, %v9573_v10  ;;  %v2792_v41 = vld [vmem:[#allocation6 + $0x1] ss:$8 sm:$0xf] }
 0x48b   :  { %3620 = vrot.lane.b32.xlu1 %v7749_v35, %s5427_s19 }
 0x48c   :  { %v7981_v39 = vpop.permute.xlu0 %2858  ;;  %v3025_v32 = vpop.permute.xlu1 %3024  ;;  %v4886_v55 = vpack.c.bf16 %v3005_v14, %v2921_v25 }
 0x48d   :  { %9624 = vst [vmem:[#allocation47_spill] sm:$0xff] %v7981_v39  ;;  %v7998_v25 = vsel %vm426_vm10, %v3025_v32, %v7875_v46  ;;  %v8003_v14 = vsel %vm426_vm10, %v7717_v63, %v3025_v32  ;;  %v2959_v63 = vsel %vm9628_vm15, %v7930_v21, %v2937_v45  ;;  %v2708_v21 = vld [vmem:[#allocation6] ss:$8 sm:$0xf]  ;;  %vm9644_vm15 = vmmov %vm9621_vm13 }
 0x48e   :  { %2694 = vrot.lane.b32.xlu0 %v7627_v9, %s5435_s27  ;;  %9626 = vst [vmem:[#allocation62_spill] sm:$0xff] %v7998_v25  ;;  %5034 = vmatprep.subr.bf16.mxu0 %v4886_v55  ;;  %v3090_v3 = vmul.f32 %v3059_v38, %v8003_v14  ;;  %v3091_v18 = vmul.f32 %v3063_v57, %v7998_v25  ;;  %v2793_v57 = vld [vmem:[#allocation6 + $0x1] ss:$8 sm:$0xf0] }
 0x48f   :  { %3282 = vrot.lane.b32.xlu1 %v7627_v9, %s5431_s23  ;;  %v3004_v25 = vmul.f32 %v2967_v51, %v2959_v63  ;;  %v8055_v51 = vor.u32 %v2793_v57, %v2792_v41  ;;  %v4181_v57 = vld [vmem:[#allocation6 + $0x83] ss:$8 sm:$0xf0] }
 0x490   :  { %v8011_v53 = vpop.permute.xlu0 %2942  ;;  %v3109_v20 = vpop.permute.xlu1 %3108 }
 0x491   :  { %9627 = vst [vmem:[#allocation74_spill] sm:$0xff] %v8011_v53  ;;  %v8021_v32 = vsel %vm512_vm11, %v3109_v20, %v7903_v13  ;;  %v8026_v55 = vsel %vm512_vm11, %v7747_v40, %v3109_v20  ;;  %v2709_v20 = vld [vmem:[#allocation6] ss:$8 sm:$0xf0]  ;;  %9634 = vst [vmem:[#allocation20_spill] sm:$0xff] %v8055_v51  ;;  %v2803_v41 = vrot.slane %v8055_v51, %v9562_v47 }
 0x492   :  { %9629 = vst [vmem:[#allocation75_spill] sm:$0xff] %v8021_v32  ;;  %v3174_v33 = vmul.f32 %v3143_v56, %v8026_v55  ;;  %v3175_v45 = vmul.f32 %v3147_v16, %v8021_v32  ;;  %2864 = vrot.lane.b32.xlu0 %v7749_v35, %s5433_s25  ;;  %v8045_v16 = vmul.f32 %v4335_v54, %v2959_v63 }
 0x493   :  { %3452 = vrot.lane.b32.xlu1 %v7749_v35, %s5429_s21 }
 0x494   :  { %v4895_v40 = vpack.c.bf16 %v3174_v33, %v3090_v3  ;;  %v8038_v13 = vpop.permute.xlu0 %2782  ;;  %v8040_v46 = vpop.permute.xlu1 %2866  ;;  %v4896_v38 = vpack.c.bf16 %v3175_v45, %v3091_v18  ;;  %9632 = vst [vmem:[#allocation16_spill] sm:$0xff] %v8045_v16  ;;  %v8053_v33 = vor.u32 %v2709_v20, %v2708_v21  ;;  %v4600_v3 = vld [vmem:[#allocation6 + $0xc2] ss:$8 sm:$0xf] }
 0x495   :  { %9630 = vst [vmem:[#allocation67_spill] sm:$0xff] %v8038_v13  ;;  %9631 = vst [vmem:[#allocation13_spill] sm:$0xff] %v8040_v46  ;;  %v2875_v56 = vsel %vm254_vm12, %v8040_v46, %v2853_v36  ;;  %v4601_v18 = vld [vmem:[#allocation6 + $0xc2] ss:$8 sm:$0xf0] }
 0x496   :  { %v2920_v32 = vmul.f32 %v2883_v29, %v2875_v56  ;;  %v8047_v26 = vmul.f32 %v4275_v11, %v2875_v56  ;;  %2696 = vrot.lane.b32.xlu0 %v7749_v35, %s5435_s27  ;;  %5073 = vmatprep.subr.bf16.mxu1 %v4896_v38  ;;  %v8065_v63 = vor.u32 %v4601_v18, %v4600_v3  ;;  %v4120_v45 = vld [vmem:[#allocation6 + $0x82] ss:$8 sm:$0xf]  ;;  %v4180_v38 = vld [vmem:[#allocation6 + $0x83] ss:$8 sm:$0xf] }
 0x497   :  { %3114 = vrot.lane.b32.xlu1 %v7627_v9, %s5432_s24  ;;  %5074 = vmatpush1.bf16.msra.mxu1 %v4895_v40  ;;  %v2719_v21 = vrot.slane %v8053_v33, %v9562_v47  ;;  %v4121_v20 = vld [vmem:[#allocation6 + $0x82] ss:$8 sm:$0xf0] }
 0x498   :  { %9633 = vst [vmem:[#allocation21_spill] sm:$0xff] %v8047_v26  ;;  %v4885_v36 = vpack.c.bf16 %v3004_v25, %v2920_v32  ;;  %v8057_v54 = vpop.permute.xlu0 %2690  ;;  %v4607_v3 = vrot.slane %v8065_v63, %v9566_v58  ;;  %v4611_v11 = vrot.slane %v8065_v63, %v9562_v47 }
 0x499   :  { %v8061_v29 = vpop.permute.xlu1 %2684 }
 0x49a   :  { %3962 = vrot.lane.b32.xlu0 %v7627_v9, %s5437_s29  ;;  %5035 = vmatpush1.bf16.msra.mxu0 %v4885_v36  ;;  %v8077_v25 = vsel %vm9635_vm7, %v8061_v29, %v7949_v2  ;;  %vm9645_vm7 = vmmov %vm9637_vm2 }
 0x49b   :  { %3284 = vrot.lane.b32.xlu1 %v7749_v35, %s5431_s23  ;;  %9636 = vst [vmem:[#allocation76_spill] sm:$0xff] %v8077_v25  ;;  %v2753_v18 = vmul.f32 %v2719_v21, %v8077_v25  ;;  %v8108_v25 = vor.u32 %v4181_v57, %v4180_v38  ;;  %v2975_v38 = vrot.slane %v7939_v5, %v9573_v10 }
 0x49c   :  { %v8079_v32 = vpop.permute.xlu0 %2774  ;;  %v2979_v57 = vrot.slane %v7939_v5, %v9574_v4 }
 0x49d   :  { %v2769_v40 = vpop.permute.xlu1 %2768  ;;  %9641 = vst [vmem:[#allocation80_spill] sm:$0xff] %v8108_v25 }
 0x49e   :  { %v8084_v56 = vsel %vm9637_vm2, %v2769_v40, %v7966_v43  ;;  %4046 = vrot.lane.b32.xlu0 %v7627_v9, %s5438_s30  ;;  %vm9647_vm2 = vcmp.lt.s32.totalorder %v5619_v12, 73 }
 0x49f   :  { %9638 = vst [vmem:[#allocation77_spill] sm:$0xff] %v8084_v56  ;;  %v2837_v36 = vmul.f32 %v2803_v41, %v8084_v56  ;;  %2946 = vrot.lane.b32.xlu1 %v7627_v9, %s5434_s26  ;;  %v8106_v41 = vor.u32 %v4121_v20, %v4120_v45  ;;  %v2891_v45 = vrot.slane %v7937_v17, %v9573_v10 }
 0x4a0   :  { %v8102_v44 = vpop.permute.xlu0 %3196  ;;  %v2895_v20 = vrot.slane %v7937_v17, %v9574_v4 }
 0x4a1   :  { %9639 = vst [vmem:[#allocation78_spill] sm:$0xff] %v8102_v44  ;;  %9640 = vst [vmem:[#allocation79_spill] sm:$0xff] %v8106_v41  ;;  %v2857_v56 = vpop.permute.xlu1 %2856  ;;  %v4878_v24 = vpack.c.bf16 %v2837_v36, %v2753_v18  ;;  %v2799_v36 = vrot.slane %v8055_v51, %v9566_v58  ;;  %v2715_v18 = vrot.slane %v8053_v33, %v9566_v58 }
 0x4a2   :  { %3966 = vrot.lane.b32.xlu0 %v7323_v15, %s5437_s29  ;;  %v8137_v46 = vsel %vm254_vm12, %v2857_v56, %v7981_v39  ;;  %v8142_v16 = vsel %vm254_vm12, %v7841_v60, %v2857_v56  ;;  %v4215_v60 = vrot.slane %v8108_v25, %v9548_v19 }
 0x4a3   :  { %3116 = vrot.lane.b32.xlu1 %v7749_v35, %s5432_s24  ;;  %9642 = vst [vmem:[#allocation81_spill] sm:$0xff] %v8137_v46  ;;  %5036 = vmatprep.subr.bf16.mxu0 %v4878_v24  ;;  %v2922_v62 = vmul.f32 %v2891_v45, %v8142_v16  ;;  %v2923_v21 = vmul.f32 %v2895_v20, %v8137_v46 }
 0x4a4   :  { %v8144_v26 = vpop.permute.xlu0 %3028  ;;  %v4155_v20 = vrot.slane %v8106_v41, %v9548_v19 }
 0x4a5   :  { %9643 = vst [vmem:[#allocation82_spill] sm:$0xff] %v8144_v26  ;;  %v2941_v39 = vpop.permute.xlu1 %2940 }
 0x4a6   :  { %v8159_v24 = vsel %vm9621_vm13, %v2941_v39, %v8011_v53  ;;  %v8164_v56 = vsel %vm9644_vm15, %v7860_v42, %v2941_v39  ;;  %v2791_v53 = vsel %vm9645_vm7, %v8038_v13, %v2769_v40  ;;  %vm9653_vm13 = vmmov %vm9647_vm2  ;;  %vm9656_vm7 = vcmask 1043456  }
 0x4a7   :  { %v3006_v5 = vmul.f32 %v2975_v38, %v8164_v56  ;;  %v3007_v15 = vmul.f32 %v2979_v57, %v8159_v24  ;;  %2778 = vrot.lane.b32.xlu1 %v7627_v9, %s5436_s28  ;;  %v4644_v38 = vmul.f32 %v4607_v3, %v7640_v30  ;;  %v4645_v3 = vmul.f32 %v4611_v11, %v7788_v6  ;;  %vm9654_vm15 = vmmov %vm9647_vm2 }
 0x4a8   :  { %v8181_v45 = vpop.permute.xlu0 %2860  ;;  %v8221_v42 = vmul.f32 %v4215_v60, %v2791_v53 }
 0x4a9   :  { %v4887_v9 = vpack.c.bf16 %v3006_v5, %v2922_v62  ;;  %v8188_v46 = vpop.permute.xlu1 %2698  ;;  %v4888_v40 = vpack.c.bf16 %v3007_v15, %v2923_v21  ;;  %v2836_v62 = vmul.f32 %v2799_v36, %v2791_v53  ;;  %v4311_v15 = vrot.slane %v7979_v27, %v9562_v47 }
 0x4aa   :  { %9646 = vst [vmem:[#allocation83_spill] sm:$0xff] %v8188_v46  ;;  %v2707_v30 = vsel %vm9647_vm2, %v8188_v46, %v8061_v29  ;;  %v4981_v6 = vpack.c.bf16 %v4644_v38, %v4644_v38  ;;  %v9650_v21 = vrot.slane %v7711_v52, %v9562_v47  ;;  %9651 = vst [vmem:[#allocation86_spill] sm:$0xff] %v8221_v42  ;;  %v9667_v46 = vld [vmem:[#allocation43_spill] sm:$0xff] }
 0x4ab   :  { %v2752_v5 = vmul.f32 %v2715_v18, %v2707_v30  ;;  %2948 = vrot.lane.b32.xlu1 %v7749_v35, %s5434_s26  ;;  %5075 = vmatprep.subr.bf16.mxu1 %v4888_v40  ;;  %v8209_v13 = vmul.f32 %v4155_v20, %v2707_v30  ;;  %v2723_v20 = vrot.slane %v8053_v33, %v9573_v10  ;;  %vm9657_vm2 = vmmov %vm9656_vm7 }
 0x4ac   :  { %5076 = vmatpush1.bf16.msra.mxu1 %v4887_v9  ;;  %v8211_v29 = vpop.permute.xlu0 %2692  ;;  %v4585_v39 = vmul.f32 %v9650_v21, %v7918_v31  ;;  %v4982_v38 = vpack.c.bf16 %v4645_v3, %v4645_v3  ;;  %v2727_v30 = vrot.slane %v8053_v33, %v9574_v4  ;;  %v2811_v31 = vrot.slane %v8055_v51, %v9574_v4 }
 0x4ad   :  { %9648 = vst [vmem:[#allocation84_spill] sm:$0xff] %v8209_v13  ;;  %9649 = vst [vmem:[#allocation85_spill] sm:$0xff] %v8211_v29  ;;  %v4877_v18 = vpack.c.bf16 %v2836_v62, %v2752_v5  ;;  %v2689_v40 = vpop.permute.xlu1 %2688  ;;  %v2807_v62 = vrot.slane %v8055_v51, %v9573_v10  ;;  %v9652_v53 = vrot.slane %v7704_v37, %v9562_v47 }
 0x4ae   :  { %v8242_v3 = vsel %vm9653_vm13, %v2689_v40, %v8057_v54  ;;  %v8247_v5 = vsel %vm9654_vm15, %v7949_v2, %v2689_v40  ;;  %v4999_v2 = vsel %vm9657_vm2, %v4981_v6, 0  ;;  %v9658_v40 = vrot.slane %v7831_v22, %v9562_v47 }
 0x4af   :  { %2780 = vrot.lane.b32.xlu1 %v7749_v35, %s5436_s28  ;;  %v4525_v60 = vmul.f32 %v9652_v53, %v7895_v0  ;;  %5037 = vmatpush1.bf16.msra.mxu0 %v4877_v18  ;;  %v9655_v0 = vrot.slane %v8065_v63, %v9573_v10  ;;  %v4619_v18 = vrot.slane %v8065_v63, %v9574_v4  ;;  %vm9659_vm13 = vcmp.lt.s32.totalorder %v5619_v12, 72 }
 0x4b0   :  { %v8249_v21 = vpop.permute.xlu0 %3954  ;;  %5301 = vmatprep.subr.msk.bf16.mxu0 %vm9656_vm7, %v4982_v38  ;;  %v4465_v9 = vmul.f32 %v9658_v40, %v8026_v55  ;;  %vm9660_vm15 = vmmov %vm9659_vm13  ;;  %v2754_v6 = vmul.f32 %v2723_v20, %v8247_v5  ;;  %v2755_v36 = vmul.f32 %v2727_v30, %v8242_v3  ;;  %v4191_v55 = vrot.slane %v8108_v25, %v9562_v47 }
 0x4b1   :  { %v4646_v53 = vmul.f32 %v9655_v0, %v7783_v28  ;;  %v2773_v11 = vpop.permute.xlu1 %2772  ;;  %v4974_v0 = vpack.c.bf16 %v4585_v39, %v4525_v60  ;;  %v4559_v39 = vrot.slane %v7711_v52, %v9574_v4  ;;  %v3151_v60 = vrot.slane %v7829_v48, %v6333_v8  ;;  %vm9679_vm7 = vmmov %vm9657_vm2 }
 0x4b2   :  { %v8270_v28 = vsel %vm9659_vm13, %v2773_v11, %v8079_v32  ;;  %v2789_v38 = vsel %vm9660_vm15, %v7966_v43, %v2773_v11  ;;  %v3319_v43 = vrot.slane %v7706_v23, %v6333_v8  ;;  %v9661_v11 = vrot.slane %v7823_v49, %v9562_v47 }
 0x4b3   :  { %v2838_v57 = vmul.f32 %v2807_v62, %v2789_v38  ;;  %v2839_v13 = vmul.f32 %v2811_v31, %v8270_v28  ;;  %3964 = vrot.lane.b32.xlu1 %v7749_v35, %s5437_s29  ;;  %5043 = vmatpush2.bf16.msra.mxu0 %v4999_v2  ;;  %v3207_v2 = vsel %vm598_vm8, %v7768_v1, %v8102_v44  ;;  %v9678_v44 = vld [vmem:[#allocation72_spill] sm:$0xff]  ;;  %vm9699_vm13 = vcmp.lt.s32.totalorder %v5619_v12, 65 }
 0x4b4   :  { %v8284_v42 = vpop.permute.xlu0 %4038  ;;  %v4405_v20 = vmul.f32 %v9661_v11, %v8003_v14  ;;  %5044 = vmatprep.subr.bf16.mxu0 %v4974_v0  ;;  %v4345_v40 = vmul.f32 %v4311_v15, %v8164_v56  ;;  %v9662_v1 = vrot.slane %v7704_v37, %v9573_v10  ;;  %v9663_v15 = vld [vmem:[#allocation45_spill] sm:$0xff]  ;;  %v9666_v11 = vld [vmem:[#allocation64_spill] sm:$0xff]  ;;  %vm9706_vm15 = vcmp.lt.s32.totalorder %v5619_v12, 73 }
 0x4b5   :  { %v4879_v30 = vpack.c.bf16 %v2838_v57, %v2754_v6  ;;  %v8294_v62 = vpop.permute.xlu1 %3364  ;;  %v4880_v31 = vpack.c.bf16 %v2839_v13, %v2755_v36  ;;  %v4439_v57 = vrot.slane %v7831_v22, %v9574_v4  ;;  %v4983_v13 = vpack.c.bf16 %v4646_v53, %v4646_v53 }
 0x4b6   :  { %v8307_v14 = vsel %vm770_vm5, %v7654_v61, %v8294_v62  ;;  %v4966_v0 = vpack.c.bf16 %v4465_v9, %v4405_v20  ;;  %v4526_v56 = vmul.f32 %v9662_v1, %v7890_v50  ;;  %v9664_v61 = vrot.slane %v7711_v52, %v9573_v10  ;;  %v9670_v20 = vld [vmem:[#allocation52_spill] sm:$0xff]  ;;  %v9672_v1 = vld [vmem:[#allocation39_spill] sm:$0xff] }
 0x4b7   :  { %v4647_v36 = vmul.f32 %v4619_v18, %v8307_v14  ;;  %4048 = vrot.lane.b32.xlu1 %v7749_v35, %s5438_s30  ;;  %5077 = vmatprep.subr.bf16.mxu1 %v4880_v31  ;;  %v9665_v53 = vrot.slane %v7993_v59, %v9562_v47  ;;  %v9668_v48 = vpack.c.bf16 %v9666_v11, %v9667_v46 }
 0x4b8   :  { %v4586_v6 = vmul.f32 %v9664_v61, %v9663_v15  ;;  %5078 = vmatpush1.bf16.msra.mxu1 %v4879_v30  ;;  %v8329_v9 = vpop.permute.xlu0 %3952  ;;  %v9671_v50 = vrot.slane %v7993_v59, %v9566_v58  ;;  %v9673_v15 = vrot.slane %v7979_v27, %v9566_v58  ;;  %v9675_v30 = vrot.slane %v7704_v37, %v9574_v4  ;;  %v9680_v37 = vld [vmem:[#allocation66_spill] sm:$0xff] }
 0x4b9   :  { %v4285_v18 = vmul.f32 %v9665_v53, %v8142_v16  ;;  %5045 = vmatpush2.bf16.msra.mxu0 %v9668_v48  ;;  %9669 = vst [vmem:[#allocation45_spill] sm:$0xff] %v8329_v9  ;;  %v9674_v16 = vrot.slane %v7702_v34, %v6333_v8  ;;  %v4984_v46 = vpack.c.bf16 %v4647_v36, %v4647_v36  ;;  %v8344_v48 = vpop.permute.xlu1 %3280 }
 0x4ba   :  { %v4284_v31 = vmul.f32 %v9671_v50, %v9670_v20  ;;  %v4344_v61 = vmul.f32 %v9673_v15, %v9672_v1  ;;  %5046 = vmatprep.subr.bf16.mxu0 %v4966_v0  ;;  %v4527_v11 = vmul.f32 %v9675_v30, %v3207_v2  ;;  %v9676_v20 = vld [vmem:[#allocation50_spill] sm:$0xff]  ;;  %v9677_v1 = vld [vmem:[#allocation48_spill] sm:$0xff]  ;;  %v4225_v52 = vmul.f32 %v4191_v55, %v2789_v38 }
 0x4bb   :  { %v8342_v53 = vmul.f32 %v9674_v16, %v3207_v2  ;;  %v3039_v50 = vsel %vm426_vm10, %v9676_v20, %v8144_v26  ;;  %v3291_v15 = vsel %vm684_vm9, %v9677_v1, %v8344_v48  ;;  %v4958_v16 = vpack.c.bf16 %v4345_v40, %v4285_v18  ;;  %4050 = vrot.lane.b32.xlu1 %v9678_v44, %s5438_s30  ;;  %v9681_v20 = vld [vmem:[#allocation70_spill] sm:$0xff]  ;;  %v9683_v38 = vld [vmem:[#allocation56_spill] sm:$0xff]  ;;  %v9687_v1 = vld [vmem:[#allocation77_spill] sm:$0xff] }
 0x4bc   :  { %v8357_v36 = vmul.f32 %v3319_v43, %v3291_v15  ;;  %v4587_v0 = vmul.f32 %v4559_v39, %v3291_v15  ;;  %5303 = vmatprep.subr.msk.bf16.mxu1 %vm9679_vm7, %v4984_v46  ;;  %v5005_v2 = vsel %vm9657_vm2, %v4983_v13, 0  ;;  %v4975_v30 = vpack.c.bf16 %v4586_v6, %v4526_v56  ;;  %v8366_v23 = vpop.permute.xlu0 %3794  ;;  %v9685_v6 = vld [vmem:[#allocation75_spill] sm:$0xff] }
 0x4bd   :  { %v9682_v26 = vpack.c.bf16 %v9680_v37, %v9681_v20  ;;  %5084 = vmatpush2.bf16.msra.mxu1 %v5005_v2  ;;  %v2983_v55 = vrot.slane %v9683_v38, %v6333_v8  ;;  %v4319_v40 = vrot.slane %v7979_v27, %v9574_v4  ;;  %v4957_v43 = vpack.c.bf16 %v4344_v61, %v4284_v31  ;;  %v8378_v37 = vpop.permute.xlu1 %3112 }
 0x4be   :  { %v9684_v39 = vrot.slane %v8106_v41, %v9562_v47  ;;  %v9686_v18 = vrot.slane %v7831_v22, %v9573_v10  ;;  %v9688_v31 = vrot.slane %v8108_v25, %v9566_v58  ;;  %v9695_v56 = vrot.slane %v8106_v41, %v9566_v58 }
 0x4bf   :  { %5047 = vmatpush2.bf16.msra.mxu0 %v9682_v26  ;;  %v4976_v26 = vpack.c.bf16 %v4587_v0, %v4527_v11  ;;  %v9691_v0 = vrot.slane %v7823_v49, %v9574_v4  ;;  %vm9709_vm7 = vcmp.lt.s32.totalorder %v5619_v12, 72  ;;  %vm9723_vm2 = vcmask 719872  }
 0x4c0   :  { %v4165_v13 = vmul.f32 %v9684_v39, %v8247_v5  ;;  %5048 = vmatprep.subr.bf16.mxu0 %v4958_v16  ;;  %v4466_v46 = vmul.f32 %v9686_v18, %v9685_v6  ;;  %v4224_v61 = vmul.f32 %v9688_v31, %v9687_v1  ;;  %v9689_v5 = vrot.slane %v7821_v7, %v6333_v8  ;;  %v9690_v16 = vld [vmem:[#allocation68_spill] sm:$0xff]  ;;  %v9692_v18 = vld [vmem:[#allocation62_spill] sm:$0xff] }
 0x4c1   :  { %v3123_v11 = vsel %vm512_vm11, %v9690_v16, %v8378_v37  ;;  %v4407_v2 = vmul.f32 %v9691_v0, %v3039_v50  ;;  %5085 = vmatprep.subr.bf16.mxu1 %v4976_v26  ;;  %v9693_v1 = vrot.slane %v7823_v49, %v9573_v10  ;;  %v9696_v16 = vld [vmem:[#allocation47_spill] sm:$0xff]  ;;  %v2815_v26 = vrot.slane %v8055_v51, %v6333_v8 }
 0x4c2   :  { %v8391_v15 = vmul.f32 %v9689_v5, %v3039_v50  ;;  %v8400_v20 = vmul.f32 %v3151_v60, %v3123_v11  ;;  %v4467_v39 = vmul.f32 %v4439_v57, %v3123_v11  ;;  %v4950_v6 = vpack.c.bf16 %v4225_v52, %v4165_v13  ;;  %v9694_v5 = vld [vmem:[#allocation76_spill] sm:$0xff]  ;;  %5086 = vmatpush2.bf16.msra.mxu1 %v4975_v30  ;;  %v8414_v60 = vpop.permute.xlu0 %3878  ;;  %v8418_v57 = vpop.permute.xlu1 %2944 }
 0x4c3   :  { %v4406_v31 = vmul.f32 %v9693_v1, %v9692_v18  ;;  %v4164_v22 = vmul.f32 %v9695_v56, %v9694_v5  ;;  %v2871_v50 = vsel %vm254_vm12, %v9696_v16, %v8181_v45  ;;  %5049 = vmatpush2.bf16.msra.mxu0 %v4957_v43  ;;  %v4199_v56 = vrot.slane %v8108_v25, %v9574_v4  ;;  %v9698_v18 = vld [vmem:[#allocation74_spill] sm:$0xff]  ;;  %v9704_v5 = vld [vmem:[#allocation81_spill] sm:$0xff] }
 0x4c4   :  { %5050 = vmatprep.subr.bf16.mxu0 %v4950_v6  ;;  %v4968_v13 = vpack.c.bf16 %v4467_v39, %v4407_v2  ;;  %v9697_v30 = vrot.slane %v7979_v27, %v9573_v10  ;;  %v2955_v6 = vsel %vm9699_vm13, %v9698_v18, %v8418_v57  ;;  %v9700_v2 = vrot.slane %v7937_v17, %v6333_v8 }
 0x4c5   :  { %v4967_v11 = vpack.c.bf16 %v4466_v46, %v4406_v31  ;;  %v4949_v0 = vpack.c.bf16 %v4224_v61, %v4164_v22  ;;  %v9702_v1 = vrot.slane %v7993_v59, %v9574_v4  ;;  %v8440_v22 = vmul.f32 %v2983_v55, %v2955_v6  ;;  %v4060_v31 = vld [vmem:[#allocation6 + $0x81] ss:$8 sm:$0xf] }
 0x4c6   :  { %v4346_v43 = vmul.f32 %v9697_v30, %v8159_v24  ;;  %v8435_v39 = vmul.f32 %v9700_v2, %v2871_v50  ;;  %v4347_v61 = vmul.f32 %v4319_v40, %v2955_v6  ;;  %5087 = vmatprep.subr.bf16.mxu1 %v4968_v13  ;;  %v4061_v24 = vld [vmem:[#allocation6 + $0x81] ss:$8 sm:$0xf0]  ;;  %v9705_v16 = vrot.slane %v7993_v59, %v9573_v10  ;;  %v8452_v55 = vpop.permute.xlu0 %3958 }
 0x4c7   :  { %v4287_v46 = vmul.f32 %v9702_v1, %v2871_v50  ;;  %9703 = vst [vmem:[#allocation43_spill] sm:$0xff] %v8440_v22  ;;  %v2703_v18 = vsel %vm9706_vm15, %v8057_v54, %v8211_v29  ;;  %v4135_v2 = vrot.slane %v8106_v41, %v9573_v10  ;;  %5051 = vmatpush2.bf16.msra.mxu0 %v4949_v0  ;;  %v8456_v50 = vpop.permute.xlu1 %2776  ;;  %v3976_v54 = vld [vmem:[#allocation6 + $0x80] ss:$8 sm:$0xf]  ;;  %vm9726_vm13 = vcmp.lt.s32.totalorder %v5619_v12, 1 }
 0x4c8   :  { %9701 = vst [vmem:[#allocation64_spill] sm:$0xff] %v8435_v39  ;;  %v4286_v30 = vmul.f32 %v9705_v16, %v9704_v5  ;;  %5088 = vmatpush2.bf16.msra.mxu1 %v4967_v11  ;;  %9707 = vst [vmem:[#allocation52_spill] sm:$0xff] %v8456_v50  ;;  %v9708_v1 = vrot.slane %v8108_v25, %v9573_v10  ;;  %v3977_v16 = vld [vmem:[#allocation6 + $0x80] ss:$8 sm:$0xf0]  ;;  %v2787_v11 = vsel %vm9709_vm7, %v8079_v32, %v8456_v50 }
 0x4c9   :  { %v4960_v13 = vpack.c.bf16 %v4347_v61, %v4287_v46  ;;  %v8466_v0 = vor.u32 %v4061_v24, %v4060_v31  ;;  %v9710_v40 = vrot.slane %v8053_v33, %v6333_v8  ;;  %v8476_v61 = vmul.f32 %v2815_v26, %v2787_v11  ;;  %v9727_v39 = vld [vmem:[#allocation60_spill] sm:$0xff]  ;;  %vm9729_vm15 = vmmov %vm9726_vm13 }
 0x4ca   :  { %v4959_v6 = vpack.c.bf16 %v4346_v43, %v4286_v30  ;;  %v4226_v5 = vmul.f32 %v9708_v1, %v8270_v28  ;;  %v9712_v43 = vrot.slane %v8106_v41, %v9574_v4  ;;  %v4227_v28 = vmul.f32 %v4199_v56, %v2787_v11  ;;  %v8479_v1 = vpop.permute.xlu0 %4042  ;;  %v9722_v41 = vld [vmem:[#allocation49_spill] sm:$0xff]  ;;  %vm9731_vm7 = vmmov %vm9726_vm13 }
 0x4cb   :  { %v8471_v52 = vmul.f32 %v9710_v40, %v2703_v18  ;;  %9713 = vst [vmem:[#allocation50_spill] sm:$0xff] %v8476_v61  ;;  %5089 = vmatprep.subr.bf16.mxu1 %v4960_v13  ;;  %v4166_v30 = vmul.f32 %v4135_v2, %v8242_v3  ;;  %v8481_v32 = vor.u32 %v3977_v16, %v3976_v54  ;;  %v3957_v24 = vpop.permute.xlu1 %3956 }
 0x4cc   :  { %v4167_v46 = vmul.f32 %v9712_v43, %v2703_v18  ;;  %5090 = vmatpush2.bf16.msra.mxu1 %v4959_v6  ;;  %v4071_v26 = vrot.slane %v8466_v0, %v9562_v47  ;;  %v3973_v3 = vsel %vm1380_vm6, %v8249_v21, %v3957_v24 }
 0x4cd   :  { %9711 = vst [vmem:[#allocation39_spill] sm:$0xff] %v8471_v52  ;;  %v4951_v25 = vpack.c.bf16 %v4226_v5, %v4166_v30  ;;  %v3987_v18 = vrot.slane %v8481_v32, %v9562_v47  ;;  %v3983_v6 = vrot.slane %v8481_v32, %v9566_v58  ;;  %v4067_v47 = vrot.slane %v8466_v0, %v9566_v58 }
 0x4ce   :  { %v4952_v40 = vpack.c.bf16 %v4227_v28, %v4167_v46  ;;  %v8492_v56 = vpop.permute.xlu0 %3700 }
 0x4cf   :  { %v4041_v2 = vpop.permute.xlu1 %4040  ;;  %v4021_v5 = vmul.f32 %v3987_v18, %v3973_v3  ;;  %v9716_v3 = vld [vmem:[#allocation51_spill] sm:$0xff] }
 0x4d0   :  { %5091 = vmatprep.subr.bf16.mxu1 %v4952_v40  ;;  %v4057_v13 = vsel %vm1466_vm14, %v8284_v42, %v4041_v2 }
 0x4d1   :  { %5092 = vmatpush2.bf16.msra.mxu1 %v4951_v25  ;;  %v4105_v54 = vmul.f32 %v4071_v26, %v4057_v13  ;;  %v3974_v25 = vsel %vm1380_vm6, %v8329_v9, %v8249_v21  ;;  %v9715_v26 = vld [vmem:[#allocation37_spill] sm:$0xff]  ;;  %v8519_v13 = vcombine.low %v9716_v3, %v9716_v3 }
 0x4d2   :  { %v8505_v16 = vpop.permute.xlu0 %3798  ;;  %v4020_v28 = vmul.f32 %v3983_v6, %v3974_v25  ;;  %v3915_v21 = vrot.slane %v9715_v26, %v6333_v8  ;;  %v9720_v6 = vld [vmem:[#allocation12_spill] sm:$0xff] }
 0x4d3   :  { %v8507_v11 = vpop.permute.xlu1 %4036  ;;  %v4942_v43 = vpack.c.bf16 %v4105_v54, %v4021_v5  ;;  %9717 = vst [vmem:[#allocation72_spill] sm:$0xff] %v8519_v13  ;;  %v9718_v5 = vld [vmem:[#allocation18_spill] sm:$0xff] }
 0x4d4   :  { %9714 = vst [vmem:[#allocation48_spill] sm:$0xff] %v8507_v11  ;;  %v4058_v46 = vsel %vm1466_vm14, %v8507_v11, %v8284_v42  ;;  %v3886_v54 = vsel %vm1294_vm0, %v9718_v5, %v8414_v60  ;;  %v9719_v42 = vld [vmem:[#allocation46_spill] sm:$0xff] }
 0x4d5   :  { %v4104_v30 = vmul.f32 %v4067_v47, %v4058_v46  ;;  %5052 = vmatprep.subr.bf16.mxu0 %v4942_v43  ;;  %v3835_v47 = vrot.slane %v9720_v6, %v9719_v42  ;;  %v3919_v25 = vrot.slane %v9715_v26, %v9719_v42  ;;  %v3831_v43 = vrot.slane %v9720_v6, %v6333_v8 }
 0x4d6   :  { %v8513_v40 = vpop.permute.xlu0 %3532  ;;  %v3940_v31 = vmul.f32 %v3915_v21, %v3886_v54  ;;  %v3995_v21 = vrot.slane %v8481_v32, %v9574_v4  ;;  %v4079_v54 = vrot.slane %v8466_v0, %v9574_v4  ;;  %v9725_v4 = vld [vmem:[#allocation38_spill] sm:$0xff] }
 0x4d7   :  { %v4941_v58 = vpack.c.bf16 %v4104_v30, %v4020_v28  ;;  %v3797_v18 = vpop.permute.xlu1 %3796  ;;  %v9721_v30 = vld [vmem:[#allocation28_spill] sm:$0xff] }
 0x4d8   :  { %v3801_v46 = vsel %vm1208_vm1, %v8366_v23, %v3797_v18  ;;  %v3802_v3 = vsel %vm1208_vm1, %v9721_v30, %v8366_v23  ;;  %v4075_v23 = vrot.slane %v8466_v0, %v9573_v10  ;;  %v3843_v30 = vrot.slane %v9720_v6, %v9548_v19 }
 0x4d9   :  { %5053 = vmatpush2.bf16.msra.mxu0 %v4941_v58  ;;  %v3857_v9 = vmul.f32 %v3835_v47, %v3801_v46  ;;  %v3856_v59 = vmul.f32 %v3831_v43, %v3802_v3  ;;  %v3991_v47 = vrot.slane %v8481_v32, %v9573_v10  ;;  %v3711_v10 = vsel %vm9726_vm13, %v9725_v4, %v8492_v56 }
 0x4da   :  { %v8534_v28 = vpop.permute.xlu0 %3616 }
 0x4db   :  { %v3881_v5 = vpop.permute.xlu1 %3880  ;;  %v4937_v50 = vpack.c.bf16 %v3940_v31, %v3856_v59  ;;  %v3972_v31 = vsel %vm1380_vm6, %v3957_v24, %v8452_v55 }
 0x4dc   :  { %v3885_v58 = vsel %vm1294_vm0, %v8414_v60, %v3881_v5  ;;  %5055 = vmatmul.mubr.bf16.vlgmr.msra.gmra.mxu0 %v8519_v13  ;;  %v4056_v60 = vsel %vm1466_vm14, %v4041_v2, %v8479_v1  ;;  %v4022_v24 = vmul.f32 %v3991_v47, %v3972_v31  ;;  %v3923_v31 = vrot.slane %v9715_v26, %v9727_v39 }
 0x4dd   :  { %v3941_v11 = vmul.f32 %v3919_v25, %v3885_v58  ;;  %5306 = vmatprep.mubr.msk.bf16.mxu0 %vm9723_vm2, %v9722_v41  ;;  %v4106_v25 = vmul.f32 %v4075_v23, %v4056_v60  ;;  %v3839_v23 = vrot.slane %v9720_v6, %v9727_v39  ;;  %v3800_v6 = vsel %vm1208_vm1, %v3797_v18, %v8505_v16 }
 0x4de   :  { %v3705_v52 = vpop.permute.xlu0 %3704 }
 0x4df   :  { %v8546_v61 = vpop.permute.xlu1 %3960  ;;  %v4938_v27 = vpack.c.bf16 %v3941_v11, %v3857_v9  ;;  %v3858_v29 = vmul.f32 %v3839_v23, %v3800_v6 }
 0x4e0   :  { %v3971_v59 = vsel %vm1380_vm6, %v8452_v55, %v8546_v61 }
 0x4e1   :  { %5104 = vmatprep.subr.bf16.mxu0 %v4938_v27  ;;  %v9724_v27 = vld [vmem:[#allocation22_spill] sm:$0xff]  ;;  %v4023_v43 = vmul.f32 %v3995_v21, %v3971_v59  ;;  %v4943_v21 = vpack.c.bf16 %v4106_v25, %v4022_v24 }
 0x4e2   :  { %5105 = vmatpush1.bf16.msra.mxu0 %v4937_v50  ;;  %v8563_v9 = vpop.permute.xlu0 %3448  ;;  %v3739_v2 = vrot.slane %v9724_v27, %v6333_v8  ;;  %v3743_v55 = vrot.slane %v9724_v27, %v9719_v42  ;;  %v3751_v60 = vrot.slane %v9724_v27, %v9548_v19 }
 0x4e3   :  { %v8570_v11 = vpop.permute.xlu1 %4044 }
 0x4e4   :  { %v4055_v50 = vsel %vm1466_vm14, %v8479_v1, %v8570_v11  ;;  %v3764_v58 = vmul.f32 %v3739_v2, %v3711_v10  ;;  %v9730_v2 = vld [vmem:[#allocation14_spill] sm:$0xff] }
 0x4e5   :  { %v4107_v46 = vmul.f32 %v4079_v54, %v4055_v50  ;;  %v9728_v54 = vld [vmem:[#allocation15_spill] sm:$0xff]  ;;  %v3708_v10 = vsel %vm9731_vm7, %v3705_v52, %v9730_v2  ;;  %v3927_v50 = vrot.slane %v9715_v26, %v9548_v19 }
 0x4e6   :  { %v8584_v3 = vpop.permute.xlu0 %3536  ;;  %v3807_v47 = vsel %vm1208_vm1, %v8505_v16, %v9728_v54  ;;  %v3747_v54 = vrot.slane %v9724_v27, %v9727_v39  ;;  %v9733_v16 = vld [vmem:[#allocation41_spill] sm:$0xff]  ;;  %v3767_v51 = vmul.f32 %v3751_v60, %v3708_v10  ;;  %vm9735_vm1 = vmmov %vm9731_vm7  ;;  %vm9790_vm7 = vcmask 1043456  }
 0x4e7   :  { %v3703_v4 = vpop.permute.xlu1 %3702  ;;  %v4944_v1 = vpack.c.bf16 %v4107_v46, %v4023_v43  ;;  %v3859_v24 = vmul.f32 %v3843_v30, %v3807_v47  ;;  %v9736_v47 = vld [vmem:[#allocation25_spill] sm:$0xff] }
 0x4e8   :  { %v3710_v59 = vsel %vm9729_vm15, %v8492_v56, %v3703_v4  ;;  %v9732_v56 = vld [vmem:[#allocation69_spill] sm:$0xff]  ;;  %v4932_v2 = vpack.c.bf16 %v9678_v44, %v3767_v51 }
 0x4e9   :  { %v3765_v25 = vmul.f32 %v3743_v55, %v3710_v59  ;;  %5093 = vmatprep.subr.bf16.mxu1 %v4944_v1  ;;  %v4929_v46 = vpack.c.bf16 %v9732_v56, %v3764_v58  ;;  %v9734_v1 = vld [vmem:[#allocation23_spill] sm:$0xff] }
 0x4ea   :  { %5094 = vmatpush2.bf16.msra.mxu1 %v4943_v21  ;;  %v8607_v43 = vpop.permute.xlu0 %3198  ;;  %v3709_v21 = vsel %vm9735_vm1, %v3703_v4, %v3705_v52  ;;  %v9737_v52 = vld [vmem:[#allocation32_spill] sm:$0xff]  ;;  %vm9791_vm1 = vmmov %vm9790_vm7 }
 0x4eb   :  { %v3883_v22 = vpop.permute.xlu1 %3882  ;;  %v4930_v18 = vpack.c.bf16 %v9733_v16, %v3765_v25  ;;  %v3766_v59 = vmul.f32 %v3747_v54, %v3709_v21  ;;  %v3627_v4 = vsel %vm1028_vm4, %v9737_v52, %v8534_v28 }
 0x4ec   :  { %v3884_v55 = vsel %vm1294_vm0, %v3881_v5, %v3883_v22  ;;  %v3891_v26 = vsel %vm1294_vm0, %v3883_v22, %v9734_v1  ;;  %v3655_v22 = vrot.slane %v9736_v47, %v6333_v8  ;;  %vm9742_vm0 = vcmp.lt.s32.totalorder %v5619_v12, 9 }
 0x4ed   :  { %v3942_v58 = vmul.f32 %v3923_v31, %v3884_v55  ;;  %v3943_v30 = vmul.f32 %v3927_v50, %v3891_v26  ;;  %5106 = vmatprep.subr.bf16.mxu0 %v4930_v18  ;;  %5096 = vmatmul.mubr.bf16.vlgmr.msra.gmra.mxu1 %v8519_v13  ;;  %v9738_v31 = vld [vmem:[#allocation19_spill] sm:$0xff]  ;;  %v9739_v50 = vld [vmem:[#allocation26_spill] sm:$0xff]  ;;  %vm9744_vm13 = vmmov %vm9742_vm0 }
 0x4ee   :  { %5107 = vmatpush1.bf16.msra.mxu0 %v4929_v46  ;;  %v8621_v27 = vpop.permute.xlu0 %3368  ;;  %5308 = vmatprep.mubr.msk.bf16.mxu1 %vm9723_vm2, %v9722_v41  ;;  %v3575_v6 = vrot.slane %v9738_v31, %v9719_v42  ;;  %v3659_v41 = vrot.slane %v9736_v47, %v9719_v42  ;;  %v3543_v56 = vsel %vm942_vm3, %v9739_v50, %v8513_v40 }
 0x4ef   :  { %v4939_v23 = vpack.c.bf16 %v3942_v58, %v3858_v29  ;;  %v3535_v5 = vpop.permute.xlu1 %3534  ;;  %v4940_v60 = vpack.c.bf16 %v3943_v30, %v3859_v24  ;;  %v3571_v29 = vrot.slane %v9738_v31, %v6333_v8  ;;  %v3680_v51 = vmul.f32 %v3655_v22, %v3627_v4  ;;  %v9741_v30 = vld [vmem:[#allocation29_spill] sm:$0xff] }
 0x4f0   :  { %v3542_v10 = vsel %vm942_vm3, %v8513_v40, %v3535_v5  ;;  %v4931_v46 = vpack.c.bf16 %v7749_v35, %v3766_v59  ;;  %v9740_v40 = vld [vmem:[#allocation31_spill] sm:$0xff]  ;;  %v3459_v35 = vsel %vm9742_vm0, %v9741_v30, %v8563_v9  ;;  %v3663_v50 = vrot.slane %v9736_v47, %v9727_v39 }
 0x4f1   :  { %5145 = vmatprep.subr.bf16.mxu1 %v4940_v60  ;;  %v3597_v54 = vmul.f32 %v3575_v6, %v3542_v10  ;;  %v3596_v18 = vmul.f32 %v3571_v29, %v3543_v56  ;;  %v3487_v58 = vrot.slane %v9740_v40, %v6333_v8  ;;  %v9743_v60 = vld [vmem:[#allocation24_spill] sm:$0xff]  ;;  %v3667_v56 = vrot.slane %v9736_v47, %v9548_v19 }
 0x4f2   :  { %5146 = vmatpush1.bf16.msra.mxu1 %v4939_v23  ;;  %v8641_v25 = vpop.permute.xlu0 %3030  ;;  %v3491_v23 = vrot.slane %v9740_v40, %v9719_v42  ;;  %v3403_v22 = vrot.slane %v9743_v60, %v6333_v8  ;;  %v3407_v59 = vrot.slane %v9743_v60, %v9719_v42 }
 0x4f3   :  { %5147 = vmatprep.subr.bf16.mxu1 %v4932_v2  ;;  %v3619_v44 = vpop.permute.xlu1 %3618  ;;  %v4921_v21 = vpack.c.bf16 %v3680_v51, %v3596_v18  ;;  %v3512_v6 = vmul.f32 %v3487_v58, %v3459_v35  ;;  %v3583_v51 = vrot.slane %v9738_v31, %v9548_v19  ;;  %v9748_v35 = vld [vmem:[#allocation78_spill] sm:$0xff] }
 0x4f4   :  { %v3626_v24 = vsel %vm1028_vm4, %v8534_v28, %v3619_v44 }
 0x4f5   :  { %v3681_v16 = vmul.f32 %v3659_v41, %v3626_v24  ;;  %v3579_v41 = vrot.slane %v9738_v31, %v9727_v39  ;;  %v9746_v31 = vld [vmem:[#allocation40_spill] sm:$0xff] }
 0x4f6   :  { %5148 = vmatpush1.bf16.msra.mxu1 %v4931_v46  ;;  %v8651_v55 = vpop.permute.xlu0 %3200  ;;  %v3323_v18 = vrot.slane %v9746_v31, %v9719_v42 }
 0x4f7   :  { %v3367_v1 = vpop.permute.xlu1 %3366  ;;  %v4922_v26 = vpack.c.bf16 %v3681_v16, %v3597_v54  ;;  %v4635_v54 = vrot.slane %v8065_v63, %v9548_v19  ;;  %v9745_v16 = vld [vmem:[#allocation30_spill] sm:$0xff] }
 0x4f8   :  { %v8670_v4 = vsel %vm770_vm5, %v8294_v62, %v3367_v1  ;;  %v3428_v62 = vmul.f32 %v3403_v22, %v8307_v14  ;;  %v3540_v47 = vsel %vm942_vm3, %v8584_v3, %v9745_v16  ;;  %v3239_v14 = vrot.slane %v7702_v34, %v9719_v42 }
 0x4f9   :  { %5108 = vmatprep.subr.bf16.mxu0 %v4922_v26  ;;  %v3429_v46 = vmul.f32 %v3407_v59, %v8670_v4 }
 0x4fa   :  { %5109 = vmatpush1.bf16.msra.mxu0 %v4921_v21  ;;  %v8659_v28 = vpop.permute.xlu0 %2862  ;;  %v4913_v26 = vpack.c.bf16 %v3512_v6, %v3428_v62  ;;  %v9747_v21 = vld [vmem:[#allocation17_spill] sm:$0xff]  ;;  %v3599_v6 = vmul.f32 %v3583_v51, %v3540_v47  ;;  %v8736_v47 = vsel %vm770_vm5, %v3367_v1, %v8621_v27 }
 0x4fb   :  { %v3451_v52 = vpop.permute.xlu1 %3450 }
 0x4fc   :  { %v3458_v2 = vsel %vm9744_vm13, %v8563_v9, %v3451_v52  ;;  %v3541_v9 = vsel %vm942_vm3, %v3535_v5, %v8584_v3  ;;  %v8709_v3 = vsel %vm598_vm8, %v9748_v35, %v8607_v43  ;;  %vm9753_vm3 = vmmov %vm9742_vm0 }
 0x4fd   :  { %v3513_v29 = vmul.f32 %v3491_v23, %v3458_v2  ;;  %v3598_v23 = vmul.f32 %v3579_v41, %v3541_v9  ;;  %v3495_v9 = vrot.slane %v9740_v40, %v9727_v39  ;;  %vm9802_vm13 = vmmov %vm9791_vm1 }
 0x4fe   :  { %v8677_v10 = vpop.permute.xlu0 %3032 }
 0x4ff   :  { %v3621_v24 = vpop.permute.xlu1 %3620  ;;  %v4914_v30 = vpack.c.bf16 %v3513_v29, %v3429_v46  ;;  %v9749_v29 = vld [vmem:[#allocation33_spill] sm:$0xff] }
 0x500   :  { %v3624_v5 = vsel %vm1028_vm4, %v3621_v24, %v9747_v21  ;;  %v3625_v58 = vsel %vm1028_vm4, %v3619_v44, %v3621_v24  ;;  %v8719_v46 = vmul.f32 %v4635_v54, %v9749_v29  ;;  %v3261_v24 = vmul.f32 %v3239_v14, %v8709_v3  ;;  %vm9754_vm4 = vmmov %vm9742_vm0 }
 0x501   :  { %v3682_v22 = vmul.f32 %v3663_v50, %v3625_v58  ;;  %v3683_v59 = vmul.f32 %v3667_v56, %v3624_v5  ;;  %5110 = vmatprep.subr.bf16.mxu0 %v4914_v30  ;;  %v3411_v56 = vrot.slane %v9743_v60, %v9727_v39  ;;  %v3415_v54 = vrot.slane %v9743_v60, %v9548_v19  ;;  %v9751_v60 = vld [vmem:[#allocation42_spill] sm:$0xff] }
 0x502   :  { %v8711_v2 = vpop.permute.xlu0 %2694  ;;  %5111 = vmatpush1.bf16.msra.mxu0 %v4913_v26  ;;  %v9750_v26 = vld [vmem:[#allocation36_spill] sm:$0xff]  ;;  %v9752_v58 = vld [vmem:[#allocation34_spill] sm:$0xff] }
 0x503   :  { %v3283_v62 = vpop.permute.xlu1 %3282  ;;  %v4923_v16 = vpack.c.bf16 %v3682_v22, %v3598_v23  ;;  %v4924_v50 = vpack.c.bf16 %v3683_v59, %v3599_v6  ;;  %v8742_v21 = vsel %vm770_vm5, %v8621_v27, %v9750_v26  ;;  %v3430_v35 = vmul.f32 %v3411_v56, %v8736_v47  ;;  %v9756_v6 = vld [vmem:[#allocation61_spill] sm:$0xff] }
 0x504   :  { %v8716_v44 = vsel %vm684_vm9, %v8344_v48, %v3283_v62  ;;  %v3499_v48 = vrot.slane %v9740_v40, %v9548_v19  ;;  %v9755_v22 = vpack.c.bf16 %v8357_v36, %v8342_v53  ;;  %v3247_v53 = vrot.slane %v7702_v34, %v9548_v19 }
 0x505   :  { %v3345_v41 = vmul.f32 %v3323_v18, %v8716_v44  ;;  %5149 = vmatprep.subr.bf16.mxu1 %v4924_v50  ;;  %v3327_v56 = vrot.slane %v9746_v31, %v9727_v39  ;;  %vm9762_vm5 = vcmp.lt.s32.totalorder %v5619_v12, 65 }
 0x506   :  { %v8725_v51 = vpop.permute.xlu0 %2864  ;;  %5150 = vmatpush1.bf16.msra.mxu1 %v4923_v16  ;;  %v3155_v16 = vrot.slane %v9756_v6, %v9719_v42 }
 0x507   :  { %v3453_v14 = vpop.permute.xlu1 %3452  ;;  %v4906_v18 = vpack.c.bf16 %v3345_v41, %v3261_v24  ;;  %v3431_v24 = vmul.f32 %v3415_v54, %v8742_v21  ;;  %v3243_v41 = vrot.slane %v7702_v34, %v9727_v39  ;;  %v8926_v13 = vsel %vm254_vm12, %v8659_v28, %v8725_v51 }
 0x508   :  { %v3456_v1 = vsel %vm9753_vm3, %v3453_v14, %v9752_v58  ;;  %v3457_v30 = vsel %vm9754_vm4, %v3451_v52, %v3453_v14  ;;  %v3071_v52 = vrot.slane %v7821_v7, %v9719_v42  ;;  %v8784_v14 = vsel %vm598_vm8, %v8607_v43, %v8651_v55  ;;  %v9758_v58 = vld [vmem:[#allocation55_spill] sm:$0xff]  ;;  %vm9804_vm3 = vmmov %vm9791_vm1 }
 0x509   :  { %5112 = vmatprep.subr.bf16.mxu0 %v4906_v18  ;;  %v3514_v23 = vmul.f32 %v3495_v9, %v3457_v30  ;;  %v3515_v27 = vmul.f32 %v3499_v48, %v3456_v1  ;;  %v3331_v9 = vrot.slane %v9746_v31, %v9548_v19  ;;  %v9757_v48 = vld [vmem:[#allocation82_spill] sm:$0xff]  ;;  %v8799_v1 = vsel %vm598_vm8, %v8651_v55, %v9758_v58 }
 0x50a   :  { %5113 = vmatpush1.bf16.msra.mxu0 %v9755_v22  ;;  %v8757_v59 = vpop.permute.xlu0 %2696  ;;  %v8778_v54 = vsel %vm426_vm10, %v9757_v48, %v8641_v25  ;;  %v2987_v22 = vrot.slane %v9683_v38, %v9719_v42  ;;  %v3263_v58 = vmul.f32 %v3247_v53, %v8799_v1  ;;  %v3075_v53 = vrot.slane %v7821_v7, %v9727_v39 }
 0x50b   :  { %v3115_v50 = vpop.permute.xlu1 %3114  ;;  %v4915_v36 = vpack.c.bf16 %v3514_v23, %v3430_v35  ;;  %v4916_v18 = vpack.c.bf16 %v3515_v27, %v3431_v24  ;;  %v3999_v35 = vrot.slane %v8481_v32, %v6333_v8  ;;  %v4083_v27 = vrot.slane %v8466_v0, %v6333_v8  ;;  %v9759_v24 = vld [vmem:[#allocation27_spill] sm:$0xff] }
 0x50c   :  { %v8789_v34 = vsel %vm512_vm11, %v8378_v37, %v3115_v50  ;;  %v2903_v37 = vrot.slane %v7937_v17, %v9719_v42  ;;  %v3093_v55 = vmul.f32 %v3071_v52, %v8778_v54  ;;  %vm9769_vm8 = vcmp.lt.s32.totalorder %v5619_v12, 73 }
 0x50d   :  { %v3177_v43 = vmul.f32 %v3155_v16, %v8789_v34  ;;  %5151 = vmatprep.subr.bf16.mxu1 %v4916_v18  ;;  %v3262_v16 = vmul.f32 %v3243_v41, %v8784_v14  ;;  %vm9783_vm15 = vmmov %vm9769_vm8 }
 0x50e   :  { %v8802_v30 = vpop.permute.xlu0 %3962  ;;  %5152 = vmatpush1.bf16.msra.mxu1 %v4915_v36 }
 0x50f   :  { %v3285_v23 = vpop.permute.xlu1 %3284  ;;  %v3970_v40 = vsel %vm1380_vm6, %v8546_v61, %v8802_v30  ;;  %v3079_v61 = vrot.slane %v7821_v7, %v9548_v19  ;;  %v3159_v7 = vrot.slane %v9756_v6, %v9727_v39 }
 0x510   :  { %v8817_v48 = vsel %vm684_vm9, %v3285_v23, %v9759_v24  ;;  %v8821_v18 = vsel %vm684_vm9, %v3283_v62, %v3285_v23  ;;  %v8836_v62 = vsel %vm254_vm12, %v8181_v45, %v8659_v28  ;;  %v4898_v23 = vpack.c.bf16 %v3177_v43, %v3093_v55 }
 0x511   :  { %v3346_v52 = vmul.f32 %v3327_v56, %v8821_v18  ;;  %v3347_v41 = vmul.f32 %v3331_v9, %v8817_v48  ;;  %v8850_v45 = vmul.f32 %v3999_v35, %v3970_v40  ;;  %v2925_v55 = vmul.f32 %v2903_v37, %v8836_v62 }
 0x512   :  { %v8840_v24 = vpop.permute.xlu0 %4046  ;;  %5114 = vmatprep.subr.bf16.mxu0 %v4898_v23  ;;  %v3163_v35 = vrot.slane %v9756_v6, %v9548_v19  ;;  %v4627_v6 = vrot.slane %v8065_v63, %v9719_v42  ;;  %v2735_v37 = vrot.slane %v8053_v33, %v9719_v42  ;;  %vm9774_vm9 = vcmp.lt.s32.totalorder %v5619_v12, 72 }
 0x513   :  { %v4907_v56 = vpack.c.bf16 %v3346_v52, %v3262_v16  ;;  %v4054_v9 = vsel %vm1466_vm14, %v8570_v11, %v8840_v24  ;;  %v8848_v36 = vpop.permute.xlu1 %2946  ;;  %v4908_v31 = vpack.c.bf16 %v3347_v41, %v3263_v58  ;;  %9760 = vst [vmem:[#allocation66_spill] sm:$0xff] %v8850_v45  ;;  %v9763_v11 = vpack.c.bf16 %v8400_v20, %v8391_v15  ;;  %v9765_v52 = vld [vmem:[#allocation35_spill] sm:$0xff]  ;;  %v9773_v45 = vld [vmem:[#allocation52_spill] sm:$0xff]  ;;  %vm9793_vm2 = vmmov %vm9774_vm9 }
 0x514   :  { %v8852_v5 = vmul.f32 %v4083_v27, %v4054_v9  ;;  %v8858_v43 = vsel %vm9762_vm5, %v8418_v57, %v8848_v36  ;;  %v4623_v27 = vrot.slane %v8065_v63, %v6333_v8  ;;  %v9764_v57 = vld [vmem:[#allocation65_spill] sm:$0xff]  ;;  %v8881_v15 = vsel %vm426_vm10, %v8641_v25, %v8677_v10  ;;  %v9766_v25 = vld [vmem:[#allocation59_spill] sm:$0xff]  ;;  %vm9794_vm0 = vmmov %vm9793_vm2 }
 0x515   :  { %5115 = vmatpush1.bf16.msra.mxu0 %v9763_v11  ;;  %v3009_v40 = vmul.f32 %v2987_v22, %v8858_v43  ;;  %5153 = vmatprep.subr.bf16.mxu1 %v4908_v31  ;;  %v8875_v16 = vsel %vm426_vm10, %v8677_v10, %v9764_v57  ;;  %v4563_v41 = vrot.slane %v9765_v52, %v6333_v8  ;;  %vm9779_vm10 = vmmov %vm9769_vm8 }
 0x516   :  { %9761 = vst [vmem:[#allocation70_spill] sm:$0xff] %v8852_v5  ;;  %5154 = vmatpush1.bf16.msra.mxu1 %v4907_v56  ;;  %v9767_v56 = vld [vmem:[#allocation20_spill] sm:$0xff]  ;;  %v3094_v11 = vmul.f32 %v3075_v53, %v8881_v15  ;;  %v3095_v57 = vmul.f32 %v3079_v61, %v8875_v16  ;;  %v2739_v53 = vrot.slane %v8053_v33, %v9727_v39  ;;  %v9770_v61 = vld [vmem:[#allocation43_spill] sm:$0xff] }
 0x517   :  { %v3117_v22 = vpop.permute.xlu1 %3116  ;;  %v4890_v58 = vpack.c.bf16 %v3009_v40, %v2925_v55  ;;  %v2819_v9 = vrot.slane %v9767_v56, %v9719_v42  ;;  %v9768_v40 = vld [vmem:[#allocation85_spill] sm:$0xff] }
 0x518   :  { %v8896_v10 = vsel %vm512_vm11, %v3117_v22, %v9766_v25  ;;  %v3121_v23 = vsel %vm512_vm11, %v3115_v50, %v3117_v22  ;;  %v8909_v25 = vsel %vm9769_vm8, %v9768_v40, %v8711_v2  ;;  %v2907_v50 = vrot.slane %v7937_v17, %v9727_v39  ;;  %vm9781_vm11 = vmmov %vm9762_vm5 }
 0x519   :  { %v3178_v20 = vmul.f32 %v3159_v7, %v3121_v23  ;;  %v3179_v55 = vmul.f32 %v3163_v35, %v8896_v10  ;;  %5116 = vmatprep.subr.bf16.mxu0 %v4890_v58  ;;  %v2911_v22 = vrot.slane %v7937_v17, %v9548_v19  ;;  %v9771_v7 = vld [vmem:[#allocation64_spill] sm:$0xff]  ;;  %v4648_v35 = vmul.f32 %v4623_v27, %v8670_v4  ;;  %v9775_v27 = vld [vmem:[#allocation13_spill] sm:$0xff] }
 0x51a   :  { %v9772_v31 = vpack.c.bf16 %v9770_v61, %v9771_v7  ;;  %v4649_v58 = vmul.f32 %v4627_v6, %v8736_v47  ;;  %v4567_v17 = vrot.slane %v9765_v52, %v9719_v42  ;;  %v2991_v4 = vrot.slane %v9683_v38, %v9727_v39 }
 0x51b   :  { %v4899_v26 = vpack.c.bf16 %v3178_v20, %v3094_v11  ;;  %v2779_v40 = vpop.permute.xlu1 %2778  ;;  %v4900_v29 = vpack.c.bf16 %v3179_v55, %v3095_v57  ;;  %v2757_v47 = vmul.f32 %v2735_v37, %v8909_v25  ;;  %v8942_v20 = vsel %vm254_vm12, %v8725_v51, %v9775_v27  ;;  %v9777_v11 = vld [vmem:[#allocation58_spill] sm:$0xff]  ;;  %v9778_v27 = vld [vmem:[#allocation83_spill] sm:$0xff]  ;;  %vm9782_vm12 = vmmov %vm9762_vm5 }
 0x51c   :  { %5117 = vmatpush1.bf16.msra.mxu0 %v9772_v31  ;;  %v8933_v31 = vsel %vm9774_vm9, %v9773_v45, %v2779_v40  ;;  %9776 = vst [vmem:[#allocation56_spill] sm:$0xff] %v8942_v20  ;;  %v2995_v6 = vrot.slane %v9683_v38, %v9548_v19  ;;  %v2743_v45 = vrot.slane %v8053_v33, %v9548_v19 }
 0x51d   :  { %v2841_v28 = vmul.f32 %v2819_v9, %v8933_v31  ;;  %5155 = vmatprep.subr.bf16.mxu1 %v4900_v29  ;;  %v4447_v57 = vrot.slane %v9777_v11, %v9719_v42  ;;  %v2823_v37 = vrot.slane %v9767_v56, %v9727_v39  ;;  %v2827_v51 = vrot.slane %v9767_v56, %v9548_v19 }
 0x51e   :  { %5156 = vmatpush1.bf16.msra.mxu1 %v4899_v26  ;;  %v4985_v55 = vpack.c.bf16 %v4648_v35, %v4648_v35  ;;  %v4986_v61 = vpack.c.bf16 %v4649_v58, %v4649_v58  ;;  %v2926_v29 = vmul.f32 %v2907_v50, %v8926_v13  ;;  %v2927_v38 = vmul.f32 %v2911_v22, %v8942_v20  ;;  %v9780_v26 = vld [vmem:[#allocation44_spill] sm:$0xff] }
 0x51f   :  { %v2949_v9 = vpop.permute.xlu1 %2948  ;;  %v4882_v7 = vpack.c.bf16 %v2841_v28, %v2757_v47  ;;  %v8961_v33 = vsel %vm9779_vm10, %v8757_v59, %v9778_v27  ;;  %v8975_v50 = vsel %vm9783_vm15, %v8711_v2, %v8757_v59  ;;  %v4589_v22 = vmul.f32 %v4567_v17, %v8821_v18  ;;  %v9786_v59 = vld [vmem:[#allocation54_spill] sm:$0xff] }
 0x520   :  { %v8966_v5 = vsel %vm9781_vm11, %v2949_v9, %v9780_v26  ;;  %v2953_v56 = vsel %vm9782_vm12, %v8848_v36, %v2949_v9  ;;  %v9784_v47 = vrot.slane %v8065_v63, %v9727_v39  ;;  %v9785_v36 = vrot.slane %v9751_v60, %v9719_v42  ;;  %v9787_v17 = vld [vmem:[#allocation50_spill] sm:$0xff] }
 0x521   :  { %v3010_v35 = vmul.f32 %v2991_v4, %v2953_v56  ;;  %v3011_v58 = vmul.f32 %v2995_v6, %v8966_v5  ;;  %5118 = vmatprep.subr.bf16.mxu0 %v4882_v7  ;;  %v4443_v2 = vrot.slane %v9777_v11, %v6333_v8  ;;  %v4327_v18 = vrot.slane %v9786_v59, %v9719_v42  ;;  %v9788_v4 = vld [vmem:[#allocation39_spill] sm:$0xff] }
 0x522   :  { %v4650_v28 = vmul.f32 %v9784_v47, %v8742_v21  ;;  %v4529_v9 = vmul.f32 %v9785_v36, %v8784_v14  ;;  %v9789_v6 = vpack.c.bf16 %v9787_v17, %v9788_v4  ;;  %v4588_v7 = vmul.f32 %v4563_v41, %v8716_v44  ;;  %v9792_v36 = vld [vmem:[#allocation67_spill] sm:$0xff] }
 0x523   :  { %v4891_v27 = vpack.c.bf16 %v3010_v35, %v2926_v29  ;;  %v2781_v63 = vpop.permute.xlu1 %2780  ;;  %v4892_v21 = vpack.c.bf16 %v3011_v58, %v2927_v38  ;;  %v5011_v26 = vsel %vm9791_vm1, %v4985_v55, 0  ;;  %v2758_v14 = vmul.f32 %v2739_v53, %v8975_v50 }
 0x524   :  { %5119 = vmatpush1.bf16.msra.mxu0 %v9789_v6  ;;  %v2759_v47 = vmul.f32 %v2743_v45, %v8961_v33  ;;  %v9002_v20 = vsel %vm9793_vm2, %v2781_v63, %v9792_v36  ;;  %v2785_v17 = vsel %vm9794_vm0, %v2779_v40, %v2781_v63  ;;  %v4469_v44 = vmul.f32 %v4447_v57, %v3121_v23  ;;  %v9796_v45 = vld [vmem:[#allocation63_spill] sm:$0xff] }
 0x525   :  { %5305 = vmatprep.subr.msk.bf16.mxu0 %vm9790_vm7, %v4986_v61  ;;  %v2842_v41 = vmul.f32 %v2823_v37, %v2785_v17  ;;  %v2843_v61 = vmul.f32 %v2827_v51, %v9002_v20  ;;  %5157 = vmatprep.subr.bf16.mxu1 %v4892_v21  ;;  %v4978_v29 = vpack.c.bf16 %v4589_v22, %v4529_v9 }
 0x526   :  { %v9795_v53 = vrot.slane %v9751_v60, %v6333_v8  ;;  %v4263_v38 = vrot.slane %v9796_v45, %v6333_v8  ;;  %v4267_v35 = vrot.slane %v9796_v45, %v9719_v42  ;;  %5158 = vmatpush1.bf16.msra.mxu1 %v4891_v27  ;;  %v9797_v23 = vrot.slane %v7823_v49, %v9719_v42 }
 0x527   :  { %v4571_v57 = vrot.slane %v9765_v52, %v9727_v39  ;;  %v4883_v37 = vpack.c.bf16 %v2842_v41, %v2758_v14  ;;  %v9021_v51 = vpop.permute.xlu1 %3964  ;;  %v4391_v22 = vrot.slane %v7823_v49, %v9727_v39  ;;  %v4468_v9 = vmul.f32 %v4443_v2, %v8789_v34  ;;  %v9800_v14 = vld [vmem:[#allocation79_spill] sm:$0xff] }
 0x528   :  { %v4528_v55 = vmul.f32 %v9795_v53, %v8709_v3  ;;  %5125 = vmatpush2.bf16.msra.mxu0 %v5011_v26  ;;  %v4409_v40 = vmul.f32 %v9797_v23, %v8881_v15  ;;  %v4884_v3 = vpack.c.bf16 %v2843_v61, %v2759_v47  ;;  %v4323_v4 = vrot.slane %v9786_v59, %v6333_v8  ;;  %v9798_v15 = vld [vmem:[#allocation80_spill] sm:$0xff] }
 0x529   :  { %5126 = vmatprep.subr.bf16.mxu0 %v4978_v29  ;;  %v4987_v6 = vpack.c.bf16 %v4650_v28, %v4650_v28  ;;  %v4349_v27 = vmul.f32 %v4327_v18, %v2953_v56  ;;  %v4207_v63 = vrot.slane %v9798_v15, %v9719_v42  ;;  %v9799_v21 = vrot.slane %v7823_v49, %v6333_v8 }
 0x52a   :  { %v4977_v58 = vpack.c.bf16 %v4588_v7, %v4528_v55  ;;  %5159 = vmatprep.subr.bf16.mxu1 %v4884_v3  ;;  %v4970_v52 = vpack.c.bf16 %v4469_v44, %v4409_v40  ;;  %v4143_v7 = vrot.slane %v9800_v14, %v6333_v8  ;;  %v4147_v34 = vrot.slane %v9800_v14, %v9719_v42 }
 0x52b   :  { %v4408_v26 = vmul.f32 %v9799_v21, %v8778_v54  ;;  %5160 = vmatpush1.bf16.msra.mxu1 %v4883_v37  ;;  %v4289_v56 = vmul.f32 %v4267_v35, %v8926_v13  ;;  %v4590_v28 = vmul.f32 %v4571_v57, %v8817_v48  ;;  %v4451_v2 = vrot.slane %v9777_v11, %v9727_v39  ;;  %v4049_v54 = vpop.permute.xlu1 %4048  ;;  %v9809_v37 = vld [vmem:[#allocation53_spill] sm:$0xff] }
 0x52c   :  { %5127 = vmatpush2.bf16.msra.mxu0 %v4977_v58  ;;  %v9801_v49 = vpack.c.bf16 %v8719_v46, %v8719_v46  ;;  %v4348_v47 = vmul.f32 %v4323_v4, %v8858_v43  ;;  %v4203_v36 = vrot.slane %v9798_v15, %v6333_v8  ;;  %v4087_v13 = vrot.slane %v8466_v0, %v9719_v42  ;;  %v9811_v4 = vld [vmem:[#allocation56_spill] sm:$0xff]  ;;  %v9814_v21 = vld [vmem:[#allocation21_spill] sm:$0xff] }
 0x52d   :  { %5128 = vmatprep.subr.bf16.mxu0 %v4970_v52  ;;  %v4969_v18 = vpack.c.bf16 %v4468_v9, %v4408_v26  ;;  %v9803_v48 = vrot.slane %v9751_v60, %v9727_v39  ;;  %v4229_v44 = vmul.f32 %v4207_v63, %v2785_v17  ;;  %v5017_v46 = vsel %vm9804_vm3, %v4987_v6, 0  ;;  %v9806_v17 = vld [vmem:[#allocation57_spill] sm:$0xff]  ;;  %v9812_v63 = vld [vmem:[#allocation48_spill] sm:$0xff] }
 0x52e   :  { %5307 = vmatprep.subr.msk.bf16.mxu1 %vm9802_vm13, %v9801_v49  ;;  %v4962_v41 = vpack.c.bf16 %v4349_v27, %v4289_v56  ;;  %v4288_v61 = vmul.f32 %v4263_v38, %v8836_v62  ;;  %v4331_v43 = vrot.slane %v9786_v59, %v9727_v39  ;;  %v4053_v8 = vsel %vm1466_vm14, %v8840_v24, %v4049_v54 }
 0x52f   :  { %v4530_v11 = vmul.f32 %v9803_v48, %v8799_v1  ;;  %5166 = vmatpush2.bf16.msra.mxu1 %v5017_v46  ;;  %v4169_v29 = vmul.f32 %v4147_v34, %v8975_v50  ;;  %v4003_v60 = vrot.slane %v8481_v32, %v9719_v42  ;;  %v9805_v1 = vld [vmem:[#allocation73_spill] sm:$0xff]  ;;  %v4470_v59 = vmul.f32 %v4451_v2, %v8896_v10  ;;  %v4051_v10 = vpop.permute.xlu1 %4050 }
 0x530   :  { %5129 = vmatpush2.bf16.msra.mxu0 %v4969_v18  ;;  %v9807_v55 = vpack.c.bf16 %v9805_v1, %v9806_v17  ;;  %v4961_v62 = vpack.c.bf16 %v4348_v47, %v4288_v61  ;;  %v4228_v38 = vmul.f32 %v4203_v36, %v8933_v31  ;;  %v3969_v24 = vsel %vm1380_vm6, %v8802_v30, %v9021_v51  ;;  %v9808_v31 = vld [vmem:[#allocation71_spill] sm:$0xff]  ;;  %v9817_v47 = vld [vmem:[#allocation70_spill] sm:$0xff] }
 0x531   :  { %v4979_v53 = vpack.c.bf16 %v4590_v28, %v4530_v11  ;;  %5130 = vmatprep.subr.bf16.mxu0 %v4962_v41  ;;  %v4109_v50 = vmul.f32 %v4087_v13, %v4053_v8  ;;  %v4954_v35 = vpack.c.bf16 %v4229_v44, %v4169_v29  ;;  %v4410_v23 = vmul.f32 %v4391_v22, %v8875_v16  ;;  %v9818_v36 = vld [vmem:[#allocation66_spill] sm:$0xff]  ;;  %v9821_v11 = vld [vmem:[#allocation84_spill] sm:$0xff] }
 0x532   :  { %5167 = vmatprep.subr.bf16.mxu1 %v9807_v55  ;;  %v4168_v42 = vmul.f32 %v4143_v7, %v8909_v25  ;;  %v4271_v40 = vrot.slane %v9796_v45, %v9727_v39  ;;  %v4025_v57 = vmul.f32 %v4003_v60, %v3969_v24  ;;  %v9810_v3 = vpack.c.bf16 %v9808_v31, %v9809_v37  ;;  %v3967_v25 = vpop.permute.xlu0 %3966  ;;  %v9816_v7 = vld [vmem:[#allocation45_spill] sm:$0xff] }
 0x533   :  { %5168 = vmatpush2.bf16.msra.mxu1 %v4979_v53  ;;  %v4971_v58 = vpack.c.bf16 %v4470_v59, %v4410_v23  ;;  %v4350_v9 = vmul.f32 %v4331_v43, %v8966_v5  ;;  %v4211_v16 = vrot.slane %v9798_v15, %v9727_v39  ;;  %v4095_v45 = vrot.slane %v8466_v0, %v9548_v19  ;;  %v9813_v15 = vld [vmem:[#allocation16_spill] sm:$0xff] }
 0x534   :  { %5131 = vmatpush2.bf16.msra.mxu0 %v4961_v62  ;;  %5169 = vmatprep.subr.bf16.mxu1 %v9810_v3  ;;  %v4953_v30 = vpack.c.bf16 %v4228_v38, %v4168_v42  ;;  %v4946_v22 = vpack.c.bf16 %v4109_v50, %v4025_v57  ;;  %v4290_v6 = vmul.f32 %v4271_v40, %v9811_v4 }
 0x535   :  { %5132 = vmatprep.subr.bf16.mxu0 %v4954_v35  ;;  %v4151_v27 = vrot.slane %v9800_v14, %v9727_v39  ;;  %v4059_v52 = vsel %vm1466_vm14, %v4051_v10, %v9812_v63  ;;  %v4011_v5 = vrot.slane %v8481_v32, %v9548_v19  ;;  %v9815_v26 = vpack.c.bf16 %v9813_v15, %v9814_v21 }
 0x536   :  { %v3975_v34 = vsel %vm1380_vm6, %v3967_v25, %v9816_v7  ;;  %v4963_v56 = vpack.c.bf16 %v4350_v9, %v4290_v6  ;;  %v4230_v14 = vmul.f32 %v4211_v16, %v9002_v20  ;;  %v4091_v28 = vrot.slane %v8466_v0, %v9727_v39  ;;  %v9820_v0 = vld [vmem:[#allocation86_spill] sm:$0xff] }
 0x537   :  { %5170 = vmatpush2.bf16.msra.mxu1 %v4971_v58  ;;  %v4052_v2 = vsel %vm1466_vm14, %v4049_v54, %v4051_v10  ;;  %v4111_v49 = vmul.f32 %v4095_v45, %v4059_v52  ;;  %v4170_v19 = vmul.f32 %v4151_v27, %v8961_v33  ;;  %v4007_v18 = vrot.slane %v8481_v32, %v9727_v39  ;;  %v9823_v33 = vld [vmem:[#allocation72_spill] sm:$0xff] }
 0x538   :  { %5133 = vmatpush2.bf16.msra.mxu0 %v4953_v30  ;;  %5171 = vmatprep.subr.bf16.mxu1 %v9815_v26  ;;  %v9819_v13 = vpack.c.bf16 %v9817_v47, %v9818_v36  ;;  %v4027_v48 = vmul.f32 %v4011_v5, %v3975_v34  ;;  %v3968_v20 = vsel %vm1380_vm6, %v9021_v51, %v3967_v25 }
 0x539   :  { %5134 = vmatprep.subr.bf16.mxu0 %v4946_v22  ;;  %v9822_v44 = vpack.c.bf16 %v9820_v0, %v9821_v11  ;;  %v4955_v54 = vpack.c.bf16 %v4230_v14, %v4170_v19  ;;  %v4110_v46 = vmul.f32 %v4091_v28, %v4052_v2  ;;  %v4026_v39 = vmul.f32 %v4007_v18, %v3968_v20  ;;  %v5216_v28 = vld [vmem:[%s9133_s5] sm:$0xff]  ;;  %s5440_s5 = smov [#allocation8]  }
 0x53a   :  { %v4948_v41 = vpack.c.bf16 %v4111_v49, %v4027_v48  ;;  %v5220_v19 = vld [vmem:[%s9134_s6] sm:$0xff]  ;;  %s5279_s6 = sshll.u32 %s5440_s5, 4  ;;  %s5280_s6 = int_to_ptr.vmem [resolvable:$true] %s5279_s6 }
 0x53b   :  { %5172 = vmatpush2.bf16.msra.mxu1 %v4963_v56  ;;  %v4947_v32 = vpack.c.bf16 %v4110_v46, %v4026_v39  ;;  %s5393_s0 = scalar_lea.vmem %s5280_s6, 1024  ;;  %p5398_p11 = scmp.lt.s32.totalorder %s5280_s6, %s5280_s6 }
 0x53c   :  { %5135 = vmatpush2.bf16.msra.mxu0 %v9819_v13  ;;  %5173 = vmatprep.subr.bf16.mxu1 %v9822_v44  ;;  %p5394_p10 = scmp.ne.s32.totalorder %s5280_s6, %s5393_s0  ;;  %p5399_p12 = scmp.lt.s32.totalorder %s5393_s0, %s5393_s0 }
 0x53e   :  { %p5400_p13 = por %p5399_p12, %p5398_p11 }
 0x53f   :  { %5137 = vmatmul.mubr.bf16.vlgmr.msra.gmra.mxu0 %v9823_v33  ;;  %5174 = vmatpush2.bf16.msra.mxu1 %v4955_v54 }
 0x540   :  { %5175 = vmatprep.subr.bf16.mxu1 %v4948_v41  ;;  %p5401_p0 = pnand %p5400_p13, %p5394_p10 }
 0x543   :  { %5176 = vmatpush2.bf16.msra.mxu1 %v4947_v32 }
 0x546   :  { %5178 = vmatmul.mubr.bf16.vlgmr.msra.gmra.mxu1 %v9823_v33 }
 0x59c   :  { %v5056_v61 = vpop.f32.mrf.mxu0 }
 0x59d   :  { %v5196_v1 = vmul.f32 %v5056_v61, %v5056_v61 }
 0x59e   :  { %v5058_v43 = vpop.f32.mrf.mxu0 }
 0x59f   :  { %v5197_v17 = vmul.f32 %v5058_v43, %v5058_v43  ;;  %v5186_v55 = vadd.f32 %v5058_v43, %v5056_v61 }
 0x5a0   :  { %v5060_v12 = vpop.f32.mrf.mxu0 }
 0x5a1   :  { %v5204_v62 = vadd.f32 %v5197_v17, %v5196_v1  ;;  %v5345_v17 = vld [vmem:[#allocation3] sm:$0xff] }
 0x5a2   :  { %v5061_v51 = vpop.f32.mrf.mxu0 }
 0x5ad   :  { %v5097_v8 = vpop.f32.mrf.mxu1 }
 0x5ae   :  { %v5198_v59 = vmul.f32 %v5097_v8, %v5097_v8  ;;  %v5187_v38 = vadd.f32 %v5186_v55, %v5097_v8 }
 0x5af   :  { %v5099_v29 = vpop.f32.mrf.mxu1 }
 0x5b0   :  { %v5205_v24 = vadd.f32 %v5204_v62, %v5198_v59  ;;  %v5199_v50 = vmul.f32 %v5099_v29, %v5099_v29  ;;  %v5188_v23 = vadd.f32 %v5187_v38, %v5099_v29  ;;  %v5346_v62 = vld [vmem:[#allocation3 + $0x8] sm:$0xff]  ;;  %v5349_v38 = vld [vmem:[#allocation3 + $0x20] sm:$0xff] }
 0x5b1   :  { %v5101_v53 = vpop.f32.mrf.mxu1 }
 0x5b2   :  { %v5206_v57 = vadd.f32 %v5205_v24, %v5199_v50  ;;  %v5350_v50 = vld [vmem:[#allocation3 + $0x28] sm:$0xff] }
 0x5b3   :  { %v5102_v60 = vpop.f32.mrf.mxu1 }
 0x5ff   :  { %v5138_v35 = vpop.f32.mrf.mxu0 }
 0x600   :  { %v5200_v42 = vmul.f32 %v5138_v35, %v5138_v35  ;;  %v5189_v10 = vadd.f32 %v5188_v23, %v5138_v35  ;;  %v5351_v23 = vld [vmem:[#allocation3 + $0x30] sm:$0xff] }
 0x601   :  { %v5140_v40 = vpop.f32.mrf.mxu0 }
 0x602   :  { %v5207_v37 = vadd.f32 %v5206_v57, %v5200_v42  ;;  %v5201_v3 = vmul.f32 %v5140_v40, %v5140_v40  ;;  %v5190_v30 = vadd.f32 %v5189_v10, %v5140_v40 }
 0x603   :  { %v5142_v31 = vpop.f32.mrf.mxu0 }
 0x604   :  { %v5208_v16 = vadd.f32 %v5207_v37, %v5201_v3 }
 0x605   :  { %v5143_v58 = vpop.f32.mrf.mxu0 }
 0x606   :  { %v5179_v9 = vpop.f32.mrf.mxu1 }
 0x607   :  { %v5191_v25 = vadd.f32 %v5190_v30, %v5179_v9  ;;  %v5202_v45 = vmul.f32 %v5179_v9, %v5179_v9 }
 0x608   :  { %v5181_v22 = vpop.f32.mrf.mxu1 }
 0x609   :  { %v5209_v4 = vadd.f32 %v5208_v16, %v5202_v45  ;;  %v5192_v6 = vadd.f32 %v5191_v25, %v5181_v22  ;;  %v5203_v27 = vmul.f32 %v5181_v22, %v5181_v22 }
 0x60a   :  { %v5183_v63 = vpop.f32.mrf.mxu1 }
 0x60b   :  { %5193 = vadd.xlane.f32.xlu0 %v5192_v6  ;;  %v5210_v52 = vadd.f32 %v5209_v4, %v5203_v27 }
 0x60c   :  { %v5184_v5 = vpop.f32.mrf.mxu1 }
 0x60d   :  { %5211 = vadd.xlane.f32.xlu1 %v5210_v52 }
 0x694   :  { %v5194_v15 = vpop.xlane.xlu0 %5193 }
 0x695   :  { %v5195_v21 = vmul.f32 0.0009765625, %v5194_v15 }
 0x696   :  { %v5212_v26 = vpop.xlane.xlu1 %5211 }
 0x697   :  { %v5214_v7 = vmul.f32 %v5195_v21, %v5195_v21  ;;  %v5213_v34 = vmul.f32 0.0009765625, %v5212_v26 }
 0x699   :  { %v5215_v56 = vsub.f32 %v5213_v34, %v5214_v7 }
 0x69b   :  { %v5217_v14 = vadd.f32 1e-05, %v5215_v56 }
 0x69d   :  { %5339 = vrsqrt.f32 %v5217_v14 }
 0x6aa   :  { %v5340_v2 = vpop.eup %5339 }
 0x6ab   :  { %v5219_v49 = vmul.f32 %v5340_v2, %v5216_v28 }
 0x6ad   :  { %5225 = vperm.xlu0 %5331, %v5219_v49   ;;  %v5221_v18 = vmul.f32 %v5219_v49, %v5195_v21 }
 0x6af   :  { %v5222_v47 = vsub.f32 %v5220_v19, %v5221_v18 }
 0x6b1   :  { %5238 = vperm.xlu1 %5332, %v5222_v47  }
 0x728   :  { %v5226_v36 = vpop.permute.xlu0 %5225 }
 0x729   :  { %v5228_v13 = vmul.f32 %v5226_v36, %v5056_v61  ;;  %v5229_v48 = vmul.f32 %v5226_v36, %v5058_v43  ;;  %v5230_v20 = vmul.f32 %v5226_v36, %v5097_v8  ;;  %v5231_v0 = vmul.f32 %v5226_v36, %v5099_v29  ;;  %v5347_v43 = vld [vmem:[#allocation3 + $0x10] sm:$0xff]  ;;  %v5348_v29 = vld [vmem:[#allocation3 + $0x18] sm:$0xff] }
 0x72a   :  { %v5232_v11 = vmul.f32 %v5226_v36, %v5138_v35  ;;  %v5233_v44 = vmul.f32 %v5226_v36, %v5140_v40  ;;  %v5234_v54 = vmul.f32 %v5226_v36, %v5179_v9  ;;  %v5235_v46 = vmul.f32 %v5226_v36, %v5181_v22  ;;  %v5352_v40 = vld [vmem:[#allocation3 + $0x38] sm:$0xff] }
 0x72c   :  { %v5239_v33 = vpop.permute.xlu1 %5238 }
 0x72d   :  { %v5241_v41 = vadd.f32 %v5239_v33, %v5228_v13  ;;  %v5242_v39 = vadd.f32 %v5239_v33, %v5229_v48  ;;  %v5243_v32 = vadd.f32 %v5239_v33, %v5230_v20  ;;  %v5244_v12 = vadd.f32 %v5239_v33, %v5231_v0 }
 0x72e   :  { %v5245_v51 = vadd.f32 %v5239_v33, %v5232_v11  ;;  %v5246_v53 = vadd.f32 %v5239_v33, %v5233_v44  ;;  %v5247_v60 = vadd.f32 %v5239_v33, %v5234_v54  ;;  %v5248_v1 = vadd.f32 %v5239_v33, %v5235_v46 }
 0x72f   :  { %v5249_v55 = vadd.f32 %v5345_v17, %v5241_v41  ;;  %v5250_v61 = vadd.f32 %v5346_v62, %v5242_v39  ;;  %v5251_v8 = vadd.f32 %v5347_v43, %v5243_v32  ;;  %v5252_v59 = vadd.f32 %v5348_v29, %v5244_v12 }
 0x730   :  { %v5253_v24 = vadd.f32 %v5349_v38, %v5245_v51  ;;  %v5254_v35 = vadd.f32 %v5350_v50, %v5246_v53  ;;  %v5255_v42 = vadd.f32 %v5351_v23, %v5247_v60  ;;  %v5256_v57 = vadd.f32 %v5352_v40, %v5248_v1 }
 0x731   :  { %v5257_v10 = vmax.f32 %v5249_v55, 0.0  ;;  %v5258_v31 = vmax.f32 %v5250_v61, 0.0  ;;  %v5259_v37 = vmax.f32 %v5251_v8, 0.0  ;;  %v5260_v3 = vmax.f32 %v5252_v59, 0.0 }
 0x732   :  { %v5261_v58 = vmax.f32 %v5253_v24, 0.0  ;;  %v5262_v30 = vmax.f32 %v5254_v35, 0.0  ;;  %v5263_v9 = vmax.f32 %v5255_v42, 0.0  ;;  %v5264_v16 = vmax.f32 %v5256_v57, 0.0 }
 0x733   :  { %5265 = vst [vmem:[#allocation8] sm:$0xff] %v5257_v10  ;;  %5266 = vst [vmem:[#allocation8 + $0x8] sm:$0xff] %v5258_v31 }
 0x734   :  { %5267 = vst [vmem:[#allocation8 + $0x10] sm:$0xff] %v5259_v37  ;;  %5268 = vst [vmem:[#allocation8 + $0x18] sm:$0xff] %v5260_v3 }
 0x735   :  { %5269 = vst [vmem:[#allocation8 + $0x20] sm:$0xff] %v5261_v58  ;;  %5270 = vst [vmem:[#allocation8 + $0x28] sm:$0xff] %v5262_v30 }
 0x736   :  { %5271 = vst [vmem:[#allocation8 + $0x30] sm:$0xff] %v5263_v9  ;;  %5272 = vst [vmem:[#allocation8 + $0x38] sm:$0xff] %v5264_v16 }
 0x737   :  { %5404 = shalt.err (!%p5401_p0)
}
 0x738   :  { %5282 = dma.vmem_to_hbm [thread:$0]  %s5280_s6, 1024, %s9136_s8, [#allocation5]  }
 0x739   :  { %5417 = dma.done.wait [#allocation5], 1024  }
 0x73a   :  { %5418 = vsyncadd [#allocation5], 4294966272 }
 0x73b   :  { %5286 = vsyncpa [#allocation4], 1 }
 0x73c   :  { %5287 = vsyncpa [#allocation7], 1 }
 0x73d   :  { %5288 = vsyncpa [#allocation5], 1 }

</bundles_post_ra>
